<compile_context>
chip_gen: v7x
topology: tpu7x:2x2x1
jax: 0.10.0
libtpu: 0.0.40
codegen_flags: <defaults>
</compile_context>

<pallas_src>
import jax
import jax.numpy as jnp
from jax.experimental import pallas as pl
from jax.experimental.pallas import tpu as pltpu

K_NEIGHBORS = 16
K = K_NEIGHBORS + 1          # PPFConv adds self loops (add_self_loops=True)
HIDDEN = 32
CLASSES = 4
TM_MAX = 256                 # node tile for conv / pool / dist rows
TC_DIST = 512                # dist column (lane) tile for the large-N path
POS_BIG = 1e30


def _round_up(x, m):
    return ((x + m - 1) // m) * m


def _tiles_for(n):
    """Pick node tile (tm), dist column tile (tc) and padded node count."""
    if n <= TM_MAX:
        tm = _round_up(max(n, 32), 32)   # multiple of 32 -> bf16 tile safe
        return tm, tm, tm                # single tile, dist cols = full width
    tm = TM_MAX
    tc = TC_DIST
    n_pad = _round_up(n, max(tm, tc))
    return tm, tc, n_pad


# ---------------------------------------------------------------------------
# Kernel 1: masked pairwise squared distances (for knn_graph)
#   2-D ("parallel","parallel") grid, asymmetric (tm, 512) lane-dense blocks.
# ---------------------------------------------------------------------------
def _dist_kernel(pos_ref, posT_ref, bi_ref, bj_ref, out_ref):
    pi = pos_ref[...]                                     # (TR, 3)
    pjT = posT_ref[...]                                   # (3, TC)
    gram = jnp.dot(pi, pjT, preferred_element_type=jnp.float32)      # (TR, TC)
    sq_i = jnp.sum(pi * pi, axis=1, keepdims=True)        # (TR, 1)
    sq_j = jnp.sum(pjT * pjT, axis=0, keepdims=True)      # (1, TC)
    d = sq_i + sq_j - 2.0 * gram
    bi = bi_ref[...]
    bj = bj_ref[...]
    same_graph = (bi == bj) & (bi >= 0)                   # mask padded nodes too
    tr, tc = d.shape
    rows = jax.lax.broadcasted_iota(jnp.int32, d.shape, 0) + pl.program_id(0) * tr
    cols = jax.lax.broadcasted_iota(jnp.int32, d.shape, 1) + pl.program_id(1) * tc
    valid = same_graph & (rows != cols)                   # loop=False
    out_ref[...] = jnp.where(valid, d, POS_BIG)


def pairwise_dist(pos, batch, tr, tc):
    n = pos.shape[0]
    posT = jnp.transpose(pos)                             # (3, N)
    bcol = batch.reshape(n, 1)
    brow = batch.reshape(1, n)
    return pl.pallas_call(
        _dist_kernel,
        out_shape=jax.ShapeDtypeStruct((n, n), jnp.float32),
        grid=(n // tr, n // tc),
        in_specs=[
            pl.BlockSpec((tr, 3), lambda i, j: (i, 0)),
            pl.BlockSpec((3, tc), lambda i, j: (0, j)),
            pl.BlockSpec((tr, 1), lambda i, j: (i, 0)),
            pl.BlockSpec((1, tc), lambda i, j: (0, j)),
        ],
        out_specs=pl.BlockSpec((tr, tc), lambda i, j: (i, j)),
        compiler_params=pltpu.CompilerParams(
            dimension_semantics=("parallel", "parallel")),
    )(pos, posT, bcol, brow)


# ---------------------------------------------------------------------------
# Kernel 2: PPFConv layers (K folded into the matmul M dimension)
#   feat tiles : (K*TM, C) bf16, rows k-major within the node tile
#   h_i        = relu( max_k  (relu(feat_k @ W1 + b1) @ W2) + b2 )
# ---------------------------------------------------------------------------
def _max_over_k(m, tm, n_k):
    """Tree max over the K row-slabs of an (n_k*tm, H) f32 value."""
    parts = [m[kk * tm:(kk + 1) * tm] for kk in range(n_k)]
    while len(parts) > 1:
        nxt = [jnp.maximum(parts[i], parts[i + 1])
               for i in range(0, len(parts) - 1, 2)]
        if len(parts) % 2:
            nxt.append(parts[-1])
        parts = nxt
    return parts[0]


def _conv1_kernel(ppf_ref, w1_ref, b1_ref, w2_ref, b2_ref, out_ref):
    tm = out_ref.shape[0]
    n_k = ppf_ref.shape[0] // tm
    a = jnp.dot(ppf_ref[...], w1_ref[...],
                preferred_element_type=jnp.float32)                   # (K*TM, H)
    a = jnp.maximum(a + b1_ref[...], 0.0)                             # mlp ReLU (f32)
    m = jnp.dot(a.astype(jnp.bfloat16), w2_ref[...],
                preferred_element_type=jnp.float32)                   # (K*TM, H)
    agg = _max_over_k(m, tm, n_k)                                     # 'max' aggr
    out_ref[...] = jnp.maximum(agg + b2_ref[...], 0.0).astype(out_ref.dtype)


def _conv2_kernel(xj_ref, ppf_ref, w1x_ref, w1p_ref, b1_ref, w2_ref, b2_ref,
                  out_ref):
    tm = out_ref.shape[0]
    n_k = xj_ref.shape[0] // tm
    # implicit concat([x_j, ppf]) @ W1 via two matmuls with split weight slabs
    a = jnp.dot(xj_ref[...], w1x_ref[...], preferred_element_type=jnp.float32)
    a = a + jnp.dot(ppf_ref[...], w1p_ref[...],
                    preferred_element_type=jnp.float32)
    a = jnp.maximum(a + b1_ref[...], 0.0)
    m = jnp.dot(a.astype(jnp.bfloat16), w2_ref[...],
                preferred_element_type=jnp.float32)
    agg = _max_over_k(m, tm, n_k)
    out_ref[...] = jnp.maximum(agg + b2_ref[...], 0.0).astype(out_ref.dtype)


def ppf_conv1(ppf_tiles, params, n_pad, tm):
    w1, b1, w2, b2 = params
    n_tiles, km, cin = ppf_tiles.shape
    hid = w1.shape[1]
    return pl.pallas_call(
        _conv1_kernel,
        out_shape=jax.ShapeDtypeStruct((n_pad, hid), jnp.bfloat16),
        grid=(n_tiles,),
        in_specs=[
            pl.BlockSpec((None, km, cin), lambda i: (i, 0, 0)),
            pl.BlockSpec((cin, hid), lambda i: (0, 0)),
            pl.BlockSpec((1, hid), lambda i: (0, 0)),
            pl.BlockSpec((hid, hid), lambda i: (0, 0)),
            pl.BlockSpec((1, hid), lambda i: (0, 0)),
        ],
        out_specs=pl.BlockSpec((tm, hid), lambda i: (i, 0)),
        compiler_params=pltpu.CompilerParams(dimension_semantics=("parallel",)),
    )(ppf_tiles, w1, b1, w2, b2)


def ppf_conv2(xj_tiles, ppf_tiles, params, n_pad, tm):
    w1x, w1p, b1, w2, b2 = params
    n_tiles, km, cx = xj_tiles.shape
    cp = ppf_tiles.shape[2]
    hid = w1x.shape[1]
    return pl.pallas_call(
        _conv2_kernel,
        out_shape=jax.ShapeDtypeStruct((n_pad, hid), jnp.bfloat16),
        grid=(n_tiles,),
        in_specs=[
            pl.BlockSpec((None, km, cx), lambda i: (i, 0, 0)),
            pl.BlockSpec((None, km, cp), lambda i: (i, 0, 0)),
            pl.BlockSpec((cx, hid), lambda i: (0, 0)),
            pl.BlockSpec((cp, hid), lambda i: (0, 0)),
            pl.BlockSpec((1, hid), lambda i: (0, 0)),
            pl.BlockSpec((hid, hid), lambda i: (0, 0)),
            pl.BlockSpec((1, hid), lambda i: (0, 0)),
        ],
        out_specs=pl.BlockSpec((tm, hid), lambda i: (i, 0)),
        compiler_params=pltpu.CompilerParams(dimension_semantics=("parallel",)),
    )(xj_tiles, ppf_tiles, w1x, w1p, b1, w2, b2)


# ---------------------------------------------------------------------------
# Kernel 3: global_mean_pool + classifier (streamed over node tiles)
# ---------------------------------------------------------------------------
def _pool_cls_kernel(p_ref, h_ref, wc_ref, bc_ref, out_ref, acc_ref):
    @pl.when(pl.program_id(0) == 0)
    def _():
        acc_ref[...] = jnp.zeros_like(acc_ref)

    acc_ref[...] += jnp.dot(p_ref[...], h_ref[...].astype(jnp.float32),
                            preferred_element_type=jnp.float32)      # (B, H)

    @pl.when(pl.program_id(0) == pl.num_programs(0) - 1)
    def _():
        out_ref[...] = jnp.dot(acc_ref[...], wc_ref[...],
                               preferred_element_type=jnp.float32) + bc_ref[...]


def pool_classifier(P, h, params, tile):
    wc, bc = params
    B, n_pad = P.shape
    hid = h.shape[1]
    C = wc.shape[1]
    return pl.pallas_call(
        _pool_cls_kernel,
        out_shape=jax.ShapeDtypeStruct((B, C), jnp.float32),
        grid=(n_pad // tile,),
        in_specs=[
            pl.BlockSpec((B, tile), lambda i: (0, i)),
            pl.BlockSpec((tile, hid), lambda i: (i, 0)),
            pl.BlockSpec((hid, C), lambda i: (0, 0)),
            pl.BlockSpec((1, C), lambda i: (0, 0)),
        ],
        out_specs=pl.BlockSpec((B, C), lambda i: (0, 0)),
        scratch_shapes=[pltpu.VMEM((B, hid), jnp.float32)],
        compiler_params=pltpu.CompilerParams(dimension_semantics=("arbitrary",)),
    )(P, h, wc, bc)


# ---------------------------------------------------------------------------
# JAX glue: point-pair features (exact torch_geometric semantics)
# TODO(synk): atan2 / top_k have no guaranteed Mosaic lowering, so the PPF
#             angle features and the knn index selection stay in plain JAX.
# ---------------------------------------------------------------------------
def point_pair_features(pos_i, pos_j, n_i, n_j):
    d = pos_j - pos_i

    def get_angle(v1, v2):
        cross = jnp.cross(v1, v2)
        return jnp.arctan2(jnp.linalg.norm(cross, axis=-1),
                           jnp.sum(v1 * v2, axis=-1))

    return jnp.stack([
        jnp.linalg.norm(d, axis=-1),
        get_angle(n_i, d),
        get_angle(n_j, d),
        get_angle(n_i, n_j),
    ], axis=-1)


def _to_tiles(feat_nkc, tm):
    """(N_pad, K, C) node-major -> (num_tiles, K*TM, C) with k-major rows."""
    n_pad, kk, c = feat_nkc.shape
    n_tiles = n_pad // tm
    return (feat_nkc.reshape(n_tiles, tm, kk, c)
            .transpose(0, 2, 1, 3)
            .reshape(n_tiles, kk * tm, c))


def ppfnet_forward(pos, batch, normal, params, num_graphs):
    N = pos.shape[0]
    tm, tc_dist, n_pad = _tiles_for(N)
    pad = n_pad - N
    n_tiles = n_pad // tm

    posp = jnp.pad(pos.astype(jnp.float32), ((0, pad), (0, 0)))
    normp = jnp.pad(normal.astype(jnp.float32), ((0, pad), (0, 0)))
    batchp = jnp.pad(batch.astype(jnp.int32), (0, pad), constant_values=-1)

    # --- knn_graph(k=16, loop=False), batched ---
    D = pairwise_dist(posp, batchp, tm, tc_dist)          # (N_pad, N_pad) masked
    vals, nbr = jax.lax.top_k(-D, K_NEIGHBORS)            # (N_pad, 16)
    self_idx = jnp.arange(n_pad, dtype=nbr.dtype)[:, None]
    # graphs with <= 16 points (and padded rows): replace masked entries by self
    nbr = jnp.where(vals < -0.5 * POS_BIG, self_idx, nbr)
    idx = jnp.concatenate([nbr, self_idx], axis=1)        # (N_pad, K) incl. self

    # --- point pair features per (i, j) edge ---
    pos_i = posp[:, None, :]                              # (N_pad, 1, 3)
    pos_j = posp[idx]                                     # (N_pad, K, 3)
    n_i = normp[:, None, :]
    n_j = normp[idx]
    ppf = point_pair_features(pos_i, pos_j, n_i, n_j)     # (N_pad, K, 4) f32

    # bf16 feature streams; ppf tiles reused by both conv layers
    ppf_tiles = _to_tiles(ppf.astype(jnp.bfloat16), tm)   # (nT, K*TM, 4)
    # tile-ordered edge indices (tiny) so the conv2 gather lands directly in
    # the kernel layout — no 17x-expanded concat / transpose intermediates.
    idx_tiles = (idx.reshape(n_tiles, tm, K)
                 .transpose(0, 2, 1)
                 .reshape(n_tiles, K * tm))

    # --- conv1 (x=None) + relu ---
    w11, b11, w12, b12 = params["conv1"]
    h = ppf_conv1(ppf_tiles,
                  (w11.astype(jnp.bfloat16), b11,
                   w12.astype(jnp.bfloat16), b12), n_pad, tm)          # (N_pad, H) bf16

    # --- conv2 (x=h) + relu ---
    # TODO(synk): move this row gather inside the kernel (VMEM-resident h +
    #             SMEM index block) once dynamic row-gather lowering is proven.
    xj_tiles = h[idx_tiles]                               # (nT, K*TM, H) bf16 gather
    w2x, w2p, b21, w22, b22 = params["conv2"]
    h = ppf_conv2(xj_tiles, ppf_tiles,
                  (w2x.astype(jnp.bfloat16), w2p.astype(jnp.bfloat16), b21,
                   w22.astype(jnp.bfloat16), b22), n_pad, tm)          # (N_pad, H) bf16

    # --- global_mean_pool + classifier ---
    onehot = (batchp[None, :] ==
              jnp.arange(num_graphs, dtype=jnp.int32)[:, None]).astype(jnp.float32)
    counts = jnp.maximum(jnp.sum(onehot, axis=1, keepdims=True), 1.0)
    P = onehot / counts                                   # (B, N_pad)
    return pool_classifier(P, h, params["cls"], tm)       # (B, classes)


# ---------------------------------------------------------------------------
# Deterministic parameter init (PyTorch Linear-style uniform bounds)
# Weights are stored transposed, i.e. (in_features, out_features).
# conv2's Linear(H+4, H) is split row-wise: rows 0..H-1 -> x_j, rows H..H+3 ->
# ppf (matches torch_geometric's cat([x_j, pseudo]) order).
# ---------------------------------------------------------------------------
def init_params(key, hidden=HIDDEN, classes=CLASSES):
    keys = jax.random.split(key, 5)

    def lin(k, fan_in, fan_out):
        kw, kb = jax.random.split(k)
        bound = 1.0 / jnp.sqrt(jnp.float32(fan_in))
        w = jax.random.uniform(kw, (fan_in, fan_out), jnp.float32, -bound, bound)
        b = jax.random.uniform(kb, (1, fan_out), jnp.float32, -bound, bound)
        return w, b

    w11, b11 = lin(keys[0], 4, hidden)                    # Linear(0+4, H)
    w12, b12 = lin(keys[1], hidden, hidden)               # Linear(H, H)
    w21, b21 = lin(keys[2], hidden + 4, hidden)           # Linear(H+4, H)
    w22, b22 = lin(keys[3], hidden, hidden)               # Linear(H, H)
    wc, bc = lin(keys[4], hidden, classes)                # classifier

    return {
        "conv1": (w11, b11, w12, b12),
        "conv2": (w21[:hidden], w21[hidden:], b21, w22, b22),  # (x_j slab, ppf slab)
        "cls": (wc, bc),
    }


if __name__ == "__main__":
    key = jax.random.PRNGKey(0)
    k_pos, k_norm, k_param = jax.random.split(key, 3)

    pts_per_graph, num_graphs = 32, 2
    N = pts_per_graph * num_graphs

    pos = jax.random.normal(k_pos, (N, 3), jnp.float32)
    normal = jax.random.normal(k_norm, (N, 3), jnp.float32)
    normal = normal / jnp.linalg.norm(normal, axis=-1, keepdims=True)
    batch = jnp.repeat(jnp.arange(num_graphs, dtype=jnp.int32), pts_per_graph)

    params = init_params(k_param)

    forward = jax.jit(ppfnet_forward, static_argnums=(4,))
    out = forward(pos, batch, normal, params, num_graphs)
    out = jax.block_until_ready(out)
    assert out.shape == (num_graphs, CLASSES) and out.dtype == jnp.float32
    assert bool(jnp.all(jnp.isfinite(out)))
    print("KERNEL_OK")
</pallas_src>

<mosaic_0001>
module attributes {stable_mosaic.version = 11 : i64} {
  func.func @_dist_kernel(%arg0: i32, %arg1: i32, %arg2: memref<64x3xf32, #tpu.memory_space<vmem>>, %arg3: memref<3x64xf32, #tpu.memory_space<vmem>>, %arg4: memref<64x1xi32, #tpu.memory_space<vmem>>, %arg5: memref<1x64xi32, #tpu.memory_space<vmem>>, %arg6: memref<64x64xf32, #tpu.memory_space<vmem>>) attributes {dimension_semantics = [#tpu.dimension_semantics<parallel>, #tpu.dimension_semantics<parallel>], iteration_bounds = array<i64: 1, 1>, scalar_prefetch = 0 : i64, scratch_operands = 0 : i64, tpu.core_type = #tpu.core_type<tc>, window_params = [{transform_indices = @transform_0, window_bounds = array<i64: 64, 3>}, {transform_indices = @transform_1, window_bounds = array<i64: 3, 64>}, {transform_indices = @transform_2, window_bounds = array<i64: 64, 1>}, {transform_indices = @transform_3, window_bounds = array<i64: 1, 64>}, {transform_indices = @transform_4, window_bounds = array<i64: 64, 64>}]} {
    %c0 = arith.constant 0 : index
    %c0_0 = arith.constant 0 : index
    %0 = vector.load %arg2[%c0, %c0_0] : memref<64x3xf32, #tpu.memory_space<vmem>>, vector<64x3xf32>
    %c0_1 = arith.constant 0 : index
    %c0_2 = arith.constant 0 : index
    %1 = vector.load %arg3[%c0_1, %c0_2] : memref<3x64xf32, #tpu.memory_space<vmem>>, vector<3x64xf32>
    %cst = arith.constant dense<0.000000e+00> : vector<64x64xf32>
    %2 = tpu.matmul %0, %1, %cst {dimension_numbers = #tpu.dot_dimension_numbers<[1], [0], [0], [1], [0, 0, 1, 1], [], []>} : vector<64x3xf32>, vector<3x64xf32>, vector<64x64xf32> -> vector<64x64xf32>
    %3 = arith.mulf %0, %0 : vector<64x3xf32>
    %cst_3 = arith.constant dense<0.000000e+00> : vector<64xf32>
    %4 = vector.multi_reduction <add>, %3, %cst_3 [1] : vector<64x3xf32> to vector<64xf32>
    %5 = vector.shape_cast %4 : vector<64xf32> to vector<64x1xf32>
    %6 = arith.mulf %1, %1 : vector<3x64xf32>
    %cst_4 = arith.constant dense<0.000000e+00> : vector<64xf32>
    %7 = vector.multi_reduction <add>, %6, %cst_4 [0] : vector<3x64xf32> to vector<64xf32>
    %8 = vector.shape_cast %7 : vector<64xf32> to vector<1x64xf32>
    %9 = vector.broadcast %5 : vector<64x1xf32> to vector<64x64xf32>
    %10 = vector.broadcast %8 : vector<1x64xf32> to vector<64x64xf32>
    %11 = arith.addf %9, %10 : vector<64x64xf32>
    %cst_5 = arith.constant 2.000000e+00 : f32
    %12 = vector.broadcast %cst_5 : f32 to vector<64x64xf32>
    %13 = arith.mulf %12, %2 : vector<64x64xf32>
    %14 = arith.subf %11, %13 : vector<64x64xf32>
    %c0_6 = arith.constant 0 : index
    %c0_7 = arith.constant 0 : index
    %15 = vector.load %arg4[%c0_6, %c0_7] : memref<64x1xi32, #tpu.memory_space<vmem>>, vector<64x1xi32>
    %c0_8 = arith.constant 0 : index
    %c0_9 = arith.constant 0 : index
    %16 = vector.load %arg5[%c0_8, %c0_9] : memref<1x64xi32, #tpu.memory_space<vmem>>, vector<1x64xi32>
    %17 = vector.broadcast %15 : vector<64x1xi32> to vector<64x64xi32>
    %18 = vector.broadcast %16 : vector<1x64xi32> to vector<64x64xi32>
    %19 = arith.cmpi eq, %17, %18 : vector<64x64xi32>
    %c0_i32 = arith.constant 0 : i32
    %20 = vector.broadcast %c0_i32 : i32 to vector<64x1xi32>
    %21 = arith.cmpi sge, %15, %20 : vector<64x1xi32>
    %22 = vector.broadcast %21 : vector<64x1xi1> to vector<64x64xi1>
    %23 = arith.andi %19, %22 : vector<64x64xi1>
    %24 = tpu.iota {dimensions = array<i32: 0>} : vector<64x64xi32>
    %c64_i32 = arith.constant 64 : i32
    %25 = arith.muli %arg0, %c64_i32 : i32
    %26 = vector.broadcast %25 : i32 to vector<64x64xi32>
    %27 = arith.addi %24, %26 : vector<64x64xi32>
    %28 = tpu.iota {dimensions = array<i32: 1>} : vector<64x64xi32>
    %c64_i32_10 = arith.constant 64 : i32
    %29 = arith.muli %arg1, %c64_i32_10 : i32
    %30 = vector.broadcast %29 : i32 to vector<64x64xi32>
    %31 = arith.addi %28, %30 : vector<64x64xi32>
    %32 = arith.cmpi ne, %27, %31 : vector<64x64xi32>
    %33 = arith.andi %23, %32 : vector<64x64xi1>
    %cst_11 = arith.constant 1.000000e+30 : f32
    %34 = vector.broadcast %cst_11 : f32 to vector<64x64xf32>
    %35 = arith.select %33, %14, %34 : vector<64x64xi1>, vector<64x64xf32>
    %c0_12 = arith.constant 0 : index
    %c0_13 = arith.constant 0 : index
    %36 = vector.load %arg6[%c0_12, %c0_13] : memref<64x64xf32, #tpu.memory_space<vmem>>, vector<64x64xf32>
    tpu.vector_store %arg6[%c0_12, %c0_13], %35 {strides = array<i32>} : memref<64x64xf32, #tpu.memory_space<vmem>>, vector<64x64xf32>,
    return
  }
  func.func @transform_0(%arg0: i32, %arg1: i32) -> (i32, i32) {
    %c0_i32 = arith.constant 0 : i32
    %c0_i32_0 = arith.constant 0 : i32
    return %arg0, %c0_i32 : i32, i32
  }
  func.func @transform_1(%arg0: i32, %arg1: i32) -> (i32, i32) {
    %c0_i32 = arith.constant 0 : i32
    %c0_i32_0 = arith.constant 0 : i32
    return %c0_i32, %arg1 : i32, i32
  }
  func.func @transform_2(%arg0: i32, %arg1: i32) -> (i32, i32) {
    %c0_i32 = arith.constant 0 : i32
    %c0_i32_0 = arith.constant 0 : i32
    return %arg0, %c0_i32 : i32, i32
  }
  func.func @transform_3(%arg0: i32, %arg1: i32) -> (i32, i32) {
    %c0_i32 = arith.constant 0 : i32
    %c0_i32_0 = arith.constant 0 : i32
    return %c0_i32, %arg1 : i32, i32
  }
  func.func @transform_4(%arg0: i32, %arg1: i32) -> (i32, i32) {
    %c0_i32 = arith.constant 0 : i32
    return %arg0, %arg1 : i32, i32
  }
}

module attributes {stable_mosaic.version = 11 : i64} {
  func.func @_conv1_kernel(%arg0: i32, %arg1: memref<1x1088x4xbf16, #tpu.memory_space<vmem>>, %arg2: memref<4x32xbf16, #tpu.memory_space<vmem>>, %arg3: memref<1x32xf32, #tpu.memory_space<vmem>>, %arg4: memref<32x32xbf16, #tpu.memory_space<vmem>>, %arg5: memref<1x32xf32, #tpu.memory_space<vmem>>, %arg6: memref<64x32xbf16, #tpu.memory_space<vmem>>) attributes {dimension_semantics = [#tpu.dimension_semantics<parallel>], iteration_bounds = array<i64: 1>, scalar_prefetch = 0 : i64, scratch_operands = 0 : i64, tpu.core_type = #tpu.core_type<tc>, window_params = [{transform_indices = @transform_0, window_bounds = array<i64: 1, 1088, 4>}, {pipeline_mode = #tpu.pipeline_mode<synchronous>, transform_indices = @transform_1, window_bounds = array<i64: 4, 32>}, {pipeline_mode = #tpu.pipeline_mode<synchronous>, transform_indices = @transform_2, window_bounds = array<i64: 1, 32>}, {pipeline_mode = #tpu.pipeline_mode<synchronous>, transform_indices = @transform_3, window_bounds = array<i64: 32, 32>}, {pipeline_mode = #tpu.pipeline_mode<synchronous>, transform_indices = @transform_4, window_bounds = array<i64: 1, 32>}, {transform_indices = @transform_5, window_bounds = array<i64: 64, 32>}]} {
    %c0 = arith.constant 0 : index
    %c0_0 = arith.constant 0 : index
    %c0_1 = arith.constant 0 : index
    %0 = vector.load %arg1[%c0, %c0_0, %c0_1] : memref<1x1088x4xbf16, #tpu.memory_space<vmem>>, vector<1x1088x4xbf16>
    %1 = vector.shape_cast %0 : vector<1x1088x4xbf16> to vector<1088x4xbf16>
    %c0_2 = arith.constant 0 : index
    %c0_3 = arith.constant 0 : index
    %2 = vector.load %arg2[%c0_2, %c0_3] : memref<4x32xbf16, #tpu.memory_space<vmem>>, vector<4x32xbf16>
    %cst = arith.constant dense<0.000000e+00> : vector<1088x32xf32>
    %3 = tpu.matmul %1, %2, %cst {dimension_numbers = #tpu.dot_dimension_numbers<[1], [0], [0], [1], [0, 0, 1, 1], [], []>} : vector<1088x4xbf16>, vector<4x32xbf16>, vector<1088x32xf32> -> vector<1088x32xf32>
    %c0_4 = arith.constant 0 : index
    %c0_5 = arith.constant 0 : index
    %4 = vector.load %arg3[%c0_4, %c0_5] : memref<1x32xf32, #tpu.memory_space<vmem>>, vector<1x32xf32>
    %5 = vector.broadcast %4 : vector<1x32xf32> to vector<1088x32xf32>
    %6 = arith.addf %3, %5 : vector<1088x32xf32>
    %cst_6 = arith.constant 0.000000e+00 : f32
    %7 = vector.broadcast %cst_6 : f32 to vector<1088x32xf32>
    %8 = arith.maximumf %6, %7 : vector<1088x32xf32>
    %9 = arith.truncf %8 : vector<1088x32xf32> to vector<1088x32xbf16>
    %c0_7 = arith.constant 0 : index
    %c0_8 = arith.constant 0 : index
    %10 = vector.load %arg4[%c0_7, %c0_8] : memref<32x32xbf16, #tpu.memory_space<vmem>>, vector<32x32xbf16>
    %cst_9 = arith.constant dense<0.000000e+00> : vector<1088x32xf32>
    %11 = tpu.matmul %9, %10, %cst_9 {dimension_numbers = #tpu.dot_dimension_numbers<[1], [0], [0], [1], [0, 0, 1, 1], [], []>} : vector<1088x32xbf16>, vector<32x32xbf16>, vector<1088x32xf32> -> vector<1088x32xf32>
    %12 = vector.extract_strided_slice %11 {offsets = [0, 0], sizes = [64, 32], strides = [1, 1]} : vector<1088x32xf32> to vector<64x32xf32>
    %13 = vector.extract_strided_slice %11 {offsets = [64, 0], sizes = [64, 32], strides = [1, 1]} : vector<1088x32xf32> to vector<64x32xf32>
    %14 = vector.extract_strided_slice %11 {offsets = [128, 0], sizes = [64, 32], strides = [1, 1]} : vector<1088x32xf32> to vector<64x32xf32>
    %15 = vector.extract_strided_slice %11 {offsets = [192, 0], sizes = [64, 32], strides = [1, 1]} : vector<1088x32xf32> to vector<64x32xf32>
    %16 = vector.extract_strided_slice %11 {offsets = [256, 0], sizes = [64, 32], strides = [1, 1]} : vector<1088x32xf32> to vector<64x32xf32>
    %17 = vector.extract_strided_slice %11 {offsets = [320, 0], sizes = [64, 32], strides = [1, 1]} : vector<1088x32xf32> to vector<64x32xf32>
    %18 = vector.extract_strided_slice %11 {offsets = [384, 0], sizes = [64, 32], strides = [1, 1]} : vector<1088x32xf32> to vector<64x32xf32>
    %19 = vector.extract_strided_slice %11 {offsets = [448, 0], sizes = [64, 32], strides = [1, 1]} : vector<1088x32xf32> to vector<64x32xf32>
    %20 = vector.extract_strided_slice %11 {offsets = [512, 0], sizes = [64, 32], strides = [1, 1]} : vector<1088x32xf32> to vector<64x32xf32>
    %21 = vector.extract_strided_slice %11 {offsets = [576, 0], sizes = [64, 32], strides = [1, 1]} : vector<1088x32xf32> to vector<64x32xf32>
    %22 = vector.extract_strided_slice %11 {offsets = [640, 0], sizes = [64, 32], strides = [1, 1]} : vector<1088x32xf32> to vector<64x32xf32>
    %23 = vector.extract_strided_slice %11 {offsets = [704, 0], sizes = [64, 32], strides = [1, 1]} : vector<1088x32xf32> to vector<64x32xf32>
    %24 = vector.extract_strided_slice %11 {offsets = [768, 0], sizes = [64, 32], strides = [1, 1]} : vector<1088x32xf32> to vector<64x32xf32>
    %25 = vector.extract_strided_slice %11 {offsets = [832, 0], sizes = [64, 32], strides = [1, 1]} : vector<1088x32xf32> to vector<64x32xf32>
    %26 = vector.extract_strided_slice %11 {offsets = [896, 0], sizes = [64, 32], strides = [1, 1]} : vector<1088x32xf32> to vector<64x32xf32>
    %27 = vector.extract_strided_slice %11 {offsets = [960, 0], sizes = [64, 32], strides = [1, 1]} : vector<1088x32xf32> to vector<64x32xf32>
    %28 = vector.extract_strided_slice %11 {offsets = [1024, 0], sizes = [64, 32], strides = [1, 1]} : vector<1088x32xf32> to vector<64x32xf32>
    %29 = arith.maximumf %12, %13 : vector<64x32xf32>
    %30 = arith.maximumf %14, %15 : vector<64x32xf32>
    %31 = arith.maximumf %16, %17 : vector<64x32xf32>
    %32 = arith.maximumf %18, %19 : vector<64x32xf32>
    %33 = arith.maximumf %20, %21 : vector<64x32xf32>
    %34 = arith.maximumf %22, %23 : vector<64x32xf32>
    %35 = arith.maximumf %24, %25 : vector<64x32xf32>
    %36 = arith.maximumf %26, %27 : vector<64x32xf32>
    %37 = arith.maximumf %29, %30 : vector<64x32xf32>
    %38 = arith.maximumf %31, %32 : vector<64x32xf32>
    %39 = arith.maximumf %33, %34 : vector<64x32xf32>
    %40 = arith.maximumf %35, %36 : vector<64x32xf32>
    %41 = arith.maximumf %37, %38 : vector<64x32xf32>
    %42 = arith.maximumf %39, %40 : vector<64x32xf32>
    %43 = arith.maximumf %41, %42 : vector<64x32xf32>
    %44 = arith.maximumf %43, %28 : vector<64x32xf32>
    %c0_10 = arith.constant 0 : index
    %c0_11 = arith.constant 0 : index
    %45 = vector.load %arg5[%c0_10, %c0_11] : memref<1x32xf32, #tpu.memory_space<vmem>>, vector<1x32xf32>
    %46 = vector.broadcast %45 : vector<1x32xf32> to vector<64x32xf32>
    %47 = arith.addf %44, %46 : vector<64x32xf32>
    %cst_12 = arith.constant 0.000000e+00 : f32
    %48 = vector.broadcast %cst_12 : f32 to vector<64x32xf32>
    %49 = arith.maximumf %47, %48 : vector<64x32xf32>
    %50 = arith.truncf %49 : vector<64x32xf32> to vector<64x32xbf16>
    %c0_13 = arith.constant 0 : index
    %c0_14 = arith.constant 0 : index
    %51 = vector.load %arg6[%c0_13, %c0_14] : memref<64x32xbf16, #tpu.memory_space<vmem>>, vector<64x32xbf16>
    tpu.vector_store %arg6[%c0_13, %c0_14], %50 {strides = array<i32>} : memref<64x32xbf16, #tpu.memory_space<vmem>>, vector<64x32xbf16>,
    return
  }
  func.func @transform_0(%arg0: i32) -> (i32, i32, i32) {
    %c0_i32 = arith.constant 0 : i32
    %c0_i32_0 = arith.constant 0 : i32
    %c0_i32_1 = arith.constant 0 : i32
    return %arg0, %c0_i32, %c0_i32_0 : i32, i32, i32
  }
  func.func @transform_1(%arg0: i32) -> (i32, i32) {
    %c0_i32 = arith.constant 0 : i32
    %c0_i32_0 = arith.constant 0 : i32
    %c0_i32_1 = arith.constant 0 : i32
    return %c0_i32, %c0_i32_0 : i32, i32
  }
  func.func @transform_2(%arg0: i32) -> (i32, i32) {
    %c0_i32 = arith.constant 0 : i32
    %c0_i32_0 = arith.constant 0 : i32
    %c0_i32_1 = arith.constant 0 : i32
    return %c0_i32, %c0_i32_0 : i32, i32
  }
  func.func @transform_3(%arg0: i32) -> (i32, i32) {
    %c0_i32 = arith.constant 0 : i32
    %c0_i32_0 = arith.constant 0 : i32
    %c0_i32_1 = arith.constant 0 : i32
    return %c0_i32, %c0_i32_0 : i32, i32
  }
  func.func @transform_4(%arg0: i32) -> (i32, i32) {
    %c0_i32 = arith.constant 0 : i32
    %c0_i32_0 = arith.constant 0 : i32
    %c0_i32_1 = arith.constant 0 : i32
    return %c0_i32, %c0_i32_0 : i32, i32
  }
  func.func @transform_5(%arg0: i32) -> (i32, i32) {
    %c0_i32 = arith.constant 0 : i32
    %c0_i32_0 = arith.constant 0 : i32
    return %arg0, %c0_i32 : i32, i32
  }
}

module attributes {stable_mosaic.version = 11 : i64} {
  func.func @_conv2_kernel(%arg0: i32, %arg1: memref<1x1088x32xbf16, #tpu.memory_space<vmem>>, %arg2: memref<1x1088x4xbf16, #tpu.memory_space<vmem>>, %arg3: memref<32x32xbf16, #tpu.memory_space<vmem>>, %arg4: memref<4x32xbf16, #tpu.memory_space<vmem>>, %arg5: memref<1x32xf32, #tpu.memory_space<vmem>>, %arg6: memref<32x32xbf16, #tpu.memory_space<vmem>>, %arg7: memref<1x32xf32, #tpu.memory_space<vmem>>, %arg8: memref<64x32xbf16, #tpu.memory_space<vmem>>) attributes {dimension_semantics = [#tpu.dimension_semantics<parallel>], iteration_bounds = array<i64: 1>, scalar_prefetch = 0 : i64, scratch_operands = 0 : i64, tpu.core_type = #tpu.core_type<tc>, window_params = [{transform_indices = @transform_0, window_bounds = array<i64: 1, 1088, 32>}, {transform_indices = @transform_1, window_bounds = array<i64: 1, 1088, 4>}, {pipeline_mode = #tpu.pipeline_mode<synchronous>, transform_indices = @transform_2, window_bounds = array<i64: 32, 32>}, {pipeline_mode = #tpu.pipeline_mode<synchronous>, transform_indices = @transform_3, window_bounds = array<i64: 4, 32>}, {pipeline_mode = #tpu.pipeline_mode<synchronous>, transform_indices = @transform_4, window_bounds = array<i64: 1, 32>}, {pipeline_mode = #tpu.pipeline_mode<synchronous>, transform_indices = @transform_5, window_bounds = array<i64: 32, 32>}, {pipeline_mode = #tpu.pipeline_mode<synchronous>, transform_indices = @transform_6, window_bounds = array<i64: 1, 32>}, {transform_indices = @transform_7, window_bounds = array<i64: 64, 32>}]} {
    %c0 = arith.constant 0 : index
    %c0_0 = arith.constant 0 : index
    %c0_1 = arith.constant 0 : index
    %0 = vector.load %arg1[%c0, %c0_0, %c0_1] : memref<1x1088x32xbf16, #tpu.memory_space<vmem>>, vector<1x1088x32xbf16>
    %1 = vector.shape_cast %0 : vector<1x1088x32xbf16> to vector<1088x32xbf16>
    %c0_2 = arith.constant 0 : index
    %c0_3 = arith.constant 0 : index
    %2 = vector.load %arg3[%c0_2, %c0_3] : memref<32x32xbf16, #tpu.memory_space<vmem>>, vector<32x32xbf16>
    %cst = arith.constant dense<0.000000e+00> : vector<1088x32xf32>
    %3 = tpu.matmul %1, %2, %cst {dimension_numbers = #tpu.dot_dimension_numbers<[1], [0], [0], [1], [0, 0, 1, 1], [], []>} : vector<1088x32xbf16>, vector<32x32xbf16>, vector<1088x32xf32> -> vector<1088x32xf32>
    %c0_4 = arith.constant 0 : index
    %c0_5 = arith.constant 0 : index
    %c0_6 = arith.constant 0 : index
    %4 = vector.load %arg2[%c0_4, %c0_5, %c0_6] : memref<1x1088x4xbf16, #tpu.memory_space<vmem>>, vector<1x1088x4xbf16>
    %5 = vector.shape_cast %4 : vector<1x1088x4xbf16> to vector<1088x4xbf16>
    %c0_7 = arith.constant 0 : index
    %c0_8 = arith.constant 0 : index
    %6 = vector.load %arg4[%c0_7, %c0_8] : memref<4x32xbf16, #tpu.memory_space<vmem>>, vector<4x32xbf16>
    %cst_9 = arith.constant dense<0.000000e+00> : vector<1088x32xf32>
    %7 = tpu.matmul %5, %6, %cst_9 {dimension_numbers = #tpu.dot_dimension_numbers<[1], [0], [0], [1], [0, 0, 1, 1], [], []>} : vector<1088x4xbf16>, vector<4x32xbf16>, vector<1088x32xf32> -> vector<1088x32xf32>
    %8 = arith.addf %3, %7 : vector<1088x32xf32>
    %c0_10 = arith.constant 0 : index
    %c0_11 = arith.constant 0 : index
    %9 = vector.load %arg5[%c0_10, %c0_11] : memref<1x32xf32, #tpu.memory_space<vmem>>, vector<1x32xf32>
    %10 = vector.broadcast %9 : vector<1x32xf32> to vector<1088x32xf32>
    %11 = arith.addf %8, %10 : vector<1088x32xf32>
    %cst_12 = arith.constant 0.000000e+00 : f32
    %12 = vector.broadcast %cst_12 : f32 to vector<1088x32xf32>
    %13 = arith.maximumf %11, %12 : vector<1088x32xf32>
    %14 = arith.truncf %13 : vector<1088x32xf32> to vector<1088x32xbf16>
    %c0_13 = arith.constant 0 : index
    %c0_14 = arith.constant 0 : index
    %15 = vector.load %arg6[%c0_13, %c0_14] : memref<32x32xbf16, #tpu.memory_space<vmem>>, vector<32x32xbf16>
    %cst_15 = arith.constant dense<0.000000e+00> : vector<1088x32xf32>
    %16 = tpu.matmul %14, %15, %cst_15 {dimension_numbers = #tpu.dot_dimension_numbers<[1], [0], [0], [1], [0, 0, 1, 1], [], []>} : vector<1088x32xbf16>, vector<32x32xbf16>, vector<1088x32xf32> -> vector<1088x32xf32>
    %17 = vector.extract_strided_slice %16 {offsets = [0, 0], sizes = [64, 32], strides = [1, 1]} : vector<1088x32xf32> to vector<64x32xf32>
    %18 = vector.extract_strided_slice %16 {offsets = [64, 0], sizes = [64, 32], strides = [1, 1]} : vector<1088x32xf32> to vector<64x32xf32>
    %19 = vector.extract_strided_slice %16 {offsets = [128, 0], sizes = [64, 32], strides = [1, 1]} : vector<1088x32xf32> to vector<64x32xf32>
    %20 = vector.extract_strided_slice %16 {offsets = [192, 0], sizes = [64, 32], strides = [1, 1]} : vector<1088x32xf32> to vector<64x32xf32>
    %21 = vector.extract_strided_slice %16 {offsets = [256, 0], sizes = [64, 32], strides = [1, 1]} : vector<1088x32xf32> to vector<64x32xf32>
    %22 = vector.extract_strided_slice %16 {offsets = [320, 0], sizes = [64, 32], strides = [1, 1]} : vector<1088x32xf32> to vector<64x32xf32>
    %23 = vector.extract_strided_slice %16 {offsets = [384, 0], sizes = [64, 32], strides = [1, 1]} : vector<1088x32xf32> to vector<64x32xf32>
    %24 = vector.extract_strided_slice %16 {offsets = [448, 0], sizes = [64, 32], strides = [1, 1]} : vector<1088x32xf32> to vector<64x32xf32>
    %25 = vector.extract_strided_slice %16 {offsets = [512, 0], sizes = [64, 32], strides = [1, 1]} : vector<1088x32xf32> to vector<64x32xf32>
    %26 = vector.extract_strided_slice %16 {offsets = [576, 0], sizes = [64, 32], strides = [1, 1]} : vector<1088x32xf32> to vector<64x32xf32>
    %27 = vector.extract_strided_slice %16 {offsets = [640, 0], sizes = [64, 32], strides = [1, 1]} : vector<1088x32xf32> to vector<64x32xf32>
    %28 = vector.extract_strided_slice %16 {offsets = [704, 0], sizes = [64, 32], strides = [1, 1]} : vector<1088x32xf32> to vector<64x32xf32>
    %29 = vector.extract_strided_slice %16 {offsets = [768, 0], sizes = [64, 32], strides = [1, 1]} : vector<1088x32xf32> to vector<64x32xf32>
    %30 = vector.extract_strided_slice %16 {offsets = [832, 0], sizes = [64, 32], strides = [1, 1]} : vector<1088x32xf32> to vector<64x32xf32>
    %31 = vector.extract_strided_slice %16 {offsets = [896, 0], sizes = [64, 32], strides = [1, 1]} : vector<1088x32xf32> to vector<64x32xf32>
    %32 = vector.extract_strided_slice %16 {offsets = [960, 0], sizes = [64, 32], strides = [1, 1]} : vector<1088x32xf32> to vector<64x32xf32>
    %33 = vector.extract_strided_slice %16 {offsets = [1024, 0], sizes = [64, 32], strides = [1, 1]} : vector<1088x32xf32> to vector<64x32xf32>
    %34 = arith.maximumf %17, %18 : vector<64x32xf32>
    %35 = arith.maximumf %19, %20 : vector<64x32xf32>
    %36 = arith.maximumf %21, %22 : vector<64x32xf32>
    %37 = arith.maximumf %23, %24 : vector<64x32xf32>
    %38 = arith.maximumf %25, %26 : vector<64x32xf32>
    %39 = arith.maximumf %27, %28 : vector<64x32xf32>
    %40 = arith.maximumf %29, %30 : vector<64x32xf32>
    %41 = arith.maximumf %31, %32 : vector<64x32xf32>
    %42 = arith.maximumf %34, %35 : vector<64x32xf32>
    %43 = arith.maximumf %36, %37 : vector<64x32xf32>
    %44 = arith.maximumf %38, %39 : vector<64x32xf32>
    %45 = arith.maximumf %40, %41 : vector<64x32xf32>
    %46 = arith.maximumf %42, %43 : vector<64x32xf32>
    %47 = arith.maximumf %44, %45 : vector<64x32xf32>
    %48 = arith.maximumf %46, %47 : vector<64x32xf32>
    %49 = arith.maximumf %48, %33 : vector<64x32xf32>
    %c0_16 = arith.constant 0 : index
    %c0_17 = arith.constant 0 : index
    %50 = vector.load %arg7[%c0_16, %c0_17] : memref<1x32xf32, #tpu.memory_space<vmem>>, vector<1x32xf32>
    %51 = vector.broadcast %50 : vector<1x32xf32> to vector<64x32xf32>
    %52 = arith.addf %49, %51 : vector<64x32xf32>
    %cst_18 = arith.constant 0.000000e+00 : f32
    %53 = vector.broadcast %cst_18 : f32 to vector<64x32xf32>
    %54 = arith.maximumf %52, %53 : vector<64x32xf32>
    %55 = arith.truncf %54 : vector<64x32xf32> to vector<64x32xbf16>
    %c0_19 = arith.constant 0 : index
    %c0_20 = arith.constant 0 : index
    %56 = vector.load %arg8[%c0_19, %c0_20] : memref<64x32xbf16, #tpu.memory_space<vmem>>, vector<64x32xbf16>
    tpu.vector_store %arg8[%c0_19, %c0_20], %55 {strides = array<i32>} : memref<64x32xbf16, #tpu.memory_space<vmem>>, vector<64x32xbf16>,
    return
  }
  func.func @transform_0(%arg0: i32) -> (i32, i32, i32) {
    %c0_i32 = arith.constant 0 : i32
    %c0_i32_0 = arith.constant 0 : i32
    %c0_i32_1 = arith.constant 0 : i32
    return %arg0, %c0_i32, %c0_i32_0 : i32, i32, i32
  }
  func.func @transform_1(%arg0: i32) -> (i32, i32, i32) {
    %c0_i32 = arith.constant 0 : i32
    %c0_i32_0 = arith.constant 0 : i32
    %c0_i32_1 = arith.constant 0 : i32
    return %arg0, %c0_i32, %c0_i32_0 : i32, i32, i32
  }
  func.func @transform_2(%arg0: i32) -> (i32, i32) {
    %c0_i32 = arith.constant 0 : i32
    %c0_i32_0 = arith.constant 0 : i32
    %c0_i32_1 = arith.constant 0 : i32
    return %c0_i32, %c0_i32_0 : i32, i32
  }
  func.func @transform_3(%arg0: i32) -> (i32, i32) {
    %c0_i32 = arith.constant 0 : i32
    %c0_i32_0 = arith.constant 0 : i32
    %c0_i32_1 = arith.constant 0 : i32
    return %c0_i32, %c0_i32_0 : i32, i32
  }
  func.func @transform_4(%arg0: i32) -> (i32, i32) {
    %c0_i32 = arith.constant 0 : i32
    %c0_i32_0 = arith.constant 0 : i32
    %c0_i32_1 = arith.constant 0 : i32
    return %c0_i32, %c0_i32_0 : i32, i32
  }
  func.func @transform_5(%arg0: i32) -> (i32, i32) {
    %c0_i32 = arith.constant 0 : i32
    %c0_i32_0 = arith.constant 0 : i32
    %c0_i32_1 = arith.constant 0 : i32
    return %c0_i32, %c0_i32_0 : i32, i32
  }
  func.func @transform_6(%arg0: i32) -> (i32, i32) {
    %c0_i32 = arith.constant 0 : i32
    %c0_i32_0 = arith.constant 0 : i32
    %c0_i32_1 = arith.constant 0 : i32
    return %c0_i32, %c0_i32_0 : i32, i32
  }
  func.func @transform_7(%arg0: i32) -> (i32, i32) {
    %c0_i32 = arith.constant 0 : i32
    %c0_i32_0 = arith.constant 0 : i32
    return %arg0, %c0_i32 : i32, i32
  }
}

module attributes {stable_mosaic.version = 11 : i64} {
  func.func @_pool_cls_kernel(%arg0: i32, %arg1: memref<2x64xf32, #tpu.memory_space<vmem>>, %arg2: memref<64x32xbf16, #tpu.memory_space<vmem>>, %arg3: memref<32x4xf32, #tpu.memory_space<vmem>>, %arg4: memref<1x4xf32, #tpu.memory_space<vmem>>, %arg5: memref<2x4xf32, #tpu.memory_space<vmem>>, %arg6: memref<2x32xf32, #tpu.memory_space<vmem>>) attributes {dimension_semantics = [#tpu.dimension_semantics<arbitrary>], iteration_bounds = array<i64: 1>, scalar_prefetch = 0 : i64, scratch_operands = 1 : i64, tpu.core_type = #tpu.core_type<tc>, window_params = [{transform_indices = @transform_0, window_bounds = array<i64: 2, 64>}, {transform_indices = @transform_1, window_bounds = array<i64: 64, 32>}, {pipeline_mode = #tpu.pipeline_mode<synchronous>, transform_indices = @transform_2, window_bounds = array<i64: 32, 4>}, {pipeline_mode = #tpu.pipeline_mode<synchronous>, transform_indices = @transform_3, window_bounds = array<i64: 1, 4>}, {pipeline_mode = #tpu.pipeline_mode<synchronous>, transform_indices = @transform_4, window_bounds = array<i64: 2, 4>}]} {
    %c0_i32 = arith.constant 0 : i32
    %0 = arith.cmpi eq, %arg0, %c0_i32 : i32
    %1 = arith.extui %0 : i1 to i32
    %c0_i32_0 = arith.constant 0 : i32
    %2 = arith.cmpi ne, %1, %c0_i32_0 : i32
    scf.if %2 {
      %cst_10 = arith.constant 0.000000e+00 : f32
      %13 = vector.broadcast %cst_10 : f32 to vector<2x32xf32>
      %c0_11 = arith.constant 0 : index
      %c0_12 = arith.constant 0 : index
      %14 = vector.load %arg6[%c0_11, %c0_12] : memref<2x32xf32, #tpu.memory_space<vmem>>, vector<2x32xf32>
      tpu.vector_store %arg6[%c0_11, %c0_12], %13 {strides = array<i32>} : memref<2x32xf32, #tpu.memory_space<vmem>>, vector<2x32xf32>,
    } else {
    }
    %c0 = arith.constant 0 : index
    %c0_1 = arith.constant 0 : index
    %3 = vector.load %arg6[%c0, %c0_1] : memref<2x32xf32, #tpu.memory_space<vmem>>, vector<2x32xf32>
    %c0_2 = arith.constant 0 : index
    %c0_3 = arith.constant 0 : index
    %4 = vector.load %arg1[%c0_2, %c0_3] : memref<2x64xf32, #tpu.memory_space<vmem>>, vector<2x64xf32>
    %c0_4 = arith.constant 0 : index
    %c0_5 = arith.constant 0 : index
    %5 = vector.load %arg2[%c0_4, %c0_5] : memref<64x32xbf16, #tpu.memory_space<vmem>>, vector<64x32xbf16>
    %6 = arith.extf %5 : vector<64x32xbf16> to vector<64x32xf32>
    %cst = arith.constant dense<0.000000e+00> : vector<2x32xf32>
    %7 = tpu.matmul %4, %6, %cst {dimension_numbers = #tpu.dot_dimension_numbers<[1], [0], [0], [1], [0, 0, 1, 1], [], []>} : vector<2x64xf32>, vector<64x32xf32>, vector<2x32xf32> -> vector<2x32xf32>
    %8 = arith.addf %3, %7 : vector<2x32xf32>
    %c0_6 = arith.constant 0 : index
    %c0_7 = arith.constant 0 : index
    %9 = vector.load %arg6[%c0_6, %c0_7] : memref<2x32xf32, #tpu.memory_space<vmem>>, vector<2x32xf32>
    tpu.vector_store %arg6[%c0_6, %c0_7], %8 {strides = array<i32>} : memref<2x32xf32, #tpu.memory_space<vmem>>, vector<2x32xf32>,
    %c0_i32_8 = arith.constant 0 : i32
    %10 = arith.cmpi eq, %arg0, %c0_i32_8 : i32
    %11 = arith.extui %10 : i1 to i32
    %c0_i32_9 = arith.constant 0 : i32
    %12 = arith.cmpi ne, %11, %c0_i32_9 : i32
    scf.if %12 {
      %c0_10 = arith.constant 0 : index
      %c0_11 = arith.constant 0 : index
      %13 = vector.load %arg6[%c0_10, %c0_11] : memref<2x32xf32, #tpu.memory_space<vmem>>, vector<2x32xf32>
      %c0_12 = arith.constant 0 : index
      %c0_13 = arith.constant 0 : index
      %14 = vector.load %arg3[%c0_12, %c0_13] : memref<32x4xf32, #tpu.memory_space<vmem>>, vector<32x4xf32>
      %cst_14 = arith.constant dense<0.000000e+00> : vector<2x4xf32>
      %15 = tpu.matmul %13, %14, %cst_14 {dimension_numbers = #tpu.dot_dimension_numbers<[1], [0], [0], [1], [0, 0, 1, 1], [], []>} : vector<2x32xf32>, vector<32x4xf32>, vector<2x4xf32> -> vector<2x4xf32>
      %c0_15 = arith.constant 0 : index
      %c0_16 = arith.constant 0 : index
      %16 = vector.load %arg4[%c0_15, %c0_16] : memref<1x4xf32, #tpu.memory_space<vmem>>, vector<1x4xf32>
      %17 = vector.broadcast %16 : vector<1x4xf32> to vector<2x4xf32>
      %18 = arith.addf %15, %17 : vector<2x4xf32>
      %c0_17 = arith.constant 0 : index
      %c0_18 = arith.constant 0 : index
      %19 = vector.load %arg5[%c0_17, %c0_18] : memref<2x4xf32, #tpu.memory_space<vmem>>, vector<2x4xf32>
      tpu.vector_store %arg5[%c0_17, %c0_18], %18 {strides = array<i32>} : memref<2x4xf32, #tpu.memory_space<vmem>>, vector<2x4xf32>,
    } else {
    }
    return
  }
  func.func @transform_0(%arg0: i32) -> (i32, i32) {
    %c0_i32 = arith.constant 0 : i32
    %c0_i32_0 = arith.constant 0 : i32
    return %c0_i32, %arg0 : i32, i32
  }
  func.func @transform_1(%arg0: i32) -> (i32, i32) {
    %c0_i32 = arith.constant 0 : i32
    %c0_i32_0 = arith.constant 0 : i32
    return %arg0, %c0_i32 : i32, i32
  }
  func.func @transform_2(%arg0: i32) -> (i32, i32) {
    %c0_i32 = arith.constant 0 : i32
    %c0_i32_0 = arith.constant 0 : i32
    %c0_i32_1 = arith.constant 0 : i32
    return %c0_i32, %c0_i32_0 : i32, i32
  }
  func.func @transform_3(%arg0: i32) -> (i32, i32) {
    %c0_i32 = arith.constant 0 : i32
    %c0_i32_0 = arith.constant 0 : i32
    %c0_i32_1 = arith.constant 0 : i32
    return %c0_i32, %c0_i32_0 : i32, i32
  }
  func.func @transform_4(%arg0: i32) -> (i32, i32) {
    %c0_i32 = arith.constant 0 : i32
    %c0_i32_0 = arith.constant 0 : i32
    %c0_i32_1 = arith.constant 0 : i32
    return %c0_i32, %c0_i32_0 : i32, i32
  }
}

</mosaic_0001>

<bundles_post_ra>
// kernel: neg.1
= control target key start
LH: loop header
LB: loop body
LE: loop exit
PB: predicated region body
PF: predicated region fallthrough
CT: control target
= control target key end

     0   :  { %s136_s0 = inlined_call_operand.vmem [shape: f32[64,64], index: 0, kind: input, shape index: {}]   ;;  %s137_s1 = inlined_call_operand.vmem [shape: f32[64,64], index: 1, kind: output, shape index: {}]  }
   0x1   :  { %v2_v0 = vld [vmem:[%s136_s0] sm:$0xff]  ;;  %v64_v1 = vld [vmem:[%s136_s0 + $0x8] sm:$0xff]  ;;  %v66_v2 = vld [vmem:[%s136_s0 + $0x10] sm:$0xff] }
   0x2   :  { %v5_v3 = vxor.u32 2147483648, %v2_v0  ;;  %v12_v4 = vxor.u32 2147483648, %v64_v1  ;;  %v20_v5 = vxor.u32 2147483648, %v66_v2  ;;  %v68_v6 = vld [vmem:[%s136_s0 + $0x18] sm:$0xff]  ;;  %v70_v7 = vld [vmem:[%s136_s0 + $0x20] sm:$0xff]  ;;  %v72_v8 = vld [vmem:[%s136_s0 + $0x28] sm:$0xff] }
   0x3   :  { %v28_v9 = vxor.u32 2147483648, %v68_v6  ;;  %v36_v10 = vxor.u32 2147483648, %v70_v7  ;;  %v44_v11 = vxor.u32 2147483648, %v72_v8  ;;  %v74_v12 = vld [vmem:[%s136_s0 + $0x30] sm:$0xff]  ;;  %v76_v13 = vld [vmem:[%s136_s0 + $0x38] sm:$0xff] }
   0x4   :  { %7 = vst [vmem:[%s137_s1] sm:$0xff] %v5_v3  ;;  %65 = vst [vmem:[%s137_s1 + $0x8] sm:$0xff] %v12_v4  ;;  %v52_v14 = vxor.u32 2147483648, %v74_v12  ;;  %v60_v15 = vxor.u32 2147483648, %v76_v13 }
   0x5   :  { %67 = vst [vmem:[%s137_s1 + $0x10] sm:$0xff] %v20_v5  ;;  %69 = vst [vmem:[%s137_s1 + $0x18] sm:$0xff] %v28_v9 }
   0x6   :  { %71 = vst [vmem:[%s137_s1 + $0x20] sm:$0xff] %v36_v10  ;;  %73 = vst [vmem:[%s137_s1 + $0x28] sm:$0xff] %v44_v11 }
   0x7   :  { %75 = vst [vmem:[%s137_s1 + $0x30] sm:$0xff] %v52_v14  ;;  %77 = vst [vmem:[%s137_s1 + $0x38] sm:$0xff] %v60_v15 }

// kernel: ppfnet_forward.4
= control target key start
LH: loop header
LB: loop body
LE: loop exit
PB: predicated region body
PF: predicated region fallthrough
CT: control target
= control target key end

     0   :  { %vm51_vm0 = vcmask 1042432   ;;  %vm26_vm1 = vcmask 23552   ;;  %v425_v3 = vmov 0   ;;  %vm193_vm10 = vcmask 518144   ;;  %s745_s1 = inlined_call_operand.vmem [shape: f32[3,64], index: 1, kind: input, shape index: {}]   ;;  %s746_s0 = inlined_call_operand.vmem [shape: f32[64,3], index: 0, kind: input, shape index: {}]   ;;  %s747_s2 = inlined_call_operand.vmem [shape: s32[64,1], index: 2, kind: input, shape index: {}]   ;;  %s748_s3 = inlined_call_operand.vmem [shape: s32[1,64], index: 3, kind: input, shape index: {}]   ;;  %s749_s4 = inlined_call_operand.vmem [shape: f32[64,64], index: 4, kind: output, shape index: {}]  }
   0x1   :  { %v454_v0 = vld [vmem:[%s745_s1] sm:$0x7]  ;;  %424 = vset.pattern.permute.xlu1 %v425_v3  ;;  %423 = vset.pattern.permute.xlu0 %v425_v3  ;;  %v18_v5 = vld [vmem:[%s746_s0 + $0x8] sm:$0xff]  ;;  %v19_v7 = vld [vmem:[%s746_s0 + $0x10] sm:$0xff] }
   0x2   :  { %v17_v1 = vld [vmem:[%s746_s0] sm:$0xff]  ;;  %406 = vmatprep.subr.msk.mxu0 %vm51_vm0, %v454_v0  ;;  %420 = vmatprep.subr.msk.mxu1 %vm51_vm0, %v454_v0  ;;  %v22_v6 = vld [vmem:[%s746_s0 + $0x28] sm:$0xff]  ;;  %v162_v8 = vmul.f32 %v19_v7, %v19_v7  ;;  %v20_v9 = vld [vmem:[%s746_s0 + $0x18] sm:$0xff]  ;;  %v161_v13 = vmul.f32 %v18_v5, %v18_v5  ;;  %v192_v55 = vmul.f32 %v454_v0, %v454_v0 }
   0x3   :  { %v21_v2 = vld [vmem:[%s746_s0 + $0x20] sm:$0xff]  ;;  %v160_v4 = vmul.f32 %v17_v1, %v17_v1  ;;  %407 = vmatpush3.msk.msra.mxu0 %vm51_vm0, %v454_v0  ;;  %421 = vmatpush3.msk.msra.mxu1 %vm51_vm0, %v454_v0  ;;  %v23_v10 = vld [vmem:[%s746_s0 + $0x30] sm:$0xff]  ;;  %v163_v12 = vmul.f32 %v20_v9, %v20_v9  ;;  %v24_v15 = vld [vmem:[%s746_s0 + $0x38] sm:$0xff]  ;;  %v165_v17 = vmul.f32 %v22_v6, %v22_v6 }
   0x4   :  { %408 = vmatprep.mubr.msk.f32.mxu0 %vm26_vm1, %v17_v1  ;;  %414 = vmatprep.mubr.msk.f32.mxu1 %vm26_vm1, %v21_v2  ;;  %v174_v14 = vsel %vm26_vm1, %v162_v8, 0.0  ;;  %v164_v18 = vmul.f32 %v21_v2, %v21_v2  ;;  %v171_v19 = vsel %vm26_vm1, %v161_v13, 0.0  ;;  %v167_v21 = vmul.f32 %v24_v15, %v24_v15  ;;  %v226_v26 = vld [vmem:[%s747_s2 + $0x8] sm:$0xff]  ;;  %v227_v27 = vld [vmem:[%s747_s2 + $0x10] sm:$0xff]  ;;  %v225_v28 = vld [vmem:[%s747_s2] sm:$0xff] }
   0x5   :  { %v168_v11 = vsel %vm26_vm1, %v160_v4, 0.0  ;;  %409 = vmatmul.mubr.msk.f32.vlgmr.msra.gmra.mrb[0].mxu0 %vm26_vm1, %v18_v5  ;;  %415 = vmatmul.mubr.msk.f32.vlgmr.msra.gmra.mrb[0].mxu1 %vm26_vm1, %v22_v6  ;;  %v177_v16 = vsel %vm26_vm1, %v163_v12, 0.0  ;;  %v183_v20 = vsel %vm26_vm1, %v165_v17, 0.0  ;;  %v166_v23 = vmul.f32 %v23_v10, %v23_v10  ;;  %v228_v29 = vld [vmem:[%s747_s2 + $0x18] sm:$0xff]  ;;  %v229_v31 = vld [vmem:[%s747_s2 + $0x20] sm:$0xff]  ;;  %v230_v32 = vld [vmem:[%s747_s2 + $0x28] sm:$0xff] }
   0x6   :  { %175 = vadd.xlane.f32.xlu1 %v174_v14  ;;  %411 = vmatprep.mubr.msk.f32.mxu0 %vm26_vm1, %v19_v7  ;;  %v180_v22 = vsel %vm26_vm1, %v164_v18, 0.0  ;;  %v189_v24 = vsel %vm26_vm1, %v167_v21, 0.0  ;;  %vm271_vm2 = vcmp.ge.s32.totalorder %v226_v26, 0  ;;  %vm273_vm3 = vcmp.ge.s32.totalorder %v228_v29, 0  ;;  %v232_v34 = vld [vmem:[%s747_s2 + $0x38] sm:$0xff]  ;;  %v231_v36 = vld [vmem:[%s747_s2 + $0x30] sm:$0xff] }
   0x7   :  { %417 = vmatprep.mubr.msk.f32.mxu1 %vm26_vm1, %v23_v10  ;;  %169 = vadd.xlane.f32.xlu0 %v168_v11  ;;  %v186_v25 = vsel %vm26_vm1, %v166_v23, 0.0  ;;  %v279_v30 = vsel %vm271_vm2, 1, %v425_v3  ;;  %v281_v33 = vsel %vm273_vm3, 1, %v425_v3  ;;  %vm275_vm4 = vcmp.ge.s32.totalorder %v230_v32, 0  ;;  %v567_v0 = vld [vmem:[%s748_s3] ss:$0 sm:$0xff] }
   0x8   :  { %v283_v35 = vsel %vm275_vm4, 1, %v425_v3  ;;  %vm277_vm5 = vcmp.ge.s32.totalorder %v232_v34, 0  ;;  %vm270_vm6 = vcmp.ge.s32.totalorder %v225_v28, 0  ;;  %vm272_vm7 = vcmp.ge.s32.totalorder %v227_v27, 0 }
   0x9   :  { %418 = vmatmul.mubr.msk.f32.gmra.mrb[2].mxu1 %vm26_vm1, %v24_v15  ;;  %412 = vmatmul.mubr.msk.f32.gmra.mrb[2].mxu0 %vm26_vm1, %v20_v9  ;;  %v285_v37 = vsel %vm277_vm5, 1, %v425_v3  ;;  %v278_v38 = vsel %vm270_vm6, 1, %v425_v3  ;;  %v280_v39 = vsel %vm272_vm7, 1, %v425_v3  ;;  %vm274_vm8 = vcmp.ge.s32.totalorder %v229_v31, 0 }
   0xa   :  { %178 = vadd.xlane.f32.xlu1 %v177_v16  ;;  %v282_v40 = vsel %vm274_vm8, 1, %v425_v3  ;;  %vm276_vm9 = vcmp.ge.s32.totalorder %v231_v36, 0  ;;  %v194_v57 = vsel %vm193_vm10, %v192_v55, 0.0  ;;  %v326_v2 = vlaneseq }
   0xb   :  { %172 = vadd.xlane.f32.xlu0 %v171_v19  ;;  %v284_v41 = vsel %vm276_vm9, 1, %v425_v3  ;;  %v195_v59 = vrot.slane %v194_v57, 4 }
   0xc   :  { %v562_v6 = vshrl.u32 %v326_v2, 7  ;;  %v569_v8 = vand.u32 127, %v326_v2 }
   0xd   :  { %v196_v61 = vadd.f32 %v195_v59, %v194_v57 }
   0xe   :  { %184 = vadd.xlane.f32.xlu1 %v183_v20  ;;  %v328_v10 = vadd.s32 8, %v562_v6  ;;  %v330_v11 = vadd.s32 24, %v562_v6  ;;  %v332_v12 = vadd.s32 40, %v562_v6  ;;  %v577_v13 = vadd.s32 56, %v562_v6 }
   0xf   :  { %181 = vadd.xlane.f32.xlu0 %v180_v22  ;;  %v197_v1 = vrot.slane %v196_v61, 2  ;;  %v581_v15 = vadd.s32 16, %v562_v6  ;;  %v331_v16 = vadd.s32 32, %v562_v6  ;;  %v589_v19 = vadd.s32 48, %v562_v6 }
  0x10   :  { %vm351_vm2 = vcmp.ne.s32.totalorder %v328_v10, %v569_v8  ;;  %vm353_vm4 = vcmp.ne.s32.totalorder %v330_v11, %v569_v8  ;;  %vm355_vm5 = vcmp.ne.s32.totalorder %v332_v12, %v569_v8  ;;  %vm357_vm7 = vcmp.ne.s32.totalorder %v577_v13, %v569_v8 }
  0x11   :  { %v198_v4 = vadd.f32 %v197_v1, %v196_v61  ;;  %vm350_vm8 = vcmp.ne.s32.totalorder %v562_v6, %v569_v8 }
  0x12   :  { %190 = vadd.xlane.f32.xlu1 %v189_v24 }
  0x13   :  { %187 = vadd.xlane.f32.xlu0 %v186_v25  ;;  %v199_v7 = vrot.slane %v198_v4, 1 }
  0x15   :  { %v200_v17 = vadd.f32 %v199_v7, %v198_v4 }
  0x23   :  { %238 = vperm.xlu1 %424, %v226_v26  }
  0x27   :  { %241 = vperm.xlu1 %424, %v227_v27  }
  0x29   :  { %235 = vperm.xlu0 %423, %v225_v28  }
  0x2b   :  { %244 = vperm.xlu1 %424, %v228_v29  }
  0x2d   :  { %290 = vperm.xlu0 %423, %v279_v30  }
  0x2f   :  { %247 = vperm.xlu1 %424, %v229_v31  }
  0x31   :  { %296 = vperm.xlu0 %423, %v281_v33  }
  0x33   :  { %250 = vperm.xlu1 %424, %v230_v32  }
  0x35   :  { %302 = vperm.xlu0 %423, %v283_v35  }
  0x37   :  { %253 = vperm.xlu1 %424, %v231_v36  }
  0x39   :  { %308 = vperm.xlu0 %423, %v285_v37  }
  0x3b   :  { %256 = vperm.xlu1 %424, %v232_v34  }
  0x3f   :  { %287 = vperm.xlu1 %424, %v278_v38  }
  0x43   :  { %293 = vperm.xlu1 %424, %v280_v39  }
  0x47   :  { %299 = vperm.xlu1 %424, %v282_v40  }
  0x4b   :  { %305 = vperm.xlu1 %424, %v284_v41  }
  0x93   :  { %v176_v42 = vpop.xlane.xlu1 %175 }
  0x94   :  { %v544_v47 = vpop.xlane.xlu0 %169  ;;  %v610_v23 = vadd.f32 %v200_v17, %v176_v42 }
  0x95   :  { %v201_v26 = vadd.f32 %v200_v17, %v544_v47 }
  0x97   :  { %v538_v43 = vpop.xlane.xlu1 %178 }
  0x98   :  { %v173_v49 = vpop.xlane.xlu0 %172  ;;  %v204_v38 = vadd.f32 %v200_v17, %v538_v43 }
  0x99   :  { %v202_v27 = vadd.f32 %v200_v17, %v173_v49 }
  0x9b   :  { %v540_v44 = vpop.xlane.xlu1 %184 }
  0x9c   :  { %v550_v52 = vpop.xlane.xlu0 %181  ;;  %v206_v32 = vadd.f32 %v200_v17, %v540_v44 }
  0x9d   :  { %v205_v39 = vadd.f32 %v200_v17, %v550_v52 }
  0x9f   :  { %v542_v45 = vpop.xlane.xlu1 %190 }
  0xa0   :  { %v552_v54 = vpop.xlane.xlu0 %187  ;;  %v208_v44 = vadd.f32 %v200_v17, %v542_v45 }
  0xa3   :  { %v239_v46 = vpop.permute.xlu1 %238 }
  0xa4   :  { %vm263_vm11 = vcmp.eq.s32.totalorder %v239_v46, %v567_v0 }
  0xa7   :  { %v546_v48 = vpop.permute.xlu1 %241 }
  0xa8   :  { %v236_v58 = vpop.permute.xlu0 %235 }
  0xa9   :  { %vm262_vm9 = vcmp.eq.s32.totalorder %v236_v58, %v567_v0  ;;  %v207_v58 = vadd.f32 %v200_v17, %v552_v54 }
  0xab   :  { %v245_v50 = vpop.permute.xlu1 %244 }
  0xac   :  { %v291_v62 = vpop.permute.xlu0 %290  ;;  %vm265_vm13 = vcmp.eq.s32.totalorder %v245_v50, %v567_v0 }
  0xad   :  { %vm311_vm12 = vcmp.eq.s32.totalorder %v291_v62, 1 }
  0xae   :  { %vm584_vm1 = vmand %vm263_vm11, %vm311_vm12  ;;  %vm354_vm12 = vcmp.ne.s32.totalorder %v331_v16, %v569_v8 }
  0xaf   :  { %v548_v51 = vpop.permute.xlu1 %247 }
  0xb0   :  { %v297_v3 = vpop.permute.xlu0 %296 }
  0xb1   :  { %vm313_vm14 = vcmp.eq.s32.totalorder %v297_v3, 1 }
  0xb2   :  { %vm592_vm3 = vmand %vm265_vm13, %vm313_vm14 }
  0xb3   :  { %v251_v53 = vpop.permute.xlu1 %250  ;;  %vm614_vm13 = vmand %vm584_vm1, %vm351_vm2 }
  0xb4   :  { %v303_v9 = vpop.permute.xlu0 %302  ;;  %vm267_vm15 = vcmp.eq.s32.totalorder %v251_v53, %v567_v0  ;;  %vm625_vm11 = vmand %vm592_vm3, %vm353_vm4  ;;  %vm266_vm3 = vcmp.eq.s32.totalorder %v548_v51, %v567_v0 }
  0xb5   :  { %vm315_vm0 = vcmp.eq.s32.totalorder %v303_v9, 1 }
  0xb6   :  { %vm598_vm6 = vmand %vm267_vm15, %vm315_vm0  ;;  %vm374_vm0 = vcmask 523264  }
  0xb7   :  { %v556_v56 = vpop.permute.xlu1 %253  ;;  %vm633_vm1 = vmand %vm598_vm6, %vm355_vm5 }
  0xb8   :  { %v309_v22 = vpop.permute.xlu0 %308 }
  0xb9   :  { %vm317_vm15 = vcmp.eq.s32.totalorder %v309_v22, 1 }
  0xbb   :  { %v558_v60 = vpop.permute.xlu1 %256 }
  0xbc   :  { %vm269_vm2 = vcmp.eq.s32.totalorder %v558_v60, %v567_v0 }
  0xbd   :  { %vm661_vm6 = vmand %vm269_vm2, %vm317_vm15 }
  0xbf   :  { %v288_v63 = vpop.permute.xlu1 %287 }
  0xc0   :  { %vm310_vm10 = vcmp.eq.s32.totalorder %v288_v63, 1 }
  0xc1   :  { %vm645_vm4 = vmand %vm262_vm9, %vm310_vm10  ;;  %vm264_vm10 = vcmp.eq.s32.totalorder %v546_v48, %v567_v0 }
  0xc3   :  { %v560_v5 = vpop.permute.xlu1 %293 }
  0xc4   :  { %vm312_vm9 = vcmp.eq.s32.totalorder %v560_v5, 1 }
  0xc7   :  { %v300_v14 = vpop.permute.xlu1 %299 }
  0xc8   :  { %vm314_vm14 = vcmp.eq.s32.totalorder %v300_v14, 1 }
  0xc9   :  { %vm652_vm5 = vmand %vm266_vm3, %vm314_vm14 }
  0xca   :  { %vm673_vm14 = vmand %vm645_vm4, %vm350_vm8  ;;  %vm268_vm8 = vcmp.eq.s32.totalorder %v556_v56, %v567_v0 }
  0xcb   :  { %v306_v25 = vpop.permute.xlu1 %305  ;;  %vm362_vm2 = vmand %vm652_vm5, %vm354_vm12  ;;  %vm773_vm5 = vcmp.ne.s32.totalorder %v589_v19, %v569_v8 }
  0xcc   :  { %vm316_vm15 = vcmp.eq.s32.totalorder %v306_v25, 1  ;;  %vm690_vm3 = vmand %vm264_vm10, %vm312_vm9 }
  0xcd   :  { %vm324_vm12 = vmand %vm268_vm8, %vm316_vm15 }
  0xce   :  { %vm364_vm9 = vmand %vm324_vm12, %vm773_vm5 }
  0xd8   :  { %v410_v30 = vpop.f32.mrb[0].mxu0  ;;  %v416_v31 = vpop.f32.mrb[0].mxu1 }
  0xd9   :  { %v210_v34 = vmul.f32 2.0, %v410_v30  ;;  %v214_v35 = vmul.f32 2.0, %v416_v31  ;;  %v121_v36 = vpop.f32.mrb[1].mxu0  ;;  %v141_v37 = vpop.f32.mrb[1].mxu1 }
  0xda   :  { %v209_v41 = vmul.f32 2.0, %v121_v36  ;;  %v213_v42 = vmul.f32 2.0, %v141_v37 }
  0xdb   :  { %v218_v43 = vsub.f32 %v202_v27, %v210_v34  ;;  %v222_v47 = vsub.f32 %v206_v32, %v214_v35 }
  0xdc   :  { %v217_v49 = vsub.f32 %v201_v26, %v209_v41  ;;  %v221_v50 = vsub.f32 %v205_v39, %v213_v42  ;;  %v413_v51 = vpop.f32.mrb[2].mxu0  ;;  %v419_v52 = vpop.f32.mrb[2].mxu1 }
  0xdd   :  { %v367_v48 = vsel %vm614_vm13, %v218_v43, 1e+30  ;;  %v371_v53 = vsel %vm633_vm1, %v222_v47, 1e+30  ;;  %v212_v55 = vmul.f32 2.0, %v413_v51  ;;  %v216_v57 = vmul.f32 2.0, %v419_v52  ;;  %vm365_vm13 = vmand %vm661_vm6, %vm357_vm7 }
  0xde   :  { %376 = vst.msk [vmem:[%s749_s4 + $0x8] sm:$0xff] %vm374_vm0, %v367_v48  ;;  %380 = vst.msk [vmem:[%s749_s4 + $0x28] sm:$0xff] %vm374_vm0, %v371_v53  ;;  %v366_v54 = vsel %vm673_vm14, %v217_v49, 1e+30  ;;  %v370_v56 = vsel %vm362_vm2, %v221_v50, 1e+30  ;;  %vm772_vm1 = vcmp.ne.s32.totalorder %v581_v15, %v569_v8 }
  0xdf   :  { %v131_v60 = vpop.f32.mrb[3].mxu0  ;;  %v151_v61 = vpop.f32.mrb[3].mxu1  ;;  %375 = vst.msk [vmem:[%s749_s4] sm:$0xff] %vm374_vm0, %v366_v54  ;;  %379 = vst.msk [vmem:[%s749_s4 + $0x20] sm:$0xff] %vm374_vm0, %v370_v56  ;;  %v220_v62 = vsub.f32 %v204_v38, %v212_v55  ;;  %v224_v63 = vsub.f32 %v208_v44, %v216_v57 }
  0xe0   :  { %v211_v1 = vmul.f32 2.0, %v131_v60  ;;  %v215_v2 = vmul.f32 2.0, %v151_v61  ;;  %vm360_vm4 = vmand %vm690_vm3, %vm772_vm1 }
  0xe1   :  { %v369_v3 = vsel %vm625_vm11, %v220_v62, 1e+30  ;;  %v373_v4 = vsel %vm365_vm13, %v224_v63, 1e+30 }
  0xe2   :  { %v219_v5 = vsub.f32 %v610_v23, %v211_v1  ;;  %v223_v6 = vsub.f32 %v207_v58, %v215_v2  ;;  %378 = vst.msk [vmem:[%s749_s4 + $0x18] sm:$0xff] %vm374_vm0, %v369_v3  ;;  %382 = vst.msk [vmem:[%s749_s4 + $0x38] sm:$0xff] %vm374_vm0, %v373_v4 }
  0xe4   :  { %v368_v0 = vsel %vm360_vm4, %v219_v5, 1e+30  ;;  %v372_v7 = vsel %vm364_vm9, %v223_v6, 1e+30 }
  0xe5   :  { %377 = vst.msk [vmem:[%s749_s4 + $0x10] sm:$0xff] %vm374_vm0, %v368_v0  ;;  %381 = vst.msk [vmem:[%s749_s4 + $0x30] sm:$0xff] %vm374_vm0, %v372_v7 }

// kernel: ppfnet_forward.5
= control target key start
LH: loop header
LB: loop body
LE: loop exit
PB: predicated region body
PF: predicated region fallthrough
CT: control target
= control target key end

     0   :  { %vm710_vm0 = vcmask 1041408   ;;  %vm505_vm1 = vcmask 31744   ;;  %vm1511_vm2 = vcmask 261120   ;;  %vm2476_vm3 = vcmask 257024   ;;  %s3930_s1 = inlined_call_operand.vmem [shape: bf16[4,32], index: 1, kind: input, shape index: {}]   ;;  %s3931_s0 = inlined_call_operand.vmem [shape: bf16[1,1088,4], index: 0, kind: input, shape index: {}]   ;;  %s3932_s3 = inlined_call_operand.vmem [shape: bf16[32,32], index: 3, kind: input, shape index: {}]   ;;  %s3933_s2 = inlined_call_operand.vmem [shape: f32[1,32], index: 2, kind: input, shape index: {}]   ;;  %s3934_s4 = inlined_call_operand.vmem [shape: f32[1,32], index: 4, kind: input, shape index: {}]   ;;  %s3935_s5 = inlined_call_operand.vmem [shape: bf16[64,32], index: 5, kind: output, shape index: {}]  }
   0x1   :  { %v157_v0 = vld [vmem:[%s3930_s1] sm:$0x3]  ;;  %v3132_v3 = vld [vmem:[%s3931_s0 + $0x8] sm:$0xff]   ;;  %v3133_v4 = vld [vmem:[%s3931_s0 + $0x10] sm:$0xff]  }
   0x2   :  { %3130 = vmatprep.subr.msk.bf16.mxu0 %vm710_vm0, %v157_v0  ;;  %v712_v1 = vsel %vm710_vm0, %v157_v0, 0  ;;  %v3131_v2 = vld [vmem:[%s3931_s0] sm:$0xff]   ;;  %v3134_v5 = vld [vmem:[%s3931_s0 + $0x18] sm:$0xff]   ;;  %v3136_v7 = vld [vmem:[%s3931_s0 + $0x28] sm:$0xff]  }
   0x3   :  { %2853 = vmatpush3.bf16.msra.mxu0 %v712_v1  ;;  %2854 = vmatprep.mubr.msk.bf16.mxu0 %vm505_vm1, %v3131_v2  ;;  %v3135_v6 = vld [vmem:[%s3931_s0 + $0x20] sm:$0xff]   ;;  %v3137_v8 = vld [vmem:[%s3931_s0 + $0x30] sm:$0xff]   ;;  %v3138_v9 = vld [vmem:[%s3931_s0 + $0x38] sm:$0xff]  }
   0x4   :  { %v3139_v10 = vld [vmem:[%s3931_s0 + $0x40] sm:$0xff]   ;;  %v3140_v11 = vld [vmem:[%s3931_s0 + $0x48] sm:$0xff]   ;;  %v3141_v12 = vld [vmem:[%s3931_s0 + $0x50] sm:$0xff]  }
   0x5   :  { %v3142_v13 = vld [vmem:[%s3931_s0 + $0x58] sm:$0xff]   ;;  %v3143_v14 = vld [vmem:[%s3931_s0 + $0x60] sm:$0xff]   ;;  %v3144_v15 = vld [vmem:[%s3931_s0 + $0x68] sm:$0xff]  }
   0x6   :  { %2855 = vmatmul.mubr.msk.bf16.vlgmr.msra.gmra.mrb[0].mxu0 %vm505_vm1, %v3132_v3  ;;  %v3145_v16 = vld [vmem:[%s3931_s0 + $0x70] sm:$0xff]   ;;  %v3146_v17 = vld [vmem:[%s3931_s0 + $0x78] sm:$0xff]   ;;  %v3147_v18 = vld [vmem:[%s3931_s0 + $0x80] sm:$0xff]  }
   0x7   :  { %2858 = vmatprep.mubr.msk.bf16.mxu0 %vm505_vm1, %v3133_v4  ;;  %v3148_v19 = vld [vmem:[%s3931_s0 + $0x88] sm:$0xff]   ;;  %v3149_v20 = vld [vmem:[%s3931_s0 + $0x90] sm:$0xff]   ;;  %v3150_v21 = vld [vmem:[%s3931_s0 + $0x98] sm:$0xff]  }
   0x8   :  { %v3151_v22 = vld [vmem:[%s3931_s0 + $0xa0] sm:$0xff]   ;;  %v3152_v23 = vld [vmem:[%s3931_s0 + $0xa8] sm:$0xff]   ;;  %v3153_v24 = vld [vmem:[%s3931_s0 + $0xb0] sm:$0xff]  }
   0x9   :  { %v3154_v25 = vld [vmem:[%s3931_s0 + $0xb8] sm:$0xff]   ;;  %v3185_v26 = vld [vmem:[%s3932_s3] sm:$0xff]   ;;  %v3188_v28 = vld [vmem:[%s3932_s3 + $0x8] sm:$0xff]  }
   0xa   :  { %v3155_v27 = vld [vmem:[%s3931_s0 + $0xc0] sm:$0xff]   ;;  %2990 = vmatprep.subr.bf16.mxu1 %v3185_v26  ;;  %v3156_v29 = vld [vmem:[%s3931_s0 + $0xc8] sm:$0xff]   ;;  %v3157_v30 = vld [vmem:[%s3931_s0 + $0xd0] sm:$0xff]  }
   0xb   :  { %2991 = vmatpush3.bf16.msra.mxu1 %v3185_v26  ;;  %v3158_v31 = vld [vmem:[%s3931_s0 + $0xd8] sm:$0xff]   ;;  %v3159_v32 = vld [vmem:[%s3931_s0 + $0xe0] sm:$0xff]   ;;  %v3160_v33 = vld [vmem:[%s3931_s0 + $0xe8] sm:$0xff]  }
   0xc   :  { %2992 = vmatprep.subr.bf16.mxu1 %v3188_v28  ;;  %v3161_v34 = vld [vmem:[%s3931_s0 + $0xf0] sm:$0xff]   ;;  %v3162_v35 = vld [vmem:[%s3931_s0 + $0xf8] sm:$0xff]   ;;  %v3163_v36 = vld [vmem:[%s3931_s0 + $0x100] sm:$0xff]  }
   0xd   :  { %v3164_v37 = vld [vmem:[%s3931_s0 + $0x108] sm:$0xff]   ;;  %v3165_v38 = vld [vmem:[%s3931_s0 + $0x110] sm:$0xff]   ;;  %v3166_v39 = vld [vmem:[%s3931_s0 + $0x118] sm:$0xff]  }
   0xe   :  { %2859 = vmatmul.mubr.msk.bf16.gmra.mrb[4].mxu0 %vm505_vm1, %v3134_v5  ;;  %v3167_v40 = vld [vmem:[%s3931_s0 + $0x120] sm:$0xff]   ;;  %v3168_v41 = vld [vmem:[%s3931_s0 + $0x128] sm:$0xff]   ;;  %v3169_v42 = vld [vmem:[%s3931_s0 + $0x130] sm:$0xff]  }
   0xf   :  { %2862 = vmatprep.mubr.msk.bf16.mxu0 %vm505_vm1, %v3135_v6  ;;  %2993 = vmatpush3.bf16.msra.mxu1 %v3188_v28  ;;  %v3170_v43 = vld [vmem:[%s3931_s0 + $0x138] sm:$0xff]   ;;  %v3171_v44 = vld [vmem:[%s3931_s0 + $0x140] sm:$0xff]   ;;  %v3172_v45 = vld [vmem:[%s3931_s0 + $0x148] sm:$0xff]  }
  0x10   :  { %v3173_v46 = vld [vmem:[%s3931_s0 + $0x150] sm:$0xff]   ;;  %v3174_v47 = vld [vmem:[%s3931_s0 + $0x158] sm:$0xff]   ;;  %v3175_v48 = vld [vmem:[%s3931_s0 + $0x160] sm:$0xff]  }
  0x11   :  { %v3176_v49 = vld [vmem:[%s3931_s0 + $0x168] sm:$0xff]   ;;  %v3177_v50 = vld [vmem:[%s3931_s0 + $0x170] sm:$0xff]   ;;  %v3178_v51 = vld [vmem:[%s3931_s0 + $0x178] sm:$0xff]  }
  0x12   :  { %v3179_v52 = vld [vmem:[%s3931_s0 + $0x180] sm:$0xff]   ;;  %v3180_v53 = vld [vmem:[%s3931_s0 + $0x188] sm:$0xff]   ;;  %v3181_v54 = vld [vmem:[%s3931_s0 + $0x190] sm:$0xff]  }
  0x13   :  { %v3182_v55 = vld [vmem:[%s3931_s0 + $0x198] sm:$0xff]   ;;  %v3183_v56 = vld [vmem:[%s3931_s0 + $0x1a0] sm:$0xff]   ;;  %v3184_v57 = vld [vmem:[%s3931_s0 + $0x1a8] sm:$0xff]  }
  0x14   :  { %v3186_v58 = vld [vmem:[%s3931_s0 + $0x1b0] sm:$0xff]   ;;  %v3463_v59 = vld [vmem:[%s3933_s2] ss:$0 sm:$0xff]  ;;  %v3187_v63 = vld [vmem:[%s3931_s0 + $0x1b8] sm:$0xff]  }
  0x15   :  { %v3189_v2 = vld [vmem:[%s3931_s0 + $0x1c0] sm:$0xff]  }
  0x16   :  { %2863 = vmatmul.mubr.msk.bf16.gmra.mrb[8].mxu0 %vm505_vm1, %v3136_v7 }
  0x17   :  { %2866 = vmatprep.mubr.msk.bf16.mxu0 %vm505_vm1, %v3137_v8 }
  0x1e   :  { %2867 = vmatmul.mubr.msk.bf16.gmra.mrb[12].mxu0 %vm505_vm1, %v3138_v9 }
  0x1f   :  { %2870 = vmatprep.mubr.msk.bf16.mxu0 %vm505_vm1, %v3139_v10 }
  0x26   :  { %2871 = vmatmul.mubr.msk.bf16.gmra.mrb[16].mxu0 %vm505_vm1, %v3140_v11 }
  0x27   :  { %2874 = vmatprep.mubr.msk.bf16.mxu0 %vm505_vm1, %v3141_v12 }
  0x2e   :  { %2875 = vmatmul.mubr.msk.bf16.gmra.mrb[20].mxu0 %vm505_vm1, %v3142_v13 }
  0x2f   :  { %2878 = vmatprep.mubr.msk.bf16.mxu0 %vm505_vm1, %v3143_v14 }
  0x36   :  { %2879 = vmatmul.mubr.msk.bf16.gmra.mrb[24].mxu0 %vm505_vm1, %v3144_v15  ;;  %v3190_v15 = vld [vmem:[%s3931_s0 + $0x1c8] sm:$0xff]  }
  0x37   :  { %2882 = vmatprep.mubr.msk.bf16.mxu0 %vm505_vm1, %v3145_v16 }
  0x3e   :  { %2883 = vmatmul.mubr.msk.bf16.gmra.mrb[28].mxu0 %vm505_vm1, %v3146_v17 }
  0x3f   :  { %2886 = vmatprep.mubr.msk.bf16.mxu0 %vm505_vm1, %v3147_v18  ;;  %v3191_v18 = vld [vmem:[%s3931_s0 + $0x1d0] sm:$0xff]  }
  0x46   :  { %2887 = vmatmul.mubr.msk.bf16.gmra.mrb[32].mxu0 %vm505_vm1, %v3148_v19 }
  0x47   :  { %2890 = vmatprep.mubr.msk.bf16.mxu0 %vm505_vm1, %v3149_v20 }
  0x4e   :  { %2891 = vmatmul.mubr.msk.bf16.gmra.mrb[36].mxu0 %vm505_vm1, %v3150_v21 }
  0x4f   :  { %2894 = vmatprep.mubr.msk.bf16.mxu0 %vm505_vm1, %v3151_v22 }
  0x56   :  { %2895 = vmatmul.mubr.msk.bf16.gmra.mrb[40].mxu0 %vm505_vm1, %v3152_v23 }
  0x57   :  { %2898 = vmatprep.mubr.msk.bf16.mxu0 %vm505_vm1, %v3153_v24 }
  0x5e   :  { %2899 = vmatmul.mubr.msk.bf16.gmra.mrb[44].mxu0 %vm505_vm1, %v3154_v25 }
  0x5f   :  { %2902 = vmatprep.mubr.msk.bf16.mxu0 %vm505_vm1, %v3155_v27 }
  0x66   :  { %2903 = vmatmul.mubr.msk.bf16.gmra.mrb[48].mxu0 %vm505_vm1, %v3156_v29 }
  0x67   :  { %2906 = vmatprep.mubr.msk.bf16.mxu0 %vm505_vm1, %v3157_v30 }
  0x6e   :  { %2907 = vmatmul.mubr.msk.bf16.gmra.mrb[52].mxu0 %vm505_vm1, %v3158_v31  ;;  %v3192_v31 = vld [vmem:[%s3931_s0 + $0x1d8] sm:$0xff]  }
  0x6f   :  { %2910 = vmatprep.mubr.msk.bf16.mxu0 %vm505_vm1, %v3159_v32 }
  0x76   :  { %2911 = vmatmul.mubr.msk.bf16.gmra.mrb[56].mxu0 %vm505_vm1, %v3160_v33 }
  0x77   :  { %2914 = vmatprep.mubr.msk.bf16.mxu0 %vm505_vm1, %v3161_v34  ;;  %v3193_v34 = vld [vmem:[%s3931_s0 + $0x1e0] sm:$0xff]  }
  0x7e   :  { %2915 = vmatmul.mubr.msk.bf16.gmra.mrb[60].mxu0 %vm505_vm1, %v3162_v35 }
  0x7f   :  { %2918 = vmatprep.mubr.msk.bf16.mxu0 %vm505_vm1, %v3163_v36 }
  0x86   :  { %2919 = vmatmul.mubr.msk.bf16.gmra.mrb[64].mxu0 %vm505_vm1, %v3164_v37 }
  0x87   :  { %2922 = vmatprep.mubr.msk.bf16.mxu0 %vm505_vm1, %v3165_v38 }
  0x8e   :  { %2923 = vmatmul.mubr.msk.bf16.gmra.mrb[68].mxu0 %vm505_vm1, %v3166_v39 }
  0x8f   :  { %2926 = vmatprep.mubr.msk.bf16.mxu0 %vm505_vm1, %v3167_v40 }
  0x96   :  { %2927 = vmatmul.mubr.msk.bf16.gmra.mrb[72].mxu0 %vm505_vm1, %v3168_v41 }
  0x97   :  { %2930 = vmatprep.mubr.msk.bf16.mxu0 %vm505_vm1, %v3169_v42 }
  0x9e   :  { %2931 = vmatmul.mubr.msk.bf16.gmra.mrb[76].mxu0 %vm505_vm1, %v3170_v43 }
  0x9f   :  { %2934 = vmatprep.mubr.msk.bf16.mxu0 %vm505_vm1, %v3171_v44 }
  0xa6   :  { %2935 = vmatmul.mubr.msk.bf16.gmra.mrb[80].mxu0 %vm505_vm1, %v3172_v45 }
  0xa7   :  { %2938 = vmatprep.mubr.msk.bf16.mxu0 %vm505_vm1, %v3173_v46 }
  0xae   :  { %2939 = vmatmul.mubr.msk.bf16.gmra.mrb[84].mxu0 %vm505_vm1, %v3174_v47  ;;  %v3194_v47 = vld [vmem:[%s3931_s0 + $0x1e8] sm:$0xff]  }
  0xaf   :  { %2942 = vmatprep.mubr.msk.bf16.mxu0 %vm505_vm1, %v3175_v48 }
  0xb6   :  { %2943 = vmatmul.mubr.msk.bf16.gmra.mrb[88].mxu0 %vm505_vm1, %v3176_v49 }
  0xb7   :  { %2946 = vmatprep.mubr.msk.bf16.mxu0 %vm505_vm1, %v3177_v50  ;;  %v3195_v50 = vld [vmem:[%s3931_s0 + $0x1f0] sm:$0xff]  }
  0xbe   :  { %2947 = vmatmul.mubr.msk.bf16.gmra.mrb[92].mxu0 %vm505_vm1, %v3178_v51 }
  0xbf   :  { %2950 = vmatprep.mubr.msk.bf16.mxu0 %vm505_vm1, %v3179_v52 }
  0xc6   :  { %2951 = vmatmul.mubr.msk.bf16.gmra.mrb[96].mxu0 %vm505_vm1, %v3180_v53 }
  0xc7   :  { %2954 = vmatprep.mubr.msk.bf16.mxu0 %vm505_vm1, %v3181_v54 }
  0xce   :  { %2955 = vmatmul.mubr.msk.bf16.gmra.mrb[100].mxu0 %vm505_vm1, %v3182_v55 }
  0xcf   :  { %2958 = vmatprep.mubr.msk.bf16.mxu0 %vm505_vm1, %v3183_v56 }
  0xd6   :  { %2959 = vmatmul.mubr.msk.bf16.gmra.mrb[104].mxu0 %vm505_vm1, %v3184_v57 }
  0xd7   :  { %2962 = vmatprep.mubr.msk.bf16.mxu0 %vm505_vm1, %v3186_v58 }
  0xd9   :  { %v2856_v60 = vpop.f32.mrb[0].mxu0 }
  0xda   :  { %v757_v61 = vadd.f32 %v2856_v60, %v3463_v59  ;;  %v748_v62 = vpop.f32.mrb[1].mxu0 }
  0xdb   :  { %v749_v0 = vadd.f32 %v3463_v59, %v748_v62  ;;  %v2857_v1 = vpop.f32.mrb[2].mxu0 }
  0xdc   :  { %v760_v3 = vadd.f32 %v2857_v1, %v3463_v59  ;;  %v751_v4 = vpop.f32.mrb[3].mxu0  ;;  %v1293_v6 = vmax.f32 %v757_v61, 0.0 }
  0xdd   :  { %v752_v5 = vadd.f32 %v3463_v59, %v751_v4  ;;  %v1291_v8 = vmax.f32 %v749_v0, 0.0  ;;  %v3196_v0 = vld [vmem:[%s3931_s0 + $0x1f8] sm:$0xff]  }
  0xde   :  { %v1294_v7 = vmax.f32 %v760_v3, 0.0  ;;  %2963 = vmatmul.mubr.msk.bf16.gmra.mrb[108].mxu0 %vm505_vm1, %v3187_v63  ;;  %v3197_v3 = vld [vmem:[%s3931_s0 + $0x200] sm:$0xff]  }
  0xdf   :  { %v1292_v9 = vmax.f32 %v752_v5, 0.0  ;;  %2966 = vmatprep.mubr.msk.bf16.mxu0 %vm505_vm1, %v3189_v2 }
  0xe0   :  { %v1428_v10 = vpack.c.bf16 %v1294_v7, %v1293_v6 }
  0xe1   :  { %v2860_v11 = vpop.f32.mrb[4].mxu0  ;;  %v1427_v12 = vpack.c.bf16 %v1292_v9, %v1291_v8 }
  0xe2   :  { %v773_v13 = vadd.f32 %v2860_v11, %v3463_v59  ;;  %v764_v14 = vpop.f32.mrb[5].mxu0 }
  0xe3   :  { %v765_v16 = vadd.f32 %v3463_v59, %v764_v14  ;;  %v2861_v17 = vpop.f32.mrb[6].mxu0  ;;  %2994 = vmatprep.mubr.msk.bf16.mxu1 %vm1511_vm2, %v1427_v12 }
  0xe4   :  { %v776_v19 = vadd.f32 %v2861_v17, %v3463_v59  ;;  %v767_v20 = vpop.f32.mrb[7].mxu0  ;;  %2995 = vmatmul.mubr.msk.bf16.vlgmr.msra.gmra.mrb[0].mxu1 %vm1511_vm2, %v1428_v10  ;;  %v1297_v22 = vmax.f32 %v773_v13, 0.0 }
  0xe5   :  { %v768_v21 = vadd.f32 %v3463_v59, %v767_v20  ;;  %v1295_v24 = vmax.f32 %v765_v16, 0.0  ;;  %v3198_v16 = vld [vmem:[%s3931_s0 + $0x208] sm:$0xff]  }
  0xe6   :  { %v1298_v23 = vmax.f32 %v776_v19, 0.0  ;;  %2967 = vmatmul.mubr.msk.bf16.gmra.mrb[112].mxu0 %vm505_vm1, %v3190_v15  ;;  %v3199_v19 = vld [vmem:[%s3931_s0 + $0x210] sm:$0xff]  }
  0xe7   :  { %v1296_v25 = vmax.f32 %v768_v21, 0.0  ;;  %2970 = vmatprep.mubr.msk.bf16.mxu0 %vm505_vm1, %v3191_v18 }
  0xe8   :  { %v1430_v26 = vpack.c.bf16 %v1298_v23, %v1297_v22 }
  0xe9   :  { %v1429_v27 = vpack.c.bf16 %v1296_v25, %v1295_v24  ;;  %v2864_v28 = vpop.f32.mrb[8].mxu0 }
  0xea   :  { %v789_v29 = vadd.f32 %v2864_v28, %v3463_v59  ;;  %v780_v30 = vpop.f32.mrb[9].mxu0 }
  0xeb   :  { %v781_v32 = vadd.f32 %v3463_v59, %v780_v30  ;;  %v2865_v33 = vpop.f32.mrb[10].mxu0  ;;  %2998 = vmatprep.mubr.msk.bf16.mxu1 %vm1511_vm2, %v1429_v27 }
  0xec   :  { %v792_v35 = vadd.f32 %v2865_v33, %v3463_v59  ;;  %v783_v36 = vpop.f32.mrb[11].mxu0  ;;  %2999 = vmatmul.mubr.msk.bf16.gmra.mrb[4].mxu1 %vm1511_vm2, %v1430_v26  ;;  %v1301_v38 = vmax.f32 %v789_v29, 0.0 }
  0xed   :  { %v784_v37 = vadd.f32 %v3463_v59, %v783_v36  ;;  %v1299_v40 = vmax.f32 %v781_v32, 0.0  ;;  %v3200_v32 = vld [vmem:[%s3931_s0 + $0x218] sm:$0xff]  }
  0xee   :  { %v1302_v39 = vmax.f32 %v792_v35, 0.0  ;;  %2971 = vmatmul.mubr.msk.bf16.gmra.mrb[116].mxu0 %vm505_vm1, %v3192_v31 }
  0xef   :  { %v1300_v41 = vmax.f32 %v784_v37, 0.0  ;;  %2974 = vmatprep.mubr.msk.bf16.mxu0 %vm505_vm1, %v3193_v34 }
  0xf0   :  { %v1432_v42 = vpack.c.bf16 %v1302_v39, %v1301_v38 }
  0xf1   :  { %v1431_v43 = vpack.c.bf16 %v1300_v41, %v1299_v40  ;;  %v2868_v44 = vpop.f32.mrb[12].mxu0 }
  0xf2   :  { %v805_v45 = vadd.f32 %v2868_v44, %v3463_v59  ;;  %v796_v46 = vpop.f32.mrb[13].mxu0 }
  0xf3   :  { %v797_v48 = vadd.f32 %v3463_v59, %v796_v46  ;;  %v2869_v49 = vpop.f32.mrb[14].mxu0  ;;  %3002 = vmatprep.mubr.msk.bf16.mxu1 %vm1511_vm2, %v1431_v43 }
  0xf4   :  { %v808_v51 = vadd.f32 %v2869_v49, %v3463_v59  ;;  %v799_v52 = vpop.f32.mrb[15].mxu0  ;;  %3003 = vmatmul.mubr.msk.bf16.gmra.mrb[8].mxu1 %vm1511_vm2, %v1432_v42  ;;  %v1305_v54 = vmax.f32 %v805_v45, 0.0 }
  0xf5   :  { %v800_v53 = vadd.f32 %v3463_v59, %v799_v52  ;;  %v1303_v56 = vmax.f32 %v797_v48, 0.0 }
  0xf6   :  { %v1306_v55 = vmax.f32 %v808_v51, 0.0  ;;  %2975 = vmatmul.mubr.msk.bf16.gmra.mrb[120].mxu0 %vm505_vm1, %v3194_v47 }
  0xf7   :  { %v1304_v57 = vmax.f32 %v800_v53, 0.0  ;;  %2978 = vmatprep.mubr.msk.bf16.mxu0 %vm505_vm1, %v3195_v50 }
  0xf8   :  { %v1434_v58 = vpack.c.bf16 %v1306_v55, %v1305_v54 }
  0xf9   :  { %v1433_v60 = vpack.c.bf16 %v1304_v57, %v1303_v56  ;;  %v2872_v61 = vpop.f32.mrb[16].mxu0 }
  0xfa   :  { %v821_v62 = vadd.f32 %v2872_v61, %v3463_v59  ;;  %v812_v63 = vpop.f32.mrb[17].mxu0 }
  0xfb   :  { %v813_v1 = vadd.f32 %v3463_v59, %v812_v63  ;;  %v2873_v2 = vpop.f32.mrb[18].mxu0  ;;  %3006 = vmatprep.mubr.msk.bf16.mxu1 %vm1511_vm2, %v1433_v60 }
  0xfc   :  { %v824_v4 = vadd.f32 %v2873_v2, %v3463_v59  ;;  %v815_v5 = vpop.f32.mrb[19].mxu0  ;;  %3007 = vmatmul.mubr.msk.bf16.gmra.mrb[12].mxu1 %vm1511_vm2, %v1434_v58  ;;  %v1309_v7 = vmax.f32 %v821_v62, 0.0 }
  0xfd   :  { %v816_v6 = vadd.f32 %v3463_v59, %v815_v5  ;;  %v1307_v9 = vmax.f32 %v813_v1, 0.0 }
  0xfe   :  { %v1310_v8 = vmax.f32 %v824_v4, 0.0  ;;  %2979 = vmatmul.mubr.msk.bf16.gmra.mrb[124].mxu0 %vm505_vm1, %v3196_v0 }
  0xff   :  { %v1308_v10 = vmax.f32 %v816_v6, 0.0  ;;  %2982 = vmatprep.mubr.msk.bf16.mxu0 %vm505_vm1, %v3197_v3 }
 0x100   :  { %v1436_v11 = vpack.c.bf16 %v1310_v8, %v1309_v7 }
 0x101   :  { %v1435_v12 = vpack.c.bf16 %v1308_v10, %v1307_v9  ;;  %v2876_v13 = vpop.f32.mrb[20].mxu0 }
 0x102   :  { %v837_v14 = vadd.f32 %v2876_v13, %v3463_v59  ;;  %v828_v15 = vpop.f32.mrb[21].mxu0 }
 0x103   :  { %v829_v17 = vadd.f32 %v3463_v59, %v828_v15  ;;  %v2877_v18 = vpop.f32.mrb[22].mxu0  ;;  %3010 = vmatprep.mubr.msk.bf16.mxu1 %vm1511_vm2, %v1435_v12 }
 0x104   :  { %v840_v20 = vadd.f32 %v2877_v18, %v3463_v59  ;;  %v831_v21 = vpop.f32.mrb[23].mxu0  ;;  %3011 = vmatmul.mubr.msk.bf16.gmra.mrb[16].mxu1 %vm1511_vm2, %v1436_v11  ;;  %v1313_v23 = vmax.f32 %v837_v14, 0.0 }
 0x105   :  { %v832_v22 = vadd.f32 %v3463_v59, %v831_v21  ;;  %v1311_v25 = vmax.f32 %v829_v17, 0.0 }
 0x106   :  { %v1314_v24 = vmax.f32 %v840_v20, 0.0  ;;  %2983 = vmatmul.mubr.msk.bf16.gmra.mrb[128].mxu0 %vm505_vm1, %v3198_v16 }
 0x107   :  { %v1312_v26 = vmax.f32 %v832_v22, 0.0  ;;  %2986 = vmatprep.mubr.msk.bf16.mxu0 %vm505_vm1, %v3199_v19 }
 0x108   :  { %v1438_v27 = vpack.c.bf16 %v1314_v24, %v1313_v23 }
 0x109   :  { %v1437_v28 = vpack.c.bf16 %v1312_v26, %v1311_v25  ;;  %v2880_v29 = vpop.f32.mrb[24].mxu0 }
 0x10a   :  { %v853_v30 = vadd.f32 %v2880_v29, %v3463_v59  ;;  %v844_v31 = vpop.f32.mrb[25].mxu0 }
 0x10b   :  { %v845_v33 = vadd.f32 %v3463_v59, %v844_v31  ;;  %v2881_v34 = vpop.f32.mrb[26].mxu0  ;;  %3014 = vmatprep.mubr.msk.bf16.mxu1 %vm1511_vm2, %v1437_v28 }
 0x10c   :  { %v856_v35 = vadd.f32 %v2881_v34, %v3463_v59  ;;  %v847_v36 = vpop.f32.mrb[27].mxu0  ;;  %3015 = vmatmul.mubr.msk.bf16.gmra.mrb[20].mxu1 %vm1511_vm2, %v1438_v27  ;;  %v1317_v38 = vmax.f32 %v853_v30, 0.0 }
 0x10d   :  { %v848_v37 = vadd.f32 %v3463_v59, %v847_v36  ;;  %v1315_v40 = vmax.f32 %v845_v33, 0.0 }
 0x10e   :  { %v1318_v39 = vmax.f32 %v856_v35, 0.0  ;;  %2987 = vmatmul.mubr.msk.bf16.gmra.mrb[132].mxu0 %vm505_vm1, %v3200_v32 }
 0x10f   :  { %v1316_v41 = vmax.f32 %v848_v37, 0.0 }
 0x110   :  { %v1440_v42 = vpack.c.bf16 %v1318_v39, %v1317_v38 }
 0x111   :  { %v1439_v43 = vpack.c.bf16 %v1316_v41, %v1315_v40  ;;  %v2884_v44 = vpop.f32.mrb[28].mxu0 }
 0x112   :  { %v869_v45 = vadd.f32 %v2884_v44, %v3463_v59  ;;  %v860_v46 = vpop.f32.mrb[29].mxu0 }
 0x113   :  { %v861_v47 = vadd.f32 %v3463_v59, %v860_v46  ;;  %v2885_v48 = vpop.f32.mrb[30].mxu0  ;;  %3018 = vmatprep.mubr.msk.bf16.mxu1 %vm1511_vm2, %v1439_v43 }
 0x114   :  { %v872_v49 = vadd.f32 %v2885_v48, %v3463_v59  ;;  %v863_v50 = vpop.f32.mrb[31].mxu0  ;;  %3019 = vmatmul.mubr.msk.bf16.gmra.mrb[24].mxu1 %vm1511_vm2, %v1440_v42  ;;  %v1321_v52 = vmax.f32 %v869_v45, 0.0 }
 0x115   :  { %v864_v51 = vadd.f32 %v3463_v59, %v863_v50  ;;  %v1319_v54 = vmax.f32 %v861_v47, 0.0 }
 0x116   :  { %v1322_v53 = vmax.f32 %v872_v49, 0.0 }
 0x117   :  { %v1320_v55 = vmax.f32 %v864_v51, 0.0 }
 0x118   :  { %v1442_v56 = vpack.c.bf16 %v1322_v53, %v1321_v52 }
 0x119   :  { %v1441_v57 = vpack.c.bf16 %v1320_v55, %v1319_v54  ;;  %v2888_v58 = vpop.f32.mrb[32].mxu0 }
 0x11a   :  { %v885_v60 = vadd.f32 %v2888_v58, %v3463_v59  ;;  %v876_v61 = vpop.f32.mrb[33].mxu0 }
 0x11b   :  { %v877_v62 = vadd.f32 %v3463_v59, %v876_v61  ;;  %v2889_v63 = vpop.f32.mrb[34].mxu0  ;;  %3022 = vmatprep.mubr.msk.bf16.mxu1 %vm1511_vm2, %v1441_v57 }
 0x11c   :  { %v888_v0 = vadd.f32 %v2889_v63, %v3463_v59  ;;  %v879_v1 = vpop.f32.mrb[35].mxu0  ;;  %3023 = vmatmul.mubr.msk.bf16.gmra.mrb[28].mxu1 %vm1511_vm2, %v1442_v56  ;;  %v1325_v3 = vmax.f32 %v885_v60, 0.0 }
 0x11d   :  { %v880_v2 = vadd.f32 %v3463_v59, %v879_v1  ;;  %v1323_v5 = vmax.f32 %v877_v62, 0.0 }
 0x11e   :  { %v1326_v4 = vmax.f32 %v888_v0, 0.0 }
 0x11f   :  { %v1324_v6 = vmax.f32 %v880_v2, 0.0 }
 0x120   :  { %v1444_v7 = vpack.c.bf16 %v1326_v4, %v1325_v3 }
 0x121   :  { %v1443_v8 = vpack.c.bf16 %v1324_v6, %v1323_v5  ;;  %v2892_v9 = vpop.f32.mrb[36].mxu0 }
 0x122   :  { %v901_v10 = vadd.f32 %v2892_v9, %v3463_v59  ;;  %v892_v11 = vpop.f32.mrb[37].mxu0 }
 0x123   :  { %v893_v12 = vadd.f32 %v3463_v59, %v892_v11  ;;  %v2893_v13 = vpop.f32.mrb[38].mxu0  ;;  %3026 = vmatprep.mubr.msk.bf16.mxu1 %vm1511_vm2, %v1443_v8 }
 0x124   :  { %v904_v14 = vadd.f32 %v2893_v13, %v3463_v59  ;;  %v895_v15 = vpop.f32.mrb[39].mxu0  ;;  %3027 = vmatmul.mubr.msk.bf16.gmra.mrb[32].mxu1 %vm1511_vm2, %v1444_v7  ;;  %v1329_v17 = vmax.f32 %v901_v10, 0.0 }
 0x125   :  { %v896_v16 = vadd.f32 %v3463_v59, %v895_v15  ;;  %v1327_v19 = vmax.f32 %v893_v12, 0.0 }
 0x126   :  { %v1330_v18 = vmax.f32 %v904_v14, 0.0 }
 0x127   :  { %v1328_v20 = vmax.f32 %v896_v16, 0.0 }
 0x128   :  { %v1446_v21 = vpack.c.bf16 %v1330_v18, %v1329_v17 }
 0x129   :  { %v1445_v22 = vpack.c.bf16 %v1328_v20, %v1327_v19  ;;  %v2896_v23 = vpop.f32.mrb[40].mxu0 }
 0x12a   :  { %v917_v24 = vadd.f32 %v2896_v23, %v3463_v59  ;;  %v908_v25 = vpop.f32.mrb[41].mxu0 }
 0x12b   :  { %v909_v26 = vadd.f32 %v3463_v59, %v908_v25  ;;  %v2897_v27 = vpop.f32.mrb[42].mxu0  ;;  %3030 = vmatprep.mubr.msk.bf16.mxu1 %vm1511_vm2, %v1445_v22 }
 0x12c   :  { %v920_v28 = vadd.f32 %v2897_v27, %v3463_v59  ;;  %v911_v29 = vpop.f32.mrb[43].mxu0  ;;  %3031 = vmatmul.mubr.msk.bf16.gmra.mrb[36].mxu1 %vm1511_vm2, %v1446_v21  ;;  %v1333_v31 = vmax.f32 %v917_v24, 0.0 }
 0x12d   :  { %v912_v30 = vadd.f32 %v3463_v59, %v911_v29  ;;  %v1331_v33 = vmax.f32 %v909_v26, 0.0 }
 0x12e   :  { %v1334_v32 = vmax.f32 %v920_v28, 0.0 }
 0x12f   :  { %v1332_v34 = vmax.f32 %v912_v30, 0.0 }
 0x130   :  { %v1448_v35 = vpack.c.bf16 %v1334_v32, %v1333_v31 }
 0x131   :  { %v1447_v36 = vpack.c.bf16 %v1332_v34, %v1331_v33  ;;  %v2900_v37 = vpop.f32.mrb[44].mxu0 }
 0x132   :  { %v933_v38 = vadd.f32 %v2900_v37, %v3463_v59  ;;  %v924_v39 = vpop.f32.mrb[45].mxu0 }
 0x133   :  { %v925_v40 = vadd.f32 %v3463_v59, %v924_v39  ;;  %v2901_v41 = vpop.f32.mrb[46].mxu0  ;;  %3034 = vmatprep.mubr.msk.bf16.mxu1 %vm1511_vm2, %v1447_v36 }
 0x134   :  { %v936_v42 = vadd.f32 %v2901_v41, %v3463_v59  ;;  %v927_v43 = vpop.f32.mrb[47].mxu0  ;;  %3035 = vmatmul.mubr.msk.bf16.gmra.mrb[40].mxu1 %vm1511_vm2, %v1448_v35  ;;  %v1337_v45 = vmax.f32 %v933_v38, 0.0 }
 0x135   :  { %v928_v44 = vadd.f32 %v3463_v59, %v927_v43  ;;  %v1335_v47 = vmax.f32 %v925_v40, 0.0 }
 0x136   :  { %v1338_v46 = vmax.f32 %v936_v42, 0.0 }
 0x137   :  { %v1336_v48 = vmax.f32 %v928_v44, 0.0 }
 0x138   :  { %v1450_v49 = vpack.c.bf16 %v1338_v46, %v1337_v45 }
 0x139   :  { %v1449_v50 = vpack.c.bf16 %v1336_v48, %v1335_v47  ;;  %v2904_v51 = vpop.f32.mrb[48].mxu0 }
 0x13a   :  { %v949_v52 = vadd.f32 %v2904_v51, %v3463_v59  ;;  %v940_v53 = vpop.f32.mrb[49].mxu0 }
 0x13b   :  { %v941_v54 = vadd.f32 %v3463_v59, %v940_v53  ;;  %v2905_v55 = vpop.f32.mrb[50].mxu0  ;;  %3038 = vmatprep.mubr.msk.bf16.mxu1 %vm1511_vm2, %v1449_v50 }
 0x13c   :  { %v952_v56 = vadd.f32 %v2905_v55, %v3463_v59  ;;  %v943_v57 = vpop.f32.mrb[51].mxu0  ;;  %3039 = vmatmul.mubr.msk.bf16.gmra.mrb[44].mxu1 %vm1511_vm2, %v1450_v49  ;;  %v1341_v60 = vmax.f32 %v949_v52, 0.0 }
 0x13d   :  { %v944_v58 = vadd.f32 %v3463_v59, %v943_v57  ;;  %v1339_v62 = vmax.f32 %v941_v54, 0.0 }
 0x13e   :  { %v1342_v61 = vmax.f32 %v952_v56, 0.0 }
 0x13f   :  { %v1340_v63 = vmax.f32 %v944_v58, 0.0 }
 0x140   :  { %v1452_v0 = vpack.c.bf16 %v1342_v61, %v1341_v60 }
 0x141   :  { %v1451_v1 = vpack.c.bf16 %v1340_v63, %v1339_v62  ;;  %v2908_v2 = vpop.f32.mrb[52].mxu0 }
 0x142   :  { %v965_v3 = vadd.f32 %v2908_v2, %v3463_v59  ;;  %v956_v4 = vpop.f32.mrb[53].mxu0 }
 0x143   :  { %v957_v5 = vadd.f32 %v3463_v59, %v956_v4  ;;  %v2909_v6 = vpop.f32.mrb[54].mxu0  ;;  %3042 = vmatprep.mubr.msk.bf16.mxu1 %vm1511_vm2, %v1451_v1 }
 0x144   :  { %v968_v7 = vadd.f32 %v2909_v6, %v3463_v59  ;;  %v959_v8 = vpop.f32.mrb[55].mxu0  ;;  %3043 = vmatmul.mubr.msk.bf16.gmra.mrb[48].mxu1 %vm1511_vm2, %v1452_v0  ;;  %v1345_v10 = vmax.f32 %v965_v3, 0.0 }
 0x145   :  { %v960_v9 = vadd.f32 %v3463_v59, %v959_v8  ;;  %v1343_v12 = vmax.f32 %v957_v5, 0.0 }
 0x146   :  { %v1346_v11 = vmax.f32 %v968_v7, 0.0 }
 0x147   :  { %v1344_v13 = vmax.f32 %v960_v9, 0.0 }
 0x148   :  { %v1454_v14 = vpack.c.bf16 %v1346_v11, %v1345_v10 }
 0x149   :  { %v1453_v15 = vpack.c.bf16 %v1344_v13, %v1343_v12  ;;  %v2912_v16 = vpop.f32.mrb[56].mxu0 }
 0x14a   :  { %v981_v17 = vadd.f32 %v2912_v16, %v3463_v59  ;;  %v972_v18 = vpop.f32.mrb[57].mxu0 }
 0x14b   :  { %v973_v19 = vadd.f32 %v3463_v59, %v972_v18  ;;  %v2913_v20 = vpop.f32.mrb[58].mxu0  ;;  %3046 = vmatprep.mubr.msk.bf16.mxu1 %vm1511_vm2, %v1453_v15 }
 0x14c   :  { %v984_v21 = vadd.f32 %v2913_v20, %v3463_v59  ;;  %v975_v22 = vpop.f32.mrb[59].mxu0  ;;  %3047 = vmatmul.mubr.msk.bf16.gmra.mrb[52].mxu1 %vm1511_vm2, %v1454_v14  ;;  %v1349_v24 = vmax.f32 %v981_v17, 0.0 }
 0x14d   :  { %v976_v23 = vadd.f32 %v3463_v59, %v975_v22  ;;  %v1347_v26 = vmax.f32 %v973_v19, 0.0 }
 0x14e   :  { %v1350_v25 = vmax.f32 %v984_v21, 0.0 }
 0x14f   :  { %v1348_v27 = vmax.f32 %v976_v23, 0.0 }
 0x150   :  { %v1456_v28 = vpack.c.bf16 %v1350_v25, %v1349_v24 }
 0x151   :  { %v1455_v29 = vpack.c.bf16 %v1348_v27, %v1347_v26  ;;  %v2916_v30 = vpop.f32.mrb[60].mxu0 }
 0x152   :  { %v997_v31 = vadd.f32 %v2916_v30, %v3463_v59  ;;  %v988_v32 = vpop.f32.mrb[61].mxu0 }
 0x153   :  { %v989_v33 = vadd.f32 %v3463_v59, %v988_v32  ;;  %v2917_v34 = vpop.f32.mrb[62].mxu0  ;;  %3050 = vmatprep.mubr.msk.bf16.mxu1 %vm1511_vm2, %v1455_v29 }
 0x154   :  { %v1000_v35 = vadd.f32 %v2917_v34, %v3463_v59  ;;  %v991_v36 = vpop.f32.mrb[63].mxu0  ;;  %3051 = vmatmul.mubr.msk.bf16.gmra.mrb[56].mxu1 %vm1511_vm2, %v1456_v28  ;;  %v1353_v38 = vmax.f32 %v997_v31, 0.0 }
 0x155   :  { %v992_v37 = vadd.f32 %v3463_v59, %v991_v36  ;;  %v1351_v40 = vmax.f32 %v989_v33, 0.0 }
 0x156   :  { %v1354_v39 = vmax.f32 %v1000_v35, 0.0 }
 0x157   :  { %v1352_v41 = vmax.f32 %v992_v37, 0.0 }
 0x158   :  { %v1458_v42 = vpack.c.bf16 %v1354_v39, %v1353_v38 }
 0x159   :  { %v1457_v43 = vpack.c.bf16 %v1352_v41, %v1351_v40  ;;  %v2920_v44 = vpop.f32.mrb[64].mxu0 }
 0x15a   :  { %v1013_v45 = vadd.f32 %v2920_v44, %v3463_v59  ;;  %v1004_v46 = vpop.f32.mrb[65].mxu0 }
 0x15b   :  { %v1005_v47 = vadd.f32 %v3463_v59, %v1004_v46  ;;  %v2921_v48 = vpop.f32.mrb[66].mxu0  ;;  %3054 = vmatprep.mubr.msk.bf16.mxu1 %vm1511_vm2, %v1457_v43 }
 0x15c   :  { %v1016_v49 = vadd.f32 %v2921_v48, %v3463_v59  ;;  %v1007_v50 = vpop.f32.mrb[67].mxu0  ;;  %3055 = vmatmul.mubr.msk.bf16.gmra.mrb[60].mxu1 %vm1511_vm2, %v1458_v42  ;;  %v1357_v52 = vmax.f32 %v1013_v45, 0.0 }
 0x15d   :  { %v1008_v51 = vadd.f32 %v3463_v59, %v1007_v50  ;;  %v1355_v54 = vmax.f32 %v1005_v47, 0.0 }
 0x15e   :  { %v1358_v53 = vmax.f32 %v1016_v49, 0.0 }
 0x15f   :  { %v1356_v55 = vmax.f32 %v1008_v51, 0.0 }
 0x160   :  { %v1460_v56 = vpack.c.bf16 %v1358_v53, %v1357_v52 }
 0x161   :  { %v1459_v57 = vpack.c.bf16 %v1356_v55, %v1355_v54  ;;  %v2924_v58 = vpop.f32.mrb[68].mxu0 }
 0x162   :  { %v1029_v60 = vadd.f32 %v2924_v58, %v3463_v59  ;;  %v1020_v61 = vpop.f32.mrb[69].mxu0 }
 0x163   :  { %v1021_v62 = vadd.f32 %v3463_v59, %v1020_v61  ;;  %v2925_v63 = vpop.f32.mrb[70].mxu0  ;;  %3058 = vmatprep.mubr.msk.bf16.mxu1 %vm1511_vm2, %v1459_v57 }
 0x164   :  { %v1032_v0 = vadd.f32 %v2925_v63, %v3463_v59  ;;  %v1023_v1 = vpop.f32.mrb[71].mxu0  ;;  %3059 = vmatmul.mubr.msk.bf16.gmra.mrb[64].mxu1 %vm1511_vm2, %v1460_v56  ;;  %v1361_v3 = vmax.f32 %v1029_v60, 0.0 }
 0x165   :  { %v1024_v2 = vadd.f32 %v3463_v59, %v1023_v1  ;;  %v1359_v5 = vmax.f32 %v1021_v62, 0.0 }
 0x166   :  { %v1362_v4 = vmax.f32 %v1032_v0, 0.0 }
 0x167   :  { %v1360_v6 = vmax.f32 %v1024_v2, 0.0 }
 0x168   :  { %v1462_v7 = vpack.c.bf16 %v1362_v4, %v1361_v3 }
 0x169   :  { %v1461_v8 = vpack.c.bf16 %v1360_v6, %v1359_v5  ;;  %v2928_v9 = vpop.f32.mrb[72].mxu0 }
 0x16a   :  { %v1045_v10 = vadd.f32 %v2928_v9, %v3463_v59  ;;  %v1036_v11 = vpop.f32.mrb[73].mxu0 }
 0x16b   :  { %v1037_v12 = vadd.f32 %v3463_v59, %v1036_v11  ;;  %v2929_v13 = vpop.f32.mrb[74].mxu0  ;;  %3062 = vmatprep.mubr.msk.bf16.mxu1 %vm1511_vm2, %v1461_v8 }
 0x16c   :  { %v1048_v14 = vadd.f32 %v2929_v13, %v3463_v59  ;;  %v1039_v15 = vpop.f32.mrb[75].mxu0  ;;  %3063 = vmatmul.mubr.msk.bf16.gmra.mrb[68].mxu1 %vm1511_vm2, %v1462_v7  ;;  %v1365_v17 = vmax.f32 %v1045_v10, 0.0 }
 0x16d   :  { %v1040_v16 = vadd.f32 %v3463_v59, %v1039_v15  ;;  %v1363_v19 = vmax.f32 %v1037_v12, 0.0 }
 0x16e   :  { %v1366_v18 = vmax.f32 %v1048_v14, 0.0 }
 0x16f   :  { %v1364_v20 = vmax.f32 %v1040_v16, 0.0 }
 0x170   :  { %v1464_v21 = vpack.c.bf16 %v1366_v18, %v1365_v17 }
 0x171   :  { %v1463_v22 = vpack.c.bf16 %v1364_v20, %v1363_v19  ;;  %v2932_v23 = vpop.f32.mrb[76].mxu0 }
 0x172   :  { %v1061_v24 = vadd.f32 %v2932_v23, %v3463_v59  ;;  %v1052_v25 = vpop.f32.mrb[77].mxu0 }
 0x173   :  { %v1053_v26 = vadd.f32 %v3463_v59, %v1052_v25  ;;  %v2933_v27 = vpop.f32.mrb[78].mxu0  ;;  %3066 = vmatprep.mubr.msk.bf16.mxu1 %vm1511_vm2, %v1463_v22 }
 0x174   :  { %v1064_v28 = vadd.f32 %v2933_v27, %v3463_v59  ;;  %v1055_v29 = vpop.f32.mrb[79].mxu0  ;;  %3067 = vmatmul.mubr.msk.bf16.gmra.mrb[72].mxu1 %vm1511_vm2, %v1464_v21  ;;  %v1369_v31 = vmax.f32 %v1061_v24, 0.0 }
 0x175   :  { %v1056_v30 = vadd.f32 %v3463_v59, %v1055_v29  ;;  %v1367_v33 = vmax.f32 %v1053_v26, 0.0 }
 0x176   :  { %v1370_v32 = vmax.f32 %v1064_v28, 0.0 }
 0x177   :  { %v1368_v34 = vmax.f32 %v1056_v30, 0.0 }
 0x178   :  { %v1466_v35 = vpack.c.bf16 %v1370_v32, %v1369_v31 }
 0x179   :  { %v1465_v36 = vpack.c.bf16 %v1368_v34, %v1367_v33  ;;  %v2936_v37 = vpop.f32.mrb[80].mxu0 }
 0x17a   :  { %v1077_v38 = vadd.f32 %v2936_v37, %v3463_v59  ;;  %v1068_v39 = vpop.f32.mrb[81].mxu0 }
 0x17b   :  { %v1069_v40 = vadd.f32 %v3463_v59, %v1068_v39  ;;  %v2937_v41 = vpop.f32.mrb[82].mxu0  ;;  %3070 = vmatprep.mubr.msk.bf16.mxu1 %vm1511_vm2, %v1465_v36 }
 0x17c   :  { %v1080_v42 = vadd.f32 %v2937_v41, %v3463_v59  ;;  %v1071_v43 = vpop.f32.mrb[83].mxu0  ;;  %3071 = vmatmul.mubr.msk.bf16.gmra.mrb[76].mxu1 %vm1511_vm2, %v1466_v35  ;;  %v1373_v45 = vmax.f32 %v1077_v38, 0.0 }
 0x17d   :  { %v1072_v44 = vadd.f32 %v3463_v59, %v1071_v43  ;;  %v1371_v47 = vmax.f32 %v1069_v40, 0.0 }
 0x17e   :  { %v1374_v46 = vmax.f32 %v1080_v42, 0.0 }
 0x17f   :  { %v1372_v48 = vmax.f32 %v1072_v44, 0.0 }
 0x180   :  { %v1468_v49 = vpack.c.bf16 %v1374_v46, %v1373_v45 }
 0x181   :  { %v1467_v50 = vpack.c.bf16 %v1372_v48, %v1371_v47  ;;  %v2940_v51 = vpop.f32.mrb[84].mxu0 }
 0x182   :  { %v1093_v52 = vadd.f32 %v2940_v51, %v3463_v59  ;;  %v1084_v53 = vpop.f32.mrb[85].mxu0 }
 0x183   :  { %v1085_v54 = vadd.f32 %v3463_v59, %v1084_v53  ;;  %v2941_v55 = vpop.f32.mrb[86].mxu0  ;;  %3074 = vmatprep.mubr.msk.bf16.mxu1 %vm1511_vm2, %v1467_v50 }
 0x184   :  { %v1096_v56 = vadd.f32 %v2941_v55, %v3463_v59  ;;  %v1087_v57 = vpop.f32.mrb[87].mxu0  ;;  %3075 = vmatmul.mubr.msk.bf16.gmra.mrb[80].mxu1 %vm1511_vm2, %v1468_v49  ;;  %v1377_v60 = vmax.f32 %v1093_v52, 0.0 }
 0x185   :  { %v1088_v58 = vadd.f32 %v3463_v59, %v1087_v57  ;;  %v1375_v62 = vmax.f32 %v1085_v54, 0.0 }
 0x186   :  { %v1378_v61 = vmax.f32 %v1096_v56, 0.0 }
 0x187   :  { %v1376_v63 = vmax.f32 %v1088_v58, 0.0 }
 0x188   :  { %v1470_v0 = vpack.c.bf16 %v1378_v61, %v1377_v60 }
 0x189   :  { %v1469_v1 = vpack.c.bf16 %v1376_v63, %v1375_v62  ;;  %v2944_v2 = vpop.f32.mrb[88].mxu0 }
 0x18a   :  { %v1109_v3 = vadd.f32 %v2944_v2, %v3463_v59  ;;  %v1100_v4 = vpop.f32.mrb[89].mxu0 }
 0x18b   :  { %v1101_v5 = vadd.f32 %v3463_v59, %v1100_v4  ;;  %v2945_v6 = vpop.f32.mrb[90].mxu0  ;;  %3078 = vmatprep.mubr.msk.bf16.mxu1 %vm1511_vm2, %v1469_v1 }
 0x18c   :  { %v1112_v7 = vadd.f32 %v2945_v6, %v3463_v59  ;;  %v1103_v8 = vpop.f32.mrb[91].mxu0  ;;  %3079 = vmatmul.mubr.msk.bf16.gmra.mrb[84].mxu1 %vm1511_vm2, %v1470_v0  ;;  %v1381_v10 = vmax.f32 %v1109_v3, 0.0 }
 0x18d   :  { %v1104_v9 = vadd.f32 %v3463_v59, %v1103_v8  ;;  %v1379_v12 = vmax.f32 %v1101_v5, 0.0 }
 0x18e   :  { %v1382_v11 = vmax.f32 %v1112_v7, 0.0 }
 0x18f   :  { %v1380_v13 = vmax.f32 %v1104_v9, 0.0 }
 0x190   :  { %v1472_v14 = vpack.c.bf16 %v1382_v11, %v1381_v10 }
 0x191   :  { %v1471_v15 = vpack.c.bf16 %v1380_v13, %v1379_v12  ;;  %v2948_v16 = vpop.f32.mrb[92].mxu0 }
 0x192   :  { %v1125_v17 = vadd.f32 %v2948_v16, %v3463_v59  ;;  %v1116_v18 = vpop.f32.mrb[93].mxu0 }
 0x193   :  { %v1117_v19 = vadd.f32 %v3463_v59, %v1116_v18  ;;  %v2949_v20 = vpop.f32.mrb[94].mxu0  ;;  %3082 = vmatprep.mubr.msk.bf16.mxu1 %vm1511_vm2, %v1471_v15 }
 0x194   :  { %v1128_v21 = vadd.f32 %v2949_v20, %v3463_v59  ;;  %v1119_v22 = vpop.f32.mrb[95].mxu0  ;;  %3083 = vmatmul.mubr.msk.bf16.gmra.mrb[88].mxu1 %vm1511_vm2, %v1472_v14  ;;  %v1385_v24 = vmax.f32 %v1125_v17, 0.0 }
 0x195   :  { %v1120_v23 = vadd.f32 %v3463_v59, %v1119_v22  ;;  %v1383_v26 = vmax.f32 %v1117_v19, 0.0 }
 0x196   :  { %v1386_v25 = vmax.f32 %v1128_v21, 0.0 }
 0x197   :  { %v1384_v27 = vmax.f32 %v1120_v23, 0.0 }
 0x198   :  { %v1474_v28 = vpack.c.bf16 %v1386_v25, %v1385_v24 }
 0x199   :  { %v1473_v29 = vpack.c.bf16 %v1384_v27, %v1383_v26  ;;  %v2952_v30 = vpop.f32.mrb[96].mxu0 }
 0x19a   :  { %v1141_v31 = vadd.f32 %v2952_v30, %v3463_v59  ;;  %v1132_v32 = vpop.f32.mrb[97].mxu0 }
 0x19b   :  { %v1133_v33 = vadd.f32 %v3463_v59, %v1132_v32  ;;  %v2953_v34 = vpop.f32.mrb[98].mxu0  ;;  %3086 = vmatprep.mubr.msk.bf16.mxu1 %vm1511_vm2, %v1473_v29 }
 0x19c   :  { %v1144_v35 = vadd.f32 %v2953_v34, %v3463_v59  ;;  %v1135_v36 = vpop.f32.mrb[99].mxu0  ;;  %3087 = vmatmul.mubr.msk.bf16.gmra.mrb[92].mxu1 %vm1511_vm2, %v1474_v28  ;;  %v1389_v38 = vmax.f32 %v1141_v31, 0.0 }
 0x19d   :  { %v1136_v37 = vadd.f32 %v3463_v59, %v1135_v36  ;;  %v1387_v40 = vmax.f32 %v1133_v33, 0.0 }
 0x19e   :  { %v1390_v39 = vmax.f32 %v1144_v35, 0.0 }
 0x19f   :  { %v1388_v41 = vmax.f32 %v1136_v37, 0.0 }
 0x1a0   :  { %v1476_v42 = vpack.c.bf16 %v1390_v39, %v1389_v38 }
 0x1a1   :  { %v1475_v43 = vpack.c.bf16 %v1388_v41, %v1387_v40  ;;  %v2956_v44 = vpop.f32.mrb[100].mxu0 }
 0x1a2   :  { %v1157_v45 = vadd.f32 %v2956_v44, %v3463_v59  ;;  %v1148_v46 = vpop.f32.mrb[101].mxu0 }
 0x1a3   :  { %v1149_v47 = vadd.f32 %v3463_v59, %v1148_v46  ;;  %v2957_v48 = vpop.f32.mrb[102].mxu0  ;;  %3090 = vmatprep.mubr.msk.bf16.mxu1 %vm1511_vm2, %v1475_v43 }
 0x1a4   :  { %v1160_v49 = vadd.f32 %v2957_v48, %v3463_v59  ;;  %v1151_v50 = vpop.f32.mrb[103].mxu0  ;;  %3091 = vmatmul.mubr.msk.bf16.gmra.mrb[96].mxu1 %vm1511_vm2, %v1476_v42  ;;  %v1393_v52 = vmax.f32 %v1157_v45, 0.0 }
 0x1a5   :  { %v1152_v51 = vadd.f32 %v3463_v59, %v1151_v50  ;;  %v1391_v54 = vmax.f32 %v1149_v47, 0.0 }
 0x1a6   :  { %v1394_v53 = vmax.f32 %v1160_v49, 0.0 }
 0x1a7   :  { %v1392_v55 = vmax.f32 %v1152_v51, 0.0 }
 0x1a8   :  { %v1478_v56 = vpack.c.bf16 %v1394_v53, %v1393_v52 }
 0x1a9   :  { %v1477_v57 = vpack.c.bf16 %v1392_v55, %v1391_v54  ;;  %v2960_v58 = vpop.f32.mrb[104].mxu0 }
 0x1aa   :  { %v1173_v60 = vadd.f32 %v2960_v58, %v3463_v59  ;;  %v1164_v61 = vpop.f32.mrb[105].mxu0 }
 0x1ab   :  { %v1165_v62 = vadd.f32 %v3463_v59, %v1164_v61  ;;  %v2961_v63 = vpop.f32.mrb[106].mxu0  ;;  %3094 = vmatprep.mubr.msk.bf16.mxu1 %vm1511_vm2, %v1477_v57 }
 0x1ac   :  { %v1176_v0 = vadd.f32 %v2961_v63, %v3463_v59  ;;  %v1167_v1 = vpop.f32.mrb[107].mxu0  ;;  %3095 = vmatmul.mubr.msk.bf16.gmra.mrb[100].mxu1 %vm1511_vm2, %v1478_v56  ;;  %v1397_v3 = vmax.f32 %v1173_v60, 0.0 }
 0x1ad   :  { %v1168_v2 = vadd.f32 %v3463_v59, %v1167_v1  ;;  %v1395_v5 = vmax.f32 %v1165_v62, 0.0 }
 0x1ae   :  { %v1398_v4 = vmax.f32 %v1176_v0, 0.0 }
 0x1af   :  { %v1396_v6 = vmax.f32 %v1168_v2, 0.0 }
 0x1b0   :  { %v1480_v7 = vpack.c.bf16 %v1398_v4, %v1397_v3 }
 0x1b1   :  { %v1479_v8 = vpack.c.bf16 %v1396_v6, %v1395_v5  ;;  %v2964_v9 = vpop.f32.mrb[108].mxu0 }
 0x1b2   :  { %v1189_v10 = vadd.f32 %v2964_v9, %v3463_v59  ;;  %v1180_v11 = vpop.f32.mrb[109].mxu0 }
 0x1b3   :  { %v1181_v12 = vadd.f32 %v3463_v59, %v1180_v11  ;;  %v2965_v13 = vpop.f32.mrb[110].mxu0  ;;  %3098 = vmatprep.mubr.msk.bf16.mxu1 %vm1511_vm2, %v1479_v8 }
 0x1b4   :  { %v1192_v14 = vadd.f32 %v2965_v13, %v3463_v59  ;;  %v1183_v15 = vpop.f32.mrb[111].mxu0  ;;  %3099 = vmatmul.mubr.msk.bf16.gmra.mrb[104].mxu1 %vm1511_vm2, %v1480_v7  ;;  %v1401_v17 = vmax.f32 %v1189_v10, 0.0 }
 0x1b5   :  { %v1184_v16 = vadd.f32 %v3463_v59, %v1183_v15  ;;  %v1399_v19 = vmax.f32 %v1181_v12, 0.0 }
 0x1b6   :  { %v1402_v18 = vmax.f32 %v1192_v14, 0.0 }
 0x1b7   :  { %v1400_v20 = vmax.f32 %v1184_v16, 0.0  ;;  %v3684_v21 = vpop.f32.mrb[0].mxu1 }
 0x1b8   :  { %v1482_v22 = vpack.c.bf16 %v1402_v18, %v1401_v17  ;;  %v3686_v23 = vpop.f32.mrb[1].mxu1 }
 0x1b9   :  { %v1481_v24 = vpack.c.bf16 %v1400_v20, %v1399_v19  ;;  %v2968_v25 = vpop.f32.mrb[112].mxu0  ;;  %v3688_v26 = vpop.f32.mrb[2].mxu1 }
 0x1ba   :  { %v1205_v27 = vadd.f32 %v2968_v25, %v3463_v59  ;;  %v1196_v28 = vpop.f32.mrb[113].mxu0  ;;  %v3691_v29 = vpop.f32.mrb[3].mxu1 }
 0x1bb   :  { %v1197_v30 = vadd.f32 %v3463_v59, %v1196_v28  ;;  %v2969_v31 = vpop.f32.mrb[114].mxu0  ;;  %3102 = vmatprep.mubr.msk.bf16.mxu1 %vm1511_vm2, %v1481_v24 }
 0x1bc   :  { %v1208_v32 = vadd.f32 %v2969_v31, %v3463_v59  ;;  %v1199_v33 = vpop.f32.mrb[115].mxu0  ;;  %3103 = vmatmul.mubr.msk.bf16.gmra.mrb[108].mxu1 %vm1511_vm2, %v1482_v22  ;;  %v1405_v35 = vmax.f32 %v1205_v27, 0.0 }
 0x1bd   :  { %v1200_v34 = vadd.f32 %v3463_v59, %v1199_v33  ;;  %v1403_v37 = vmax.f32 %v1197_v30, 0.0 }
 0x1be   :  { %v1406_v36 = vmax.f32 %v1208_v32, 0.0 }
 0x1bf   :  { %v1404_v38 = vmax.f32 %v1200_v34, 0.0  ;;  %v3698_v39 = vpop.f32.mrb[4].mxu1 }
 0x1c0   :  { %v1484_v40 = vpack.c.bf16 %v1406_v36, %v1405_v35  ;;  %v3700_v41 = vpop.f32.mrb[5].mxu1 }
 0x1c1   :  { %v1483_v42 = vpack.c.bf16 %v1404_v38, %v1403_v37  ;;  %v2972_v43 = vpop.f32.mrb[116].mxu0  ;;  %v3702_v44 = vpop.f32.mrb[6].mxu1 }
 0x1c2   :  { %v1221_v45 = vadd.f32 %v2972_v43, %v3463_v59  ;;  %v1212_v46 = vpop.f32.mrb[117].mxu0  ;;  %v3705_v47 = vpop.f32.mrb[7].mxu1 }
 0x1c3   :  { %v1213_v48 = vadd.f32 %v3463_v59, %v1212_v46  ;;  %v2973_v49 = vpop.f32.mrb[118].mxu0  ;;  %3106 = vmatprep.mubr.msk.bf16.mxu1 %vm1511_vm2, %v1483_v42 }
 0x1c4   :  { %v1224_v50 = vadd.f32 %v2973_v49, %v3463_v59  ;;  %v1215_v51 = vpop.f32.mrb[119].mxu0  ;;  %3107 = vmatmul.mubr.msk.bf16.gmra.mrb[112].mxu1 %vm1511_vm2, %v1484_v40  ;;  %v1409_v53 = vmax.f32 %v1221_v45, 0.0 }
 0x1c5   :  { %v1216_v52 = vadd.f32 %v3463_v59, %v1215_v51  ;;  %v1407_v55 = vmax.f32 %v1213_v48, 0.0  ;;  %v3725_v59 = vld [vmem:[%s3933_s2] ss:$0 sm:$0xff] }
 0x1c6   :  { %v1410_v54 = vmax.f32 %v1224_v50, 0.0 }
 0x1c7   :  { %v1408_v56 = vmax.f32 %v1216_v52, 0.0  ;;  %v3712_v57 = vpop.f32.mrb[8].mxu1 }
 0x1c8   :  { %v1486_v58 = vpack.c.bf16 %v1410_v54, %v1409_v53  ;;  %v2295_v60 = vmax.f32 %v3684_v21, %v3712_v57  ;;  %v3716_v61 = vpop.f32.mrb[9].mxu1 }
 0x1c9   :  { %v1485_v62 = vpack.c.bf16 %v1408_v56, %v1407_v55  ;;  %v2293_v63 = vmax.f32 %v3686_v23, %v3716_v61  ;;  %v2976_v0 = vpop.f32.mrb[120].mxu0  ;;  %v3720_v1 = vpop.f32.mrb[10].mxu1 }
 0x1ca   :  { %v1237_v2 = vadd.f32 %v3725_v59, %v2976_v0  ;;  %v2296_v3 = vmax.f32 %v3688_v26, %v3720_v1  ;;  %v1228_v4 = vpop.f32.mrb[121].mxu0  ;;  %v3730_v5 = vpop.f32.mrb[11].mxu1 }
 0x1cb   :  { %v1229_v6 = vadd.f32 %v3725_v59, %v1228_v4  ;;  %v2294_v7 = vmax.f32 %v3691_v29, %v3730_v5  ;;  %v2977_v8 = vpop.f32.mrb[122].mxu0  ;;  %3110 = vmatprep.mubr.msk.bf16.mxu1 %vm1511_vm2, %v1485_v62 }
 0x1cc   :  { %v1240_v9 = vadd.f32 %v3725_v59, %v2977_v8  ;;  %v1231_v10 = vpop.f32.mrb[123].mxu0  ;;  %3111 = vmatmul.mubr.msk.bf16.gmra.mrb[116].mxu1 %vm1511_vm2, %v1486_v58  ;;  %v1413_v12 = vmax.f32 %v1237_v2, 0.0 }
 0x1cd   :  { %v1232_v11 = vadd.f32 %v3725_v59, %v1231_v10  ;;  %v1411_v14 = vmax.f32 %v1229_v6, 0.0 }
 0x1ce   :  { %v1414_v13 = vmax.f32 %v1240_v9, 0.0 }
 0x1cf   :  { %v1412_v15 = vmax.f32 %v1232_v11, 0.0  ;;  %v3739_v16 = vpop.f32.mrb[12].mxu1 }
 0x1d0   :  { %v1488_v17 = vpack.c.bf16 %v1414_v13, %v1413_v12  ;;  %v2299_v18 = vmax.f32 %v3698_v39, %v3739_v16  ;;  %v3743_v19 = vpop.f32.mrb[13].mxu1 }
 0x1d1   :  { %v1487_v20 = vpack.c.bf16 %v1412_v15, %v1411_v14  ;;  %v2297_v22 = vmax.f32 %v3700_v41, %v3743_v19  ;;  %v2980_v24 = vpop.f32.mrb[124].mxu0  ;;  %v3747_v25 = vpop.f32.mrb[14].mxu1 }
 0x1d2   :  { %v1253_v27 = vadd.f32 %v3725_v59, %v2980_v24  ;;  %v2300_v28 = vmax.f32 %v3702_v44, %v3747_v25  ;;  %v1244_v30 = vpop.f32.mrb[125].mxu0  ;;  %v3752_v31 = vpop.f32.mrb[15].mxu1 }
 0x1d3   :  { %v1245_v32 = vadd.f32 %v3725_v59, %v1244_v30  ;;  %v2298_v33 = vmax.f32 %v3705_v47, %v3752_v31  ;;  %v2981_v34 = vpop.f32.mrb[126].mxu0  ;;  %3114 = vmatprep.mubr.msk.bf16.mxu1 %vm1511_vm2, %v1487_v20 }
 0x1d4   :  { %v1256_v35 = vadd.f32 %v3725_v59, %v2981_v34  ;;  %v1247_v36 = vpop.f32.mrb[127].mxu0  ;;  %3115 = vmatmul.mubr.msk.bf16.gmra.mrb[120].mxu1 %vm1511_vm2, %v1488_v17  ;;  %v1417_v38 = vmax.f32 %v1253_v27, 0.0 }
 0x1d5   :  { %v1248_v37 = vadd.f32 %v3725_v59, %v1247_v36  ;;  %v1415_v42 = vmax.f32 %v1245_v32, 0.0 }
 0x1d6   :  { %v1418_v40 = vmax.f32 %v1256_v35, 0.0 }
 0x1d7   :  { %v1416_v43 = vmax.f32 %v1248_v37, 0.0  ;;  %v3012_v45 = vpop.f32.mrb[16].mxu1 }
 0x1d8   :  { %v1490_v46 = vpack.c.bf16 %v1418_v40, %v1417_v38  ;;  %v1814_v48 = vpop.f32.mrb[17].mxu1 }
 0x1d9   :  { %v1489_v49 = vpack.c.bf16 %v1416_v43, %v1415_v42  ;;  %v2984_v50 = vpop.f32.mrb[128].mxu0  ;;  %v3013_v51 = vpop.f32.mrb[18].mxu1 }
 0x1da   :  { %v1269_v52 = vadd.f32 %v3725_v59, %v2984_v50  ;;  %v1260_v53 = vpop.f32.mrb[129].mxu0  ;;  %v1817_v54 = vpop.f32.mrb[19].mxu1 }
 0x1db   :  { %v1261_v55 = vadd.f32 %v3725_v59, %v1260_v53  ;;  %v2985_v56 = vpop.f32.mrb[130].mxu0  ;;  %3118 = vmatprep.mubr.msk.bf16.mxu1 %vm1511_vm2, %v1489_v49 }
 0x1dc   :  { %v1272_v58 = vadd.f32 %v3725_v59, %v2985_v56  ;;  %v1263_v62 = vpop.f32.mrb[131].mxu0  ;;  %3119 = vmatmul.mubr.msk.bf16.gmra.mrb[124].mxu1 %vm1511_vm2, %v1490_v46  ;;  %v1421_v2 = vmax.f32 %v1269_v52, 0.0 }
 0x1dd   :  { %v1264_v0 = vadd.f32 %v3725_v59, %v1263_v62  ;;  %v1419_v6 = vmax.f32 %v1261_v55, 0.0 }
 0x1de   :  { %v1422_v4 = vmax.f32 %v1272_v58, 0.0 }
 0x1df   :  { %v1420_v8 = vmax.f32 %v1264_v0, 0.0  ;;  %v3016_v9 = vpop.f32.mrb[20].mxu1 }
 0x1e0   :  { %v1492_v10 = vpack.c.bf16 %v1422_v4, %v1421_v2  ;;  %v1830_v11 = vpop.f32.mrb[21].mxu1 }
 0x1e1   :  { %v1491_v12 = vpack.c.bf16 %v1420_v8, %v1419_v6  ;;  %v2988_v13 = vpop.f32.mrb[132].mxu0  ;;  %v3017_v14 = vpop.f32.mrb[22].mxu1 }
 0x1e2   :  { %v1285_v15 = vadd.f32 %v3725_v59, %v2988_v13  ;;  %v1276_v17 = vpop.f32.mrb[133].mxu0  ;;  %v1833_v20 = vpop.f32.mrb[23].mxu1 }
 0x1e3   :  { %v1277_v24 = vadd.f32 %v3725_v59, %v1276_v17  ;;  %v2989_v27 = vpop.f32.mrb[134].mxu0  ;;  %3122 = vmatprep.mubr.msk.bf16.mxu1 %vm1511_vm2, %v1491_v12 }
 0x1e4   :  { %v1288_v30 = vadd.f32 %v3725_v59, %v2989_v27  ;;  %v1279_v32 = vpop.f32.mrb[135].mxu0  ;;  %3123 = vmatmul.mubr.msk.bf16.gmra.mrb[128].mxu1 %vm1511_vm2, %v1492_v10  ;;  %v1425_v35 = vmax.f32 %v1285_v15, 0.0 }
 0x1e5   :  { %v1280_v34 = vadd.f32 %v3725_v59, %v1279_v32  ;;  %v1423_v37 = vmax.f32 %v1277_v24, 0.0 }
 0x1e6   :  { %v1426_v36 = vmax.f32 %v1288_v30, 0.0 }
 0x1e7   :  { %v1424_v38 = vmax.f32 %v1280_v34, 0.0  ;;  %v3020_v40 = vpop.f32.mrb[24].mxu1 }
 0x1e8   :  { %v1494_v42 = vpack.c.bf16 %v1426_v36, %v1425_v35  ;;  %v2303_v43 = vmax.f32 %v3012_v45, %v3020_v40  ;;  %v1846_v46 = vpop.f32.mrb[25].mxu1 }
 0x1e9   :  { %v1493_v49 = vpack.c.bf16 %v1424_v38, %v1423_v37  ;;  %v2301_v50 = vmax.f32 %v1814_v48, %v1846_v46  ;;  %v3021_v52 = vpop.f32.mrb[26].mxu1 }
 0x1ea   :  { %v3776_v53 = vmax.f32 %v2295_v60, %v2303_v43  ;;  %v2304_v55 = vmax.f32 %v3013_v51, %v3021_v52  ;;  %v1849_v56 = vpop.f32.mrb[27].mxu1 }
 0x1eb   :  { %v3781_v59 = vmax.f32 %v2293_v63, %v2301_v50  ;;  %v2302_v58 = vmax.f32 %v1817_v54, %v1849_v56  ;;  %3126 = vmatprep.mubr.msk.bf16.mxu1 %vm1511_vm2, %v1493_v49 }
 0x1ec   :  { %v3787_v45 = vmax.f32 %v2296_v3, %v2304_v55  ;;  %3127 = vmatmul.mubr.msk.bf16.gmra.mrb[132].mxu1 %vm1511_vm2, %v1494_v42 }
 0x1ed   :  { %v3793_v21 = vmax.f32 %v2294_v7, %v2302_v58 }
 0x1ef   :  { %v3024_v57 = vpop.f32.mrb[28].mxu1 }
 0x1f0   :  { %v2307_v60 = vmax.f32 %v3016_v9, %v3024_v57  ;;  %v1862_v23 = vpop.f32.mrb[29].mxu1 }
 0x1f1   :  { %v2305_v61 = vmax.f32 %v1830_v11, %v1862_v23  ;;  %v3025_v63 = vpop.f32.mrb[30].mxu1 }
 0x1f2   :  { %v3798_v48 = vmax.f32 %v2299_v18, %v2307_v60  ;;  %v2308_v26 = vmax.f32 %v3017_v14, %v3025_v63  ;;  %v1865_v1 = vpop.f32.mrb[31].mxu1 }
 0x1f3   :  { %v3803_v3 = vmax.f32 %v2297_v22, %v2305_v61  ;;  %v2306_v29 = vmax.f32 %v1833_v20, %v1865_v1 }
 0x1f4   :  { %v3808_v5 = vmax.f32 %v2300_v28, %v2308_v26 }
 0x1f5   :  { %v3813_v7 = vmax.f32 %v2298_v33, %v2306_v29 }
 0x1f7   :  { %v3028_v39 = vpop.f32.mrb[32].mxu1 }
 0x1f8   :  { %v1878_v16 = vpop.f32.mrb[33].mxu1 }
 0x1f9   :  { %v3029_v18 = vpop.f32.mrb[34].mxu1 }
 0x1fa   :  { %v1881_v51 = vpop.f32.mrb[35].mxu1 }
 0x1ff   :  { %v3032_v54 = vpop.f32.mrb[36].mxu1 }
 0x200   :  { %v1894_v62 = vpop.f32.mrb[37].mxu1 }
 0x201   :  { %v3033_v41 = vpop.f32.mrb[38].mxu1 }
 0x202   :  { %v1897_v19 = vpop.f32.mrb[39].mxu1 }
 0x207   :  { %v3036_v22 = vpop.f32.mrb[40].mxu1 }
 0x208   :  { %v2311_v0 = vmax.f32 %v3028_v39, %v3036_v22  ;;  %v1910_v2 = vpop.f32.mrb[41].mxu1 }
 0x209   :  { %v2309_v4 = vmax.f32 %v1878_v16, %v1910_v2  ;;  %v3037_v44 = vpop.f32.mrb[42].mxu1 }
 0x20a   :  { %v2312_v25 = vmax.f32 %v3029_v18, %v3037_v44  ;;  %v1913_v28 = vpop.f32.mrb[43].mxu1 }
 0x20b   :  { %v2310_v6 = vmax.f32 %v1881_v51, %v1913_v28 }
 0x20f   :  { %v3040_v8 = vpop.f32.mrb[44].mxu1 }
 0x210   :  { %v2315_v47 = vmax.f32 %v3032_v54, %v3040_v8  ;;  %v1926_v31 = vpop.f32.mrb[45].mxu1 }
 0x211   :  { %v2313_v33 = vmax.f32 %v1894_v62, %v1926_v31  ;;  %v3041_v9 = vpop.f32.mrb[46].mxu1 }
 0x212   :  { %v2316_v10 = vmax.f32 %v3033_v41, %v3041_v9  ;;  %v1929_v11 = vpop.f32.mrb[47].mxu1 }
 0x213   :  { %v2314_v12 = vmax.f32 %v1897_v19, %v1929_v11 }
 0x217   :  { %v3044_v13 = vpop.f32.mrb[48].mxu1 }
 0x218   :  { %v1942_v14 = vpop.f32.mrb[49].mxu1 }
 0x219   :  { %v3045_v15 = vpop.f32.mrb[50].mxu1 }
 0x21a   :  { %v1945_v17 = vpop.f32.mrb[51].mxu1 }
 0x21f   :  { %v3048_v20 = vpop.f32.mrb[52].mxu1 }
 0x220   :  { %v1958_v24 = vpop.f32.mrb[53].mxu1 }
 0x221   :  { %v3049_v27 = vpop.f32.mrb[54].mxu1 }
 0x222   :  { %v1961_v30 = vpop.f32.mrb[55].mxu1 }
 0x227   :  { %v3052_v32 = vpop.f32.mrb[56].mxu1 }
 0x228   :  { %v2319_v34 = vmax.f32 %v3044_v13, %v3052_v32  ;;  %v1974_v35 = vpop.f32.mrb[57].mxu1 }
 0x229   :  { %v2317_v36 = vmax.f32 %v1942_v14, %v1974_v35  ;;  %v3053_v37 = vpop.f32.mrb[58].mxu1 }
 0x22a   :  { %v3815_v38 = vmax.f32 %v2311_v0, %v2319_v34  ;;  %v2320_v40 = vmax.f32 %v3045_v15, %v3053_v37  ;;  %v1977_v42 = vpop.f32.mrb[59].mxu1 }
 0x22b   :  { %v3817_v43 = vmax.f32 %v2309_v4, %v2317_v36  ;;  %v2318_v46 = vmax.f32 %v1945_v17, %v1977_v42 }
 0x22c   :  { %v3819_v49 = vmax.f32 %v2312_v25, %v2320_v40  ;;  %v2391_v50 = vmax.f32 %v3776_v53, %v3815_v38 }
 0x22d   :  { %v3823_v52 = vmax.f32 %v2310_v6, %v2318_v46  ;;  %v2389_v55 = vmax.f32 %v3781_v59, %v3817_v43 }
 0x22e   :  { %v2392_v56 = vmax.f32 %v3787_v45, %v3819_v49 }
 0x22f   :  { %v3056_v58 = vpop.f32.mrb[60].mxu1  ;;  %v2390_v57 = vmax.f32 %v3793_v21, %v3823_v52  ;;  %v2696_v21 = vld [vmem:[%s3934_s4] ss:$0 sm:$0xff] }
 0x230   :  { %v2323_v60 = vmax.f32 %v3048_v20, %v3056_v58  ;;  %v1990_v23 = vpop.f32.mrb[61].mxu1 }
 0x231   :  { %v2321_v61 = vmax.f32 %v1958_v24, %v1990_v23  ;;  %v3057_v63 = vpop.f32.mrb[62].mxu1 }
 0x232   :  { %v3831_v26 = vmax.f32 %v2315_v47, %v2323_v60  ;;  %v2324_v1 = vmax.f32 %v3049_v27, %v3057_v63  ;;  %v1993_v29 = vpop.f32.mrb[63].mxu1 }
 0x233   :  { %v3833_v39 = vmax.f32 %v2313_v33, %v2321_v61  ;;  %v2322_v16 = vmax.f32 %v1961_v30, %v1993_v29 }
 0x234   :  { %v3835_v18 = vmax.f32 %v2316_v10, %v2324_v1  ;;  %v2395_v51 = vmax.f32 %v3798_v48, %v3831_v26 }
 0x235   :  { %v3839_v54 = vmax.f32 %v2314_v12, %v2322_v16  ;;  %v2393_v62 = vmax.f32 %v3803_v3, %v3833_v39 }
 0x236   :  { %v2396_v41 = vmax.f32 %v3808_v5, %v3835_v18 }
 0x237   :  { %v3060_v19 = vpop.f32.mrb[64].mxu1  ;;  %v2394_v22 = vmax.f32 %v3813_v7, %v3839_v54 }
 0x238   :  { %v2006_v0 = vpop.f32.mrb[65].mxu1 }
 0x239   :  { %v3061_v2 = vpop.f32.mrb[66].mxu1 }
 0x23a   :  { %v2009_v4 = vpop.f32.mrb[67].mxu1 }
 0x23f   :  { %v3064_v44 = vpop.f32.mrb[68].mxu1 }
 0x240   :  { %v2022_v25 = vpop.f32.mrb[69].mxu1 }
 0x241   :  { %v3065_v28 = vpop.f32.mrb[70].mxu1 }
 0x242   :  { %v2025_v6 = vpop.f32.mrb[71].mxu1 }
 0x247   :  { %v3068_v8 = vpop.f32.mrb[72].mxu1 }
 0x248   :  { %v2327_v47 = vmax.f32 %v3060_v19, %v3068_v8  ;;  %v2038_v31 = vpop.f32.mrb[73].mxu1 }
 0x249   :  { %v2325_v33 = vmax.f32 %v2006_v0, %v2038_v31  ;;  %v3069_v9 = vpop.f32.mrb[74].mxu1 }
 0x24a   :  { %v2328_v10 = vmax.f32 %v3061_v2, %v3069_v9  ;;  %v2041_v11 = vpop.f32.mrb[75].mxu1 }
 0x24b   :  { %v2326_v12 = vmax.f32 %v2009_v4, %v2041_v11 }
 0x24f   :  { %v3072_v13 = vpop.f32.mrb[76].mxu1 }
 0x250   :  { %v2331_v14 = vmax.f32 %v3064_v44, %v3072_v13  ;;  %v2054_v15 = vpop.f32.mrb[77].mxu1 }
 0x251   :  { %v2329_v17 = vmax.f32 %v2022_v25, %v2054_v15  ;;  %v3073_v20 = vpop.f32.mrb[78].mxu1 }
 0x252   :  { %v2332_v24 = vmax.f32 %v3065_v28, %v3073_v20  ;;  %v2057_v27 = vpop.f32.mrb[79].mxu1 }
 0x253   :  { %v2330_v30 = vmax.f32 %v2025_v6, %v2057_v27 }
 0x257   :  { %v3076_v32 = vpop.f32.mrb[80].mxu1 }
 0x258   :  { %v2070_v34 = vpop.f32.mrb[81].mxu1 }
 0x259   :  { %v3077_v35 = vpop.f32.mrb[82].mxu1 }
 0x25a   :  { %v2073_v36 = vpop.f32.mrb[83].mxu1 }
 0x25f   :  { %v3080_v37 = vpop.f32.mrb[84].mxu1 }
 0x260   :  { %v2086_v40 = vpop.f32.mrb[85].mxu1 }
 0x261   :  { %v3081_v42 = vpop.f32.mrb[86].mxu1 }
 0x262   :  { %v2089_v46 = vpop.f32.mrb[87].mxu1 }
 0x267   :  { %v3084_v58 = vpop.f32.mrb[88].mxu1 }
 0x268   :  { %v2335_v60 = vmax.f32 %v3076_v32, %v3084_v58  ;;  %v2102_v23 = vpop.f32.mrb[89].mxu1 }
 0x269   :  { %v2333_v61 = vmax.f32 %v2070_v34, %v2102_v23  ;;  %v3085_v63 = vpop.f32.mrb[90].mxu1 }
 0x26a   :  { %v3847_v1 = vmax.f32 %v2327_v47, %v2335_v60  ;;  %v2336_v29 = vmax.f32 %v3077_v35, %v3085_v63  ;;  %v2105_v16 = vpop.f32.mrb[91].mxu1 }
 0x26b   :  { %v3849_v19 = vmax.f32 %v2325_v33, %v2333_v61  ;;  %v2334_v0 = vmax.f32 %v2073_v36, %v2105_v16 }
 0x26c   :  { %v3851_v2 = vmax.f32 %v2328_v10, %v2336_v29 }
 0x26d   :  { %v3853_v4 = vmax.f32 %v2326_v12, %v2334_v0 }
 0x26f   :  { %v3088_v44 = vpop.f32.mrb[92].mxu1 }
 0x270   :  { %v2339_v25 = vmax.f32 %v3080_v37, %v3088_v44  ;;  %v2118_v28 = vpop.f32.mrb[93].mxu1 }
 0x271   :  { %v2337_v6 = vmax.f32 %v2086_v40, %v2118_v28  ;;  %v3089_v8 = vpop.f32.mrb[94].mxu1 }
 0x272   :  { %v3855_v31 = vmax.f32 %v2331_v14, %v2339_v25  ;;  %v2340_v9 = vmax.f32 %v3081_v42, %v3089_v8  ;;  %v2121_v11 = vpop.f32.mrb[95].mxu1 }
 0x273   :  { %v3857_v47 = vmax.f32 %v2329_v17, %v2337_v6  ;;  %v2338_v13 = vmax.f32 %v2089_v46, %v2121_v11 }
 0x274   :  { %v3859_v15 = vmax.f32 %v2332_v24, %v2340_v9 }
 0x275   :  { %v3861_v33 = vmax.f32 %v2330_v30, %v2338_v13 }
 0x277   :  { %v3092_v10 = vpop.f32.mrb[96].mxu1 }
 0x278   :  { %v2134_v20 = vpop.f32.mrb[97].mxu1 }
 0x279   :  { %v3093_v12 = vpop.f32.mrb[98].mxu1 }
 0x27a   :  { %v2137_v27 = vpop.f32.mrb[99].mxu1 }
 0x27f   :  { %v3096_v32 = vpop.f32.mrb[100].mxu1 }
 0x280   :  { %v2150_v34 = vpop.f32.mrb[101].mxu1 }
 0x281   :  { %v3097_v35 = vpop.f32.mrb[102].mxu1 }
 0x282   :  { %v2153_v36 = vpop.f32.mrb[103].mxu1 }
 0x287   :  { %v3100_v37 = vpop.f32.mrb[104].mxu1 }
 0x288   :  { %v2343_v14 = vmax.f32 %v3092_v10, %v3100_v37  ;;  %v2166_v40 = vpop.f32.mrb[105].mxu1 }
 0x289   :  { %v2341_v42 = vmax.f32 %v2134_v20, %v2166_v40  ;;  %v3101_v58 = vpop.f32.mrb[106].mxu1 }
 0x28a   :  { %v2344_v17 = vmax.f32 %v3093_v12, %v3101_v58  ;;  %v2169_v60 = vpop.f32.mrb[107].mxu1 }
 0x28b   :  { %v2342_v46 = vmax.f32 %v2137_v27, %v2169_v60 }
 0x28f   :  { %v3104_v24 = vpop.f32.mrb[108].mxu1 }
 0x290   :  { %v2347_v23 = vmax.f32 %v3096_v32, %v3104_v24  ;;  %v2182_v30 = vpop.f32.mrb[109].mxu1 }
 0x291   :  { %v2345_v61 = vmax.f32 %v2150_v34, %v2182_v30  ;;  %v3105_v63 = vpop.f32.mrb[110].mxu1 }
 0x292   :  { %v2348_v29 = vmax.f32 %v3097_v35, %v3105_v63  ;;  %v2185_v16 = vpop.f32.mrb[111].mxu1 }
 0x293   :  { %v2346_v0 = vmax.f32 %v2153_v36, %v2185_v16 }
 0x297   :  { %v3108_v44 = vpop.f32.mrb[112].mxu1 }
 0x298   :  { %v2198_v25 = vpop.f32.mrb[113].mxu1 }
 0x299   :  { %v3109_v28 = vpop.f32.mrb[114].mxu1 }
 0x29a   :  { %v2201_v6 = vpop.f32.mrb[115].mxu1 }
 0x29f   :  { %v3112_v8 = vpop.f32.mrb[116].mxu1 }
 0x2a0   :  { %v2214_v9 = vpop.f32.mrb[117].mxu1 }
 0x2a1   :  { %v3113_v11 = vpop.f32.mrb[118].mxu1 }
 0x2a2   :  { %v2217_v13 = vpop.f32.mrb[119].mxu1 }
 0x2a7   :  { %v3116_v10 = vpop.f32.mrb[120].mxu1 }
 0x2a8   :  { %v2351_v20 = vmax.f32 %v3108_v44, %v3116_v10  ;;  %v2230_v12 = vpop.f32.mrb[121].mxu1 }
 0x2a9   :  { %v2349_v27 = vmax.f32 %v2198_v25, %v2230_v12  ;;  %v3117_v37 = vpop.f32.mrb[122].mxu1 }
 0x2aa   :  { %v2383_v32 = vmax.f32 %v2343_v14, %v2351_v20  ;;  %v2352_v40 = vmax.f32 %v3109_v28, %v3117_v37  ;;  %v2233_v34 = vpop.f32.mrb[123].mxu1 }
 0x2ab   :  { %v2381_v58 = vmax.f32 %v2341_v42, %v2349_v27  ;;  %v2350_v35 = vmax.f32 %v2201_v6, %v2233_v34 }
 0x2ac   :  { %v2384_v60 = vmax.f32 %v2344_v17, %v2352_v40  ;;  %v2399_v36 = vmax.f32 %v3847_v1, %v2383_v32 }
 0x2ad   :  { %v2382_v24 = vmax.f32 %v2342_v46, %v2350_v35  ;;  %v2397_v30 = vmax.f32 %v3849_v19, %v2381_v58 }
 0x2ae   :  { %v2407_v63 = vmax.f32 %v2391_v50, %v2399_v36  ;;  %v2400_v16 = vmax.f32 %v3851_v2, %v2384_v60 }
 0x2af   :  { %v3120_v44 = vpop.f32.mrb[124].mxu1  ;;  %v2405_v14 = vmax.f32 %v2389_v55, %v2397_v30  ;;  %v2398_v42 = vmax.f32 %v3853_v4, %v2382_v24 }
 0x2b0   :  { %v2355_v25 = vmax.f32 %v3112_v8, %v3120_v44  ;;  %v2246_v17 = vpop.f32.mrb[125].mxu1  ;;  %v2408_v1 = vmax.f32 %v2392_v56, %v2400_v16 }
 0x2b1   :  { %v2353_v19 = vmax.f32 %v2214_v9, %v2246_v17  ;;  %v3121_v46 = vpop.f32.mrb[126].mxu1  ;;  %v2406_v53 = vmax.f32 %v2390_v57, %v2398_v42 }
 0x2b2   :  { %v2387_v38 = vmax.f32 %v2347_v23, %v2355_v25  ;;  %v2356_v50 = vmax.f32 %v3113_v11, %v3121_v46  ;;  %v2249_v2 = vpop.f32.mrb[127].mxu1 }
 0x2b3   :  { %v2385_v28 = vmax.f32 %v2345_v61, %v2353_v19  ;;  %v2354_v59 = vmax.f32 %v2217_v13, %v2249_v2 }
 0x2b4   :  { %v2388_v43 = vmax.f32 %v2348_v29, %v2356_v50  ;;  %v2403_v55 = vmax.f32 %v3855_v31, %v2387_v38 }
 0x2b5   :  { %v2386_v4 = vmax.f32 %v2346_v0, %v2354_v59  ;;  %v2401_v6 = vmax.f32 %v3857_v47, %v2385_v28 }
 0x2b6   :  { %v2411_v45 = vmax.f32 %v2395_v51, %v2403_v55  ;;  %v2404_v49 = vmax.f32 %v3859_v15, %v2388_v43 }
 0x2b7   :  { %v3124_v56 = vpop.f32.mrb[128].mxu1  ;;  %v2409_v52 = vmax.f32 %v2393_v62, %v2401_v6  ;;  %v2402_v57 = vmax.f32 %v3861_v33, %v2386_v4 }
 0x2b8   :  { %v2415_v31 = vmax.f32 %v2407_v63, %v3124_v56  ;;  %v2262_v23 = vpop.f32.mrb[129].mxu1  ;;  %v2412_v48 = vmax.f32 %v2396_v41, %v2404_v49 }
 0x2b9   :  { %v2413_v26 = vmax.f32 %v2405_v14, %v2262_v23  ;;  %v3125_v51 = vpop.f32.mrb[130].mxu1  ;;  %v2410_v47 = vmax.f32 %v2394_v22, %v2402_v57 }
 0x2ba   :  { %v2430_v15 = vadd.f32 %v2696_v21, %v2415_v31  ;;  %v2416_v61 = vmax.f32 %v2408_v1, %v3125_v51  ;;  %v2265_v29 = vpop.f32.mrb[131].mxu1 }
 0x2bb   :  { %v2428_v0 = vadd.f32 %v2696_v21, %v2413_v26  ;;  %v2414_v3 = vmax.f32 %v2406_v53, %v2265_v29 }
 0x2bc   :  { %v2438_v39 = vmax.f32 %v2430_v15, 0.0  ;;  %v2431_v62 = vadd.f32 %v2696_v21, %v2416_v61 }
 0x2bd   :  { %v2436_v33 = vmax.f32 %v2428_v0, 0.0  ;;  %v2429_v8 = vadd.f32 %v2696_v21, %v2414_v3 }
 0x2be   :  { %v2707_v9 = vpack.c.bf16 %v2438_v39, %v2438_v39  ;;  %v2439_v11 = vmax.f32 %v2431_v62, 0.0 }
 0x2bf   :  { %v2705_v5 = vpack.c.bf16 %v2436_v33, %v2436_v33  ;;  %v2437_v18 = vmax.f32 %v2429_v8, 0.0  ;;  %v3128_v41 = vpop.f32.mrb[132].mxu1 }
 0x2c0   :  { %2479 = vst.msk [vmem:[%s3935_s5 + $0x8] sm:$0xf] %vm2476_vm3, %v2707_v9  ;;  %v2708_v7 = vpack.c.bf16 %v2439_v11, %v2439_v11  ;;  %v2419_v54 = vmax.f32 %v2411_v45, %v3128_v41  ;;  %v2278_v22 = vpop.f32.mrb[133].mxu1 }
 0x2c1   :  { %2477 = vst.msk [vmem:[%s3935_s5] sm:$0xf] %vm2476_vm3, %v2705_v5  ;;  %v2706_v13 = vpack.c.bf16 %v2437_v18, %v2437_v18  ;;  %v2417_v10 = vmax.f32 %v2409_v52, %v2278_v22  ;;  %v3129_v20 = vpop.f32.mrb[134].mxu1 }
 0x2c2   :  { %2480 = vst.msk [vmem:[%s3935_s5 + $0xc] sm:$0xf] %vm2476_vm3, %v2708_v7  ;;  %v2434_v12 = vadd.f32 %v2696_v21, %v2419_v54  ;;  %v2420_v27 = vmax.f32 %v2412_v48, %v3129_v20  ;;  %v2281_v37 = vpop.f32.mrb[135].mxu1 }
 0x2c3   :  { %2478 = vst.msk [vmem:[%s3935_s5 + $0x4] sm:$0xf] %vm2476_vm3, %v2706_v13  ;;  %v2432_v32 = vadd.f32 %v2696_v21, %v2417_v10  ;;  %v2418_v40 = vmax.f32 %v2410_v47, %v2281_v37 }
 0x2c4   :  { %v2442_v34 = vmax.f32 %v2434_v12, 0.0  ;;  %v2435_v58 = vadd.f32 %v2696_v21, %v2420_v27 }
 0x2c5   :  { %v2440_v35 = vmax.f32 %v2432_v32, 0.0  ;;  %v2433_v60 = vadd.f32 %v2696_v21, %v2418_v40 }
 0x2c6   :  { %v2711_v36 = vpack.c.bf16 %v2442_v34, %v2442_v34  ;;  %v2443_v24 = vmax.f32 %v2435_v58, 0.0 }
 0x2c7   :  { %v2709_v30 = vpack.c.bf16 %v2440_v35, %v2440_v35  ;;  %v2441_v63 = vmax.f32 %v2433_v60, 0.0 }
 0x2c8   :  { %2483 = vst.msk [vmem:[%s3935_s5 + $0x18] sm:$0xf] %vm2476_vm3, %v2711_v36  ;;  %v2712_v16 = vpack.c.bf16 %v2443_v24, %v2443_v24 }
 0x2c9   :  { %2481 = vst.msk [vmem:[%s3935_s5 + $0x10] sm:$0xf] %vm2476_vm3, %v2709_v30  ;;  %v2710_v44 = vpack.c.bf16 %v2441_v63, %v2441_v63 }
 0x2ca   :  { %2484 = vst.msk [vmem:[%s3935_s5 + $0x1c] sm:$0xf] %vm2476_vm3, %v2712_v16 }
 0x2cb   :  { %2482 = vst.msk [vmem:[%s3935_s5 + $0x14] sm:$0xf] %vm2476_vm3, %v2710_v44 }

// kernel: ppfnet_forward.7
= control target key start
LH: loop header
LB: loop body
LE: loop exit
PB: predicated region body
PF: predicated region fallthrough
CT: control target
= control target key end

     0   :  { %vm22_vm0 = vcmask 254976   ;;  %v336_v1 = vmov 0.0|0.0   ;;  %v337_v2 = vmov 0.0   ;;  %vm338_vm1 = vmmov 0   ;;  %s409_s0 = inlined_call_operand.vmem [shape: f32[2,64], index: 0, kind: input, shape index: {}]   ;;  %s410_s1 = inlined_call_operand.vmem [shape: bf16[64,32], index: 1, kind: input, shape index: {}]   ;;  %s411_s2 = inlined_call_operand.vmem [shape: f32[32,4], index: 2, kind: input, shape index: {}]   ;;  %s412_s3 = inlined_call_operand.vmem [shape: f32[1,4], index: 3, kind: input, shape index: {}]   ;;  %s413_s4 = inlined_call_operand.hbm [shape: f32[2,4], index: 4, kind: output, shape index: {}]  }
   0x1   :  { %v228_v0 = vld [vmem:[%s410_s1] sm:$0xff]   ;;  %290 = vmatprep.subr.bf16.mxu0 %v336_v1  ;;  %23 = vst.msk [vmem:[#allocation2] sm:$0x3] %vm22_vm0, %v337_v2  ;;  %302 = vmatprep.subr.bf16.mxu1 %v336_v1 }
   0x2   :  { %292 = vmatpush3.bf16.msra.mxu0 %v228_v0  ;;  %276 = vmatprep.mubr.msk.f32.mxu0 %vm338_vm1, %v337_v2 }
   0x3   :  { %9 = vsyncpa [#allocation4], 0  ;;  %293 = vmatprep.subr.bf16.mxu0 %v336_v1  ;;  %v243_v3 = vld [vmem:[%s410_s1 + $0x8] sm:$0xff]   ;;  %287 = vmatprep.mubr.msk.f32.mxu1 %vm338_vm1, %v337_v2  ;;  %v244_v4 = vld [vmem:[%s410_s1 + $0x10] sm:$0xff]   ;;  %vm42_vm2 = vcmask 523264   ;;  %vm134_vm3 = vcmask 261120  }
   0x4   :  { %v245_v5 = vld [vmem:[%s410_s1 + $0x18] sm:$0xff]   ;;  %v25_v6 = vld [vmem:[%s409_s0] sm:$0x3]  ;;  %v124_v8 = vld [vmem:[%s411_s2 + $0x8] sm:$0xff]  ;;  %s339_s7 = smov [#allocation3]   ;;  %vm208_vm4 = vcmask 25600  }
   0x5   :  { %v123_v7 = vld [vmem:[%s411_s2] sm:$0xff]  ;;  %v125_v10 = vld [vmem:[%s411_s2 + $0x10] sm:$0xff]  ;;  %v126_v11 = vld [vmem:[%s411_s2 + $0x18] sm:$0xff]  ;;  %s216_s8 = sshll.u32 %s339_s7, 4  ;;  %s217_s8 = int_to_ptr.vmem [resolvable:$true] %s216_s8 }
   0x6   :  { %295 = vmatpush3.bf16.msra.mxu0 %v243_v3  ;;  %v303_v9 = vpack.c.bf16 %v124_v8, %v123_v7  ;;  %v306_v12 = vpack.c.bf16 %v126_v11, %v125_v10  ;;  %v225_v18 = vld [vmem:[%s412_s3] ss:$0 sm:$0xff]  ;;  %s312_s2 = scalar_lea.vmem %s217_s8, 32  ;;  %p317_p1 = scmp.lt.s32.totalorder %s217_s8, %s217_s8 }
   0x7   :  { %296 = vmatprep.subr.bf16.mxu0 %v336_v1  ;;  %p313_p0 = scmp.ne.s32.totalorder %s217_s8, %s312_s2  ;;  %p318_p2 = scmp.lt.s32.totalorder %s312_s2, %s312_s2 }
   0x8   :  { %304 = vmatpush3.bf16.msra.mxu1 %v303_v9  ;;  %v24_v13 = vld [vmem:[#allocation2] sm:$0x3] }
   0x9   :  { %305 = vmatprep.subr.bf16.mxu1 %v336_v1  ;;  %p319_p3 = por %p318_p2, %p317_p1 }
   0xa   :  { %298 = vmatpush3.bf16.msra.mxu0 %v244_v4 }
   0xb   :  { %299 = vmatprep.subr.bf16.mxu0 %v336_v1  ;;  %p320_p4 = pnand %p319_p3, %p313_p0 }
   0xc   :  { %307 = vmatpush3.bf16.msra.mxu1 %v306_v12 }
   0xe   :  { %301 = vmatpush3.bf16.msra.mxu0 %v245_v5 }
  0x11   :  { %277 = vmatmul.mubr.msk.f32.vlgmr.msra.gmra.mrb[0].mxu0 %vm42_vm2, %v25_v6 }
  0xe4   :  { %v112_v14 = vpop.f32.mrb[0].mxu0 }
  0xe5   :  { %v116_v15 = vadd.f32 %v112_v14, %v24_v13  ;;  %v278_v16 = vpop.f32.mrb[1].mxu0 }
  0xe7   :  { %118 = vst.msk [vmem:[#allocation2] sm:$0x3] %vm22_vm0, %v116_v15 }
  0xee   :  { %v122_v17 = vld [vmem:[#allocation2] sm:$0x3] }
  0xef   :  { %288 = vmatmul.mubr.msk.f32.vlgmr.msra.gmra.mrb[0].mxu1 %vm134_vm3, %v122_v17 }
 0x1c2   :  { %v204_v19 = vpop.f32.mrb[0].mxu1 }
 0x1c3   :  { %v205_v20 = vadd.f32 %v225_v18, %v204_v19  ;;  %v289_v21 = vpop.f32.mrb[1].mxu1 }
 0x1c5   :  { %209 = vst.msk [vmem:[#allocation3] sm:$0x3] %vm208_vm4, %v205_v20 }
 0x1c6   :  { %323 = shalt.err (!%p320_p4)
}
 0x1c7   :  { %s324_s11 = scalar_lea.hbm %s413_s4, 32 }
 0x1c8   :  { %p325_p5 = scmp.ne.s32.totalorder %s413_s4, %s324_s11  ;;  %p328_p6 = scmp.lt.u32.totalorder %s324_s11, %s413_s4 }
 0x1ca   :  { %p330_p7 = pnand %p328_p6, %p325_p5 }
 0x1cc   :  { %333 = shalt.err (!%p330_p7)
}
 0x1cd   :  { %219 = dma.vmem_to_hbm [thread:$0]  %s217_s8, 32, %s413_s4, [#allocation4]  }
 0x1ce   :  { %334 = dma.done.wait [#allocation4], 32  }
 0x1cf   :  { %335 = vsyncadd [#allocation4], 4294967264 }
 0x1d0   :  { %223 = vsyncpa [#allocation4], 1 }

// kernel: ppfnet_forward.6
= control target key start
LH: loop header
LB: loop body
LE: loop exit
PB: predicated region body
PF: predicated region fallthrough
CT: control target
= control target key end

     0   :  { %vm849_vm0 = vcmask 1041408   ;;  %vm644_vm1 = vcmask 31744   ;;  %vm1782_vm2 = vcmask 261120   ;;  %vm3891_vm3 = vcmask 257024   ;;  %s6394_s3 = inlined_call_operand.vmem [shape: bf16[4,32], index: 3, kind: input, shape index: {}]   ;;  %s6395_s1 = inlined_call_operand.vmem [shape: bf16[1,1088,4], index: 1, kind: input, shape index: {}]   ;;  %s6396_s2 = inlined_call_operand.vmem [shape: bf16[32,32], index: 2, kind: input, shape index: {}]   ;;  %s6397_s0 = inlined_call_operand.vmem [shape: bf16[1,1088,32], index: 0, kind: input, shape index: {}]   ;;  %s6398_s5 = inlined_call_operand.vmem [shape: bf16[32,32], index: 5, kind: input, shape index: {}]   ;;  %s6399_s4 = inlined_call_operand.vmem [shape: f32[1,32], index: 4, kind: input, shape index: {}]   ;;  %s6400_s6 = inlined_call_operand.vmem [shape: f32[1,32], index: 6, kind: input, shape index: {}]   ;;  %s6401_s7 = inlined_call_operand.vmem [shape: bf16[64,32], index: 7, kind: output, shape index: {}]  }
   0x1   :  { %v303_v0 = vld [vmem:[%s6394_s3] sm:$0x3]  ;;  %v5034_v3 = vld [vmem:[%s6395_s1 + $0x8] sm:$0xff]   ;;  %v5036_v5 = vld [vmem:[%s6395_s1 + $0x10] sm:$0xff]  }
   0x2   :  { %5031 = vmatprep.subr.msk.bf16.mxu0 %vm849_vm0, %v303_v0  ;;  %v851_v1 = vsel %vm849_vm0, %v303_v0, 0  ;;  %v5033_v2 = vld [vmem:[%s6395_s1] sm:$0xff]   ;;  %5032 = vmatprep.subr.msk.bf16.mxu1 %vm849_vm0, %v303_v0  ;;  %v5037_v6 = vld [vmem:[%s6395_s1 + $0x18] sm:$0xff]   ;;  %v5039_v8 = vld [vmem:[%s6395_s1 + $0x28] sm:$0xff]  }
   0x3   :  { %4476 = vmatpush3.bf16.msra.mxu0 %v851_v1  ;;  %4894 = vmatpush3.bf16.msra.mxu1 %v851_v1  ;;  %v5035_v4 = vld [vmem:[%s6396_s2] sm:$0xff]   ;;  %v5040_v9 = vld [vmem:[%s6395_s1 + $0x30] sm:$0xff]   ;;  %v5052_v10 = vld [vmem:[%s6396_s2 + $0x8] sm:$0xff]  }
   0x4   :  { %4477 = vmatprep.mubr.msk.bf16.mxu0 %vm644_vm1, %v5033_v2  ;;  %4613 = vmatprep.subr.bf16.mxu0 %v5035_v4  ;;  %v5038_v7 = vld [vmem:[%s6395_s1 + $0x20] sm:$0xff]   ;;  %v5041_v11 = vld [vmem:[%s6395_s1 + $0x38] sm:$0xff]   ;;  %v5043_v13 = vld [vmem:[%s6395_s1 + $0x48] sm:$0xff]  }
   0x5   :  { %v5042_v12 = vld [vmem:[%s6395_s1 + $0x40] sm:$0xff]   ;;  %v5044_v14 = vld [vmem:[%s6395_s1 + $0x50] sm:$0xff]   ;;  %v5045_v15 = vld [vmem:[%s6395_s1 + $0x58] sm:$0xff]  }
   0x6   :  { %4478 = vmatmul.mubr.msk.bf16.vlgmr.msra.gmra.mrb[0].mxu0 %vm644_vm1, %v5034_v3  ;;  %v5046_v16 = vld [vmem:[%s6395_s1 + $0x60] sm:$0xff]   ;;  %v5047_v17 = vld [vmem:[%s6395_s1 + $0x68] sm:$0xff]   ;;  %v5048_v18 = vld [vmem:[%s6395_s1 + $0x70] sm:$0xff]  }
   0x7   :  { %4614 = vmatpush3.bf16.msra.mxu0 %v5035_v4  ;;  %4481 = vmatprep.mubr.msk.bf16.mxu0 %vm644_vm1, %v5036_v5  ;;  %v5049_v19 = vld [vmem:[%s6395_s1 + $0x78] sm:$0xff]   ;;  %v5050_v20 = vld [vmem:[%s6395_s1 + $0x80] sm:$0xff]   ;;  %v5051_v21 = vld [vmem:[%s6395_s1 + $0x88] sm:$0xff]  }
   0x8   :  { %4615 = vmatprep.subr.bf16.mxu0 %v5052_v10  ;;  %v5053_v22 = vld [vmem:[%s6395_s1 + $0x90] sm:$0xff]   ;;  %v5054_v23 = vld [vmem:[%s6395_s1 + $0x98] sm:$0xff]   ;;  %v5055_v24 = vld [vmem:[%s6395_s1 + $0xa0] sm:$0xff]  }
   0x9   :  { %v5056_v25 = vld [vmem:[%s6395_s1 + $0xa8] sm:$0xff]   ;;  %v5057_v26 = vld [vmem:[%s6395_s1 + $0xb0] sm:$0xff]   ;;  %v5058_v27 = vld [vmem:[%s6395_s1 + $0xb8] sm:$0xff]  }
   0xa   :  { %v5059_v28 = vld [vmem:[%s6395_s1 + $0xc0] sm:$0xff]   ;;  %v5091_v29 = vld [vmem:[%s6395_s1 + $0x110] sm:$0xff]   ;;  %v5092_v30 = vld [vmem:[%s6395_s1 + $0x118] sm:$0xff]  }
   0xb   :  { %4616 = vmatpush3.bf16.msra.mxu0 %v5052_v10  ;;  %v5060_v31 = vld [vmem:[%s6395_s1 + $0xc8] sm:$0xff]   ;;  %4545 = vmatprep.mubr.msk.bf16.mxu1 %vm644_vm1, %v5091_v29  ;;  %v5061_v32 = vld [vmem:[%s6395_s1 + $0xd0] sm:$0xff]   ;;  %v5096_v33 = vld [vmem:[%s6395_s1 + $0x120] sm:$0xff]  }
   0xc   :  { %4546 = vmatmul.mubr.msk.bf16.vlgmr.msra.gmra.mrb[0].mxu1 %vm644_vm1, %v5092_v30  ;;  %v5097_v34 = vld [vmem:[%s6395_s1 + $0x128] sm:$0xff]   ;;  %v5095_v35 = vld [vmem:[%s6398_s5] sm:$0xff]   ;;  %v5062_v36 = vld [vmem:[%s6395_s1 + $0xd8] sm:$0xff]  }
   0xd   :  { %4549 = vmatprep.mubr.msk.bf16.mxu1 %vm644_vm1, %v5096_v33  ;;  %v5063_v37 = vld [vmem:[%s6395_s1 + $0xe0] sm:$0xff]   ;;  %4753 = vmatprep.subr.bf16.mxu1 %v5095_v35  ;;  %v5100_v38 = vld [vmem:[%s6395_s1 + $0x130] sm:$0xff]   ;;  %v5101_v39 = vld [vmem:[%s6395_s1 + $0x138] sm:$0xff]  }
   0xe   :  { %4482 = vmatmul.mubr.msk.bf16.gmra.mrb[4].mxu0 %vm644_vm1, %v5037_v6  ;;  %4754 = vmatpush3.bf16.msra.mxu1 %v5095_v35  ;;  %v5064_v40 = vld [vmem:[%s6395_s1 + $0xe8] sm:$0xff]   ;;  %v5065_v41 = vld [vmem:[%s6395_s1 + $0xf0] sm:$0xff]   ;;  %v5104_v42 = vld [vmem:[%s6395_s1 + $0x140] sm:$0xff]  }
   0xf   :  { %4485 = vmatprep.mubr.msk.bf16.mxu0 %vm644_vm1, %v5038_v7  ;;  %v5105_v43 = vld [vmem:[%s6395_s1 + $0x148] sm:$0xff]   ;;  %v5066_v44 = vld [vmem:[%s6395_s1 + $0xf8] sm:$0xff]   ;;  %v5067_v45 = vld [vmem:[%s6395_s1 + $0x100] sm:$0xff]  }
  0x10   :  { %v5108_v46 = vld [vmem:[%s6395_s1 + $0x150] sm:$0xff]   ;;  %v5109_v47 = vld [vmem:[%s6395_s1 + $0x158] sm:$0xff]   ;;  %v5068_v48 = vld [vmem:[%s6395_s1 + $0x108] sm:$0xff]  }
  0x11   :  { %v5069_v49 = vld [vmem:[%s6397_s0] sm:$0xff]   ;;  %v5113_v51 = vld [vmem:[%s6395_s1 + $0x168] sm:$0xff]   ;;  %v5071_v53 = vld [vmem:[%s6397_s0 + $0x10] sm:$0xff]  }
  0x12   :  { %v5112_v50 = vld [vmem:[%s6395_s1 + $0x160] sm:$0xff]   ;;  %v5070_v52 = vld [vmem:[%s6397_s0 + $0x8] sm:$0xff]   ;;  %v5116_v54 = vld [vmem:[%s6395_s1 + $0x170] sm:$0xff]  }
  0x13   :  { %v5117_v55 = vld [vmem:[%s6395_s1 + $0x178] sm:$0xff]   ;;  %v5073_v57 = vld [vmem:[%s6397_s0 + $0x20] sm:$0xff]   ;;  %v5121_v59 = vld [vmem:[%s6395_s1 + $0x188] sm:$0xff]  }
  0x14   :  { %4550 = vmatmul.mubr.msk.bf16.gmra.mrb[4].mxu1 %vm644_vm1, %v5097_v34  ;;  %v5072_v56 = vld [vmem:[%s6397_s0 + $0x18] sm:$0xff]   ;;  %v5120_v58 = vld [vmem:[%s6395_s1 + $0x180] sm:$0xff]   ;;  %v5074_v60 = vld [vmem:[%s6397_s0 + $0x28] sm:$0xff]  }
  0x15   :  { %4553 = vmatprep.mubr.msk.bf16.mxu1 %vm644_vm1, %v5100_v38  ;;  %v5075_v61 = vld [vmem:[%s6397_s0 + $0x30] sm:$0xff]   ;;  %v5125_v63 = vld [vmem:[%s6395_s1 + $0x198] sm:$0xff]   ;;  %v5077_v1 = vld [vmem:[%s6397_s0 + $0x40] sm:$0xff]  }
  0x16   :  { %4486 = vmatmul.mubr.msk.bf16.gmra.mrb[8].mxu0 %vm644_vm1, %v5039_v8  ;;  %v5124_v62 = vld [vmem:[%s6395_s1 + $0x190] sm:$0xff]   ;;  %v5076_v0 = vld [vmem:[%s6397_s0 + $0x38] sm:$0xff]   ;;  %v5128_v2 = vld [vmem:[%s6398_s5 + $0x8] sm:$0xff]  }
  0x17   :  { %4489 = vmatprep.mubr.msk.bf16.mxu0 %vm644_vm1, %v5040_v9  ;;  %v5129_v3 = vld [vmem:[%s6395_s1 + $0x1a0] sm:$0xff]   ;;  %v5130_v4 = vld [vmem:[%s6395_s1 + $0x1a8] sm:$0xff]   ;;  %4755 = vmatprep.subr.bf16.mxu1 %v5128_v2  ;;  %v5079_v6 = vld [vmem:[%s6397_s0 + $0x50] sm:$0xff]  }
  0x18   :  { %4756 = vmatpush3.bf16.msra.mxu1 %v5128_v2  ;;  %v5078_v5 = vld [vmem:[%s6397_s0 + $0x48] sm:$0xff]   ;;  %v5133_v7 = vld [vmem:[%s6395_s1 + $0x1b0] sm:$0xff]   ;;  %v5134_v8 = vld [vmem:[%s6395_s1 + $0x1b8] sm:$0xff]  }
  0x19   :  { %v5080_v9 = vld [vmem:[%s6397_s0 + $0x58] sm:$0xff]   ;;  %v5081_v10 = vld [vmem:[%s6397_s0 + $0x60] sm:$0xff]   ;;  %v5090_v29 = vld [vmem:[%s6397_s0 + $0xa8] sm:$0xff]  }
  0x1a   :  { %v5093_v30 = vld [vmem:[%s6397_s0 + $0xb0] sm:$0xff]   ;;  %v5094_v33 = vld [vmem:[%s6397_s0 + $0xb8] sm:$0xff]   ;;  %v5098_v34 = vld [vmem:[%s6397_s0 + $0xc0] sm:$0xff]  }
  0x1b   :  { %v5099_v35 = vld [vmem:[%s6397_s0 + $0xc8] sm:$0xff]   ;;  %v5106_v38 = vld [vmem:[%s6397_s0 + $0xe0] sm:$0xff]  }
  0x1c   :  { %4554 = vmatmul.mubr.msk.bf16.gmra.mrb[8].mxu1 %vm644_vm1, %v5101_v39  ;;  %v5107_v39 = vld [vmem:[%s6397_s0 + $0xe8] sm:$0xff]   ;;  %v5147_v2 = vld [vmem:[%s6397_s0 + $0x180] sm:$0xff]  }
  0x1d   :  { %4557 = vmatprep.mubr.msk.bf16.mxu1 %vm644_vm1, %v5104_v42  ;;  %v5114_v42 = vld [vmem:[%s6397_s0 + $0x100] sm:$0xff]  }
  0x1e   :  { %4490 = vmatmul.mubr.msk.bf16.gmra.mrb[12].mxu0 %vm644_vm1, %v5041_v11  ;;  %v5137_v11 = vld [vmem:[%s6395_s1 + $0x1c0] sm:$0xff]  }
  0x1f   :  { %4493 = vmatprep.mubr.msk.bf16.mxu0 %vm644_vm1, %v5042_v12  ;;  %v5138_v12 = vld [vmem:[%s6395_s1 + $0x1c8] sm:$0xff]  }
  0x24   :  { %4558 = vmatmul.mubr.msk.bf16.gmra.mrb[12].mxu1 %vm644_vm1, %v5105_v43  ;;  %v5115_v43 = vld [vmem:[%s6397_s0 + $0x108] sm:$0xff]  }
  0x25   :  { %4561 = vmatprep.mubr.msk.bf16.mxu1 %vm644_vm1, %v5108_v46  ;;  %v5122_v46 = vld [vmem:[%s6397_s0 + $0x120] sm:$0xff]  }
  0x26   :  { %4494 = vmatmul.mubr.msk.bf16.gmra.mrb[16].mxu0 %vm644_vm1, %v5043_v13  ;;  %v5082_v13 = vld [vmem:[%s6397_s0 + $0x68] sm:$0xff]  }
  0x27   :  { %4497 = vmatprep.mubr.msk.bf16.mxu0 %vm644_vm1, %v5044_v14  ;;  %v5083_v14 = vld [vmem:[%s6397_s0 + $0x70] sm:$0xff]  }
  0x2c   :  { %4562 = vmatmul.mubr.msk.bf16.gmra.mrb[16].mxu1 %vm644_vm1, %v5109_v47  ;;  %v5123_v47 = vld [vmem:[%s6397_s0 + $0x128] sm:$0xff]  }
  0x2d   :  { %4565 = vmatprep.mubr.msk.bf16.mxu1 %vm644_vm1, %v5112_v50  ;;  %v5131_v50 = vld [vmem:[%s6397_s0 + $0x140] sm:$0xff]  }
  0x2e   :  { %4498 = vmatmul.mubr.msk.bf16.gmra.mrb[20].mxu0 %vm644_vm1, %v5045_v15  ;;  %v5141_v15 = vld [vmem:[%s6395_s1 + $0x1d0] sm:$0xff]  }
  0x2f   :  { %4501 = vmatprep.mubr.msk.bf16.mxu0 %vm644_vm1, %v5046_v16  ;;  %v5142_v16 = vld [vmem:[%s6395_s1 + $0x1d8] sm:$0xff]  }
  0x34   :  { %4566 = vmatmul.mubr.msk.bf16.gmra.mrb[20].mxu1 %vm644_vm1, %v5113_v51  ;;  %v5132_v51 = vld [vmem:[%s6397_s0 + $0x148] sm:$0xff]  }
  0x35   :  { %4569 = vmatprep.mubr.msk.bf16.mxu1 %vm644_vm1, %v5116_v54  ;;  %v5139_v54 = vld [vmem:[%s6397_s0 + $0x160] sm:$0xff]  }
  0x36   :  { %4502 = vmatmul.mubr.msk.bf16.gmra.mrb[24].mxu0 %vm644_vm1, %v5047_v17  ;;  %v5084_v17 = vld [vmem:[%s6397_s0 + $0x78] sm:$0xff]  }
  0x37   :  { %4505 = vmatprep.mubr.msk.bf16.mxu0 %vm644_vm1, %v5048_v18  ;;  %v5085_v18 = vld [vmem:[%s6397_s0 + $0x80] sm:$0xff]  }
  0x3c   :  { %4570 = vmatmul.mubr.msk.bf16.gmra.mrb[24].mxu1 %vm644_vm1, %v5117_v55 }
  0x3d   :  { %4573 = vmatprep.mubr.msk.bf16.mxu1 %vm644_vm1, %v5120_v58 }
  0x3e   :  { %4506 = vmatmul.mubr.msk.bf16.gmra.mrb[28].mxu0 %vm644_vm1, %v5049_v19  ;;  %v5145_v19 = vld [vmem:[%s6395_s1 + $0x1e0] sm:$0xff]  }
  0x3f   :  { %4509 = vmatprep.mubr.msk.bf16.mxu0 %vm644_vm1, %v5050_v20  ;;  %v5146_v20 = vld [vmem:[%s6395_s1 + $0x1e8] sm:$0xff]  }
  0x44   :  { %4574 = vmatmul.mubr.msk.bf16.gmra.mrb[28].mxu1 %vm644_vm1, %v5121_v59  ;;  %v5140_v59 = vld [vmem:[%s6397_s0 + $0x168] sm:$0xff]  }
  0x45   :  { %4577 = vmatprep.mubr.msk.bf16.mxu1 %vm644_vm1, %v5124_v62 }
  0x46   :  { %4510 = vmatmul.mubr.msk.bf16.gmra.mrb[32].mxu0 %vm644_vm1, %v5051_v21  ;;  %v5086_v21 = vld [vmem:[%s6397_s0 + $0x88] sm:$0xff]  }
  0x47   :  { %4513 = vmatprep.mubr.msk.bf16.mxu0 %vm644_vm1, %v5053_v22  ;;  %v5087_v22 = vld [vmem:[%s6397_s0 + $0x90] sm:$0xff]  }
  0x4c   :  { %4578 = vmatmul.mubr.msk.bf16.gmra.mrb[32].mxu1 %vm644_vm1, %v5125_v63 }
  0x4d   :  { %4581 = vmatprep.mubr.msk.bf16.mxu1 %vm644_vm1, %v5129_v3 }
  0x4e   :  { %4514 = vmatmul.mubr.msk.bf16.gmra.mrb[36].mxu0 %vm644_vm1, %v5054_v23  ;;  %v5149_v23 = vld [vmem:[%s6395_s1 + $0x1f0] sm:$0xff]  }
  0x4f   :  { %4517 = vmatprep.mubr.msk.bf16.mxu0 %vm644_vm1, %v5055_v24  ;;  %v5150_v24 = vld [vmem:[%s6395_s1 + $0x1f8] sm:$0xff]  }
  0x54   :  { %4582 = vmatmul.mubr.msk.bf16.gmra.mrb[36].mxu1 %vm644_vm1, %v5130_v4 }
  0x55   :  { %4585 = vmatprep.mubr.msk.bf16.mxu1 %vm644_vm1, %v5133_v7  ;;  %v5148_v7 = vld [vmem:[%s6397_s0 + $0x188] sm:$0xff]  }
  0x56   :  { %4518 = vmatmul.mubr.msk.bf16.gmra.mrb[40].mxu0 %vm644_vm1, %v5056_v25  ;;  %v5088_v25 = vld [vmem:[%s6397_s0 + $0x98] sm:$0xff]  }
  0x57   :  { %4521 = vmatprep.mubr.msk.bf16.mxu0 %vm644_vm1, %v5057_v26  ;;  %v5089_v26 = vld [vmem:[%s6397_s0 + $0xa0] sm:$0xff]  }
  0x5c   :  { %4586 = vmatmul.mubr.msk.bf16.gmra.mrb[40].mxu1 %vm644_vm1, %v5134_v8  ;;  %v5151_v8 = vld [vmem:[%s6397_s0 + $0x190] sm:$0xff]  }
  0x5d   :  { %4589 = vmatprep.mubr.msk.bf16.mxu1 %vm644_vm1, %v5137_v11 }
  0x5e   :  { %4522 = vmatmul.mubr.msk.bf16.gmra.mrb[44].mxu0 %vm644_vm1, %v5058_v27  ;;  %v5153_v27 = vld [vmem:[%s6395_s1 + $0x200] sm:$0xff]  }
  0x5f   :  { %4525 = vmatprep.mubr.msk.bf16.mxu0 %vm644_vm1, %v5059_v28  ;;  %v5154_v28 = vld [vmem:[%s6395_s1 + $0x208] sm:$0xff]  }
  0x64   :  { %4590 = vmatmul.mubr.msk.bf16.gmra.mrb[44].mxu1 %vm644_vm1, %v5138_v12 }
  0x65   :  { %4593 = vmatprep.mubr.msk.bf16.mxu1 %vm644_vm1, %v5141_v15 }
  0x66   :  { %4526 = vmatmul.mubr.msk.bf16.gmra.mrb[48].mxu0 %vm644_vm1, %v5060_v31  ;;  %v5157_v31 = vld [vmem:[%s6395_s1 + $0x210] sm:$0xff]  }
  0x67   :  { %4529 = vmatprep.mubr.msk.bf16.mxu0 %vm644_vm1, %v5061_v32  ;;  %v5158_v32 = vld [vmem:[%s6395_s1 + $0x218] sm:$0xff]  }
  0x6c   :  { %4594 = vmatmul.mubr.msk.bf16.gmra.mrb[48].mxu1 %vm644_vm1, %v5142_v16 }
  0x6d   :  { %4597 = vmatprep.mubr.msk.bf16.mxu1 %vm644_vm1, %v5145_v19  ;;  %v5156_v19 = vld [vmem:[%s6397_s0 + $0x1a8] sm:$0xff]  }
  0x6e   :  { %4530 = vmatmul.mubr.msk.bf16.gmra.mrb[52].mxu0 %vm644_vm1, %v5062_v36  ;;  %v5102_v36 = vld [vmem:[%s6397_s0 + $0xd0] sm:$0xff]  }
  0x6f   :  { %4533 = vmatprep.mubr.msk.bf16.mxu0 %vm644_vm1, %v5063_v37  ;;  %v5103_v37 = vld [vmem:[%s6397_s0 + $0xd8] sm:$0xff]  }
  0x74   :  { %4598 = vmatmul.mubr.msk.bf16.gmra.mrb[52].mxu1 %vm644_vm1, %v5146_v20  ;;  %v5159_v20 = vld [vmem:[%s6397_s0 + $0x1b0] sm:$0xff]  }
  0x75   :  { %4601 = vmatprep.mubr.msk.bf16.mxu1 %vm644_vm1, %v5149_v23 }
  0x76   :  { %4534 = vmatmul.mubr.msk.bf16.gmra.mrb[56].mxu0 %vm644_vm1, %v5064_v40  ;;  %v5110_v40 = vld [vmem:[%s6397_s0 + $0xf0] sm:$0xff]  }
  0x77   :  { %4537 = vmatprep.mubr.msk.bf16.mxu0 %vm644_vm1, %v5065_v41  ;;  %v5111_v41 = vld [vmem:[%s6397_s0 + $0xf8] sm:$0xff]  }
  0x7c   :  { %4602 = vmatmul.mubr.msk.bf16.gmra.mrb[56].mxu1 %vm644_vm1, %v5150_v24 }
  0x7d   :  { %4605 = vmatprep.mubr.msk.bf16.mxu1 %vm644_vm1, %v5153_v27 }
  0x7e   :  { %4538 = vmatmul.mubr.msk.bf16.gmra.mrb[60].mxu0 %vm644_vm1, %v5066_v44  ;;  %v5118_v44 = vld [vmem:[%s6397_s0 + $0x110] sm:$0xff]  }
  0x7f   :  { %4541 = vmatprep.mubr.msk.bf16.mxu0 %vm644_vm1, %v5067_v45  ;;  %v5119_v45 = vld [vmem:[%s6397_s0 + $0x118] sm:$0xff]  }
  0x84   :  { %4606 = vmatmul.mubr.msk.bf16.gmra.mrb[60].mxu1 %vm644_vm1, %v5154_v28 }
  0x85   :  { %4609 = vmatprep.mubr.msk.bf16.mxu1 %vm644_vm1, %v5157_v31 }
  0x86   :  { %4542 = vmatmul.mubr.msk.bf16.gmra.mrb[64].mxu0 %vm644_vm1, %v5068_v48  ;;  %v5126_v48 = vld [vmem:[%s6397_s0 + $0x130] sm:$0xff]  }
  0x87   :  { %4617 = vmatprep.mubr.msk.bf16.mxu0 %vm1782_vm2, %v5069_v49  ;;  %v5127_v49 = vld [vmem:[%s6397_s0 + $0x138] sm:$0xff]  }
  0x8c   :  { %4610 = vmatmul.mubr.msk.bf16.gmra.mrb[64].mxu1 %vm644_vm1, %v5158_v32  ;;  %v5161_v32 = vld [vmem:[%s6397_s0 + $0x1c0] sm:$0xff]  }
  0x8e   :  { %4618 = vmatmul.mubr.msk.bf16.vlgmr.msra.gmra.mrb[0].mxu0 %vm1782_vm2, %v5070_v52  ;;  %v5135_v52 = vld [vmem:[%s6397_s0 + $0x150] sm:$0xff]  }
  0x8f   :  { %4621 = vmatprep.mubr.msk.bf16.mxu0 %vm1782_vm2, %v5071_v53  ;;  %v5136_v53 = vld [vmem:[%s6397_s0 + $0x158] sm:$0xff]  }
  0x96   :  { %4622 = vmatmul.mubr.msk.bf16.gmra.mrb[4].mxu0 %vm1782_vm2, %v5072_v56 }
  0x97   :  { %4625 = vmatprep.mubr.msk.bf16.mxu0 %vm1782_vm2, %v5073_v57 }
  0x9e   :  { %4626 = vmatmul.mubr.msk.bf16.gmra.mrb[8].mxu0 %vm1782_vm2, %v5074_v60  ;;  %v5143_v60 = vld [vmem:[%s6397_s0 + $0x170] sm:$0xff]  }
  0x9f   :  { %4629 = vmatprep.mubr.msk.bf16.mxu0 %vm1782_vm2, %v5075_v61 }
  0xa6   :  { %4630 = vmatmul.mubr.msk.bf16.gmra.mrb[12].mxu0 %vm1782_vm2, %v5076_v0 }
  0xa7   :  { %4633 = vmatprep.mubr.msk.bf16.mxu0 %vm1782_vm2, %v5077_v1  ;;  %v5144_v1 = vld [vmem:[%s6397_s0 + $0x178] sm:$0xff]  }
  0xae   :  { %4634 = vmatmul.mubr.msk.bf16.gmra.mrb[16].mxu0 %vm1782_vm2, %v5078_v5 }
  0xaf   :  { %4637 = vmatprep.mubr.msk.bf16.mxu0 %vm1782_vm2, %v5079_v6 }
  0xb6   :  { %4638 = vmatmul.mubr.msk.bf16.gmra.mrb[20].mxu0 %vm1782_vm2, %v5080_v9 }
  0xb7   :  { %4641 = vmatprep.mubr.msk.bf16.mxu0 %vm1782_vm2, %v5081_v10 }
  0xbe   :  { %4642 = vmatmul.mubr.msk.bf16.gmra.mrb[24].mxu0 %vm1782_vm2, %v5082_v13  ;;  %v5152_v13 = vld [vmem:[%s6397_s0 + $0x198] sm:$0xff]  }
  0xbf   :  { %4645 = vmatprep.mubr.msk.bf16.mxu0 %vm1782_vm2, %v5083_v14  ;;  %v5155_v14 = vld [vmem:[%s6397_s0 + $0x1a0] sm:$0xff]  }
  0xc6   :  { %4646 = vmatmul.mubr.msk.bf16.gmra.mrb[28].mxu0 %vm1782_vm2, %v5084_v17 }
  0xc7   :  { %4649 = vmatprep.mubr.msk.bf16.mxu0 %vm1782_vm2, %v5085_v18 }
  0xce   :  { %4650 = vmatmul.mubr.msk.bf16.gmra.mrb[32].mxu0 %vm1782_vm2, %v5086_v21 }
  0xcf   :  { %4653 = vmatprep.mubr.msk.bf16.mxu0 %vm1782_vm2, %v5087_v22  ;;  %v5765_v22 = vld [vmem:[%s6399_s4] ss:$0 sm:$0xff] }
  0xd6   :  { %4654 = vmatmul.mubr.msk.bf16.gmra.mrb[36].mxu0 %vm1782_vm2, %v5088_v25 }
  0xd7   :  { %4657 = vmatprep.mubr.msk.bf16.mxu0 %vm1782_vm2, %v5089_v26 }
  0xde   :  { %4658 = vmatmul.mubr.msk.bf16.gmra.mrb[40].mxu0 %vm1782_vm2, %v5090_v29  ;;  %v5160_v29 = vld [vmem:[%s6397_s0 + $0x1b8] sm:$0xff]  }
  0xdf   :  { %4661 = vmatprep.mubr.msk.bf16.mxu0 %vm1782_vm2, %v5093_v30  ;;  %v5680_v55 = vpop.f32.mrb[0].mxu1 }
  0xe0   :  { %v5683_v56 = vpop.f32.mrb[1].mxu1 }
  0xe1   :  { %v5685_v57 = vpop.f32.mrb[2].mxu1 }
  0xe2   :  { %v5687_v58 = vpop.f32.mrb[3].mxu1 }
  0xe6   :  { %4662 = vmatmul.mubr.msk.bf16.gmra.mrb[44].mxu0 %vm1782_vm2, %v5094_v33 }
  0xe7   :  { %4665 = vmatprep.mubr.msk.bf16.mxu0 %vm1782_vm2, %v5098_v34  ;;  %v5696_v61 = vpop.f32.mrb[4].mxu1 }
  0xe8   :  { %v5699_v62 = vpop.f32.mrb[5].mxu1 }
  0xe9   :  { %v5701_v63 = vpop.f32.mrb[6].mxu1 }
  0xea   :  { %v5703_v0 = vpop.f32.mrb[7].mxu1 }
  0xee   :  { %4666 = vmatmul.mubr.msk.bf16.gmra.mrb[48].mxu0 %vm1782_vm2, %v5099_v35 }
  0xef   :  { %4669 = vmatprep.mubr.msk.bf16.mxu0 %vm1782_vm2, %v5102_v36  ;;  %v5712_v3 = vpop.f32.mrb[8].mxu1 }
  0xf0   :  { %v5715_v4 = vpop.f32.mrb[9].mxu1 }
  0xf1   :  { %v5717_v5 = vpop.f32.mrb[10].mxu1 }
  0xf2   :  { %v5719_v6 = vpop.f32.mrb[11].mxu1 }
  0xf6   :  { %4670 = vmatmul.mubr.msk.bf16.gmra.mrb[52].mxu0 %vm1782_vm2, %v5103_v37 }
  0xf7   :  { %4673 = vmatprep.mubr.msk.bf16.mxu0 %vm1782_vm2, %v5106_v38  ;;  %v5728_v9 = vpop.f32.mrb[12].mxu1 }
  0xf8   :  { %v5731_v10 = vpop.f32.mrb[13].mxu1 }
  0xf9   :  { %v5733_v11 = vpop.f32.mrb[14].mxu1 }
  0xfa   :  { %v5735_v12 = vpop.f32.mrb[15].mxu1 }
  0xfe   :  { %4674 = vmatmul.mubr.msk.bf16.gmra.mrb[56].mxu0 %vm1782_vm2, %v5107_v39 }
  0xff   :  { %4677 = vmatprep.mubr.msk.bf16.mxu0 %vm1782_vm2, %v5110_v40  ;;  %v5744_v15 = vpop.f32.mrb[16].mxu1 }
 0x100   :  { %v5747_v16 = vpop.f32.mrb[17].mxu1 }
 0x101   :  { %v5749_v17 = vpop.f32.mrb[18].mxu1 }
 0x102   :  { %v5751_v18 = vpop.f32.mrb[19].mxu1 }
 0x106   :  { %4678 = vmatmul.mubr.msk.bf16.gmra.mrb[60].mxu0 %vm1782_vm2, %v5111_v41 }
 0x107   :  { %4681 = vmatprep.mubr.msk.bf16.mxu0 %vm1782_vm2, %v5114_v42  ;;  %v5760_v21 = vpop.f32.mrb[20].mxu1 }
 0x108   :  { %v5768_v23 = vpop.f32.mrb[21].mxu1 }
 0x109   :  { %v5770_v24 = vpop.f32.mrb[22].mxu1 }
 0x10a   :  { %v5772_v26 = vpop.f32.mrb[23].mxu1 }
 0x10e   :  { %4682 = vmatmul.mubr.msk.bf16.gmra.mrb[64].mxu0 %vm1782_vm2, %v5115_v43 }
 0x10f   :  { %4685 = vmatprep.mubr.msk.bf16.mxu0 %vm1782_vm2, %v5118_v44  ;;  %v5785_v38 = vpop.f32.mrb[24].mxu1 }
 0x110   :  { %v5788_v41 = vpop.f32.mrb[25].mxu1 }
 0x111   :  { %v5790_v43 = vpop.f32.mrb[26].mxu1 }
 0x116   :  { %4686 = vmatmul.mubr.msk.bf16.gmra.mrb[68].mxu0 %vm1782_vm2, %v5119_v45 }
 0x117   :  { %4689 = vmatprep.mubr.msk.bf16.mxu0 %vm1782_vm2, %v5122_v46  ;;  %v5792_v46 = vpop.f32.mrb[27].mxu1 }
 0x11e   :  { %4690 = vmatmul.mubr.msk.bf16.gmra.mrb[72].mxu0 %vm1782_vm2, %v5123_v47 }
 0x11f   :  { %4693 = vmatprep.mubr.msk.bf16.mxu0 %vm1782_vm2, %v5126_v48 }
 0x126   :  { %4694 = vmatmul.mubr.msk.bf16.gmra.mrb[76].mxu0 %vm1782_vm2, %v5127_v49  ;;  %v5162_v49 = vld [vmem:[%s6397_s0 + $0x1c8] sm:$0xff]  }
 0x127   :  { %4697 = vmatprep.mubr.msk.bf16.mxu0 %vm1782_vm2, %v5131_v50 }
 0x12e   :  { %4698 = vmatmul.mubr.msk.bf16.gmra.mrb[80].mxu0 %vm1782_vm2, %v5132_v51 }
 0x12f   :  { %4701 = vmatprep.mubr.msk.bf16.mxu0 %vm1782_vm2, %v5135_v52  ;;  %v5163_v52 = vld [vmem:[%s6397_s0 + $0x1d0] sm:$0xff]  }
 0x136   :  { %4702 = vmatmul.mubr.msk.bf16.gmra.mrb[84].mxu0 %vm1782_vm2, %v5136_v53 }
 0x137   :  { %4705 = vmatprep.mubr.msk.bf16.mxu0 %vm1782_vm2, %v5139_v54 }
 0x13e   :  { %4706 = vmatmul.mubr.msk.bf16.gmra.mrb[88].mxu0 %vm1782_vm2, %v5140_v59 }
 0x13f   :  { %4709 = vmatprep.mubr.msk.bf16.mxu0 %vm1782_vm2, %v5143_v60 }
 0x146   :  { %4710 = vmatmul.mubr.msk.bf16.gmra.mrb[92].mxu0 %vm1782_vm2, %v5144_v1 }
 0x147   :  { %4713 = vmatprep.mubr.msk.bf16.mxu0 %vm1782_vm2, %v5147_v2  ;;  %v5807_v2 = vpop.f32.mrb[28].mxu1 }
 0x14e   :  { %4714 = vmatmul.mubr.msk.bf16.gmra.mrb[96].mxu0 %vm1782_vm2, %v5148_v7 }
 0x14f   :  { %4717 = vmatprep.mubr.msk.bf16.mxu0 %vm1782_vm2, %v5151_v8 }
 0x156   :  { %4718 = vmatmul.mubr.msk.bf16.gmra.mrb[100].mxu0 %vm1782_vm2, %v5152_v13  ;;  %v5810_v13 = vpop.f32.mrb[29].mxu1 }
 0x157   :  { %4721 = vmatprep.mubr.msk.bf16.mxu0 %vm1782_vm2, %v5155_v14 }
 0x15e   :  { %4722 = vmatmul.mubr.msk.bf16.gmra.mrb[104].mxu0 %vm1782_vm2, %v5156_v19  ;;  %v5812_v19 = vpop.f32.mrb[30].mxu1 }
 0x15f   :  { %4725 = vmatprep.mubr.msk.bf16.mxu0 %vm1782_vm2, %v5159_v20 }
 0x161   :  { %v4619_v25 = vpop.f32.mrb[0].mxu0 }
 0x162   :  { %v2573_v27 = vadd.f32 %v4619_v25, %v5765_v22  ;;  %v2021_v28 = vpop.f32.mrb[1].mxu0 }
 0x163   :  { %v2571_v30 = vadd.f32 %v5765_v22, %v2021_v28  ;;  %v4620_v31 = vpop.f32.mrb[2].mxu0 }
 0x164   :  { %v2574_v33 = vadd.f32 %v4620_v31, %v5765_v22  ;;  %v2024_v34 = vpop.f32.mrb[3].mxu0  ;;  %v2709_v36 = vmax.f32 %v2573_v27, 0.0  ;;  %v5814_v27 = vpop.f32.mrb[31].mxu1 }
 0x165   :  { %v2572_v35 = vadd.f32 %v5765_v22, %v2024_v34  ;;  %v2707_v39 = vmax.f32 %v2571_v30, 0.0  ;;  %v5164_v30 = vld [vmem:[%s6397_s0 + $0x1d8] sm:$0xff]  }
 0x166   :  { %v2710_v37 = vmax.f32 %v2574_v33, 0.0  ;;  %4726 = vmatmul.mubr.msk.bf16.gmra.mrb[108].mxu0 %vm1782_vm2, %v5160_v29  ;;  %v5165_v33 = vld [vmem:[%s6397_s0 + $0x1e0] sm:$0xff]  }
 0x167   :  { %v2708_v40 = vmax.f32 %v2572_v35, 0.0  ;;  %4729 = vmatprep.mubr.msk.bf16.mxu0 %vm1782_vm2, %v5161_v32 }
 0x168   :  { %v2844_v42 = vpack.c.bf16 %v2710_v37, %v2709_v36 }
 0x169   :  { %v2843_v44 = vpack.c.bf16 %v2708_v40, %v2707_v39  ;;  %v4623_v45 = vpop.f32.mrb[4].mxu0  ;;  %v5829_v40 = vpop.f32.mrb[32].mxu1 }
 0x16a   :  { %v2577_v47 = vadd.f32 %v4623_v45, %v5765_v22  ;;  %v2037_v48 = vpop.f32.mrb[5].mxu0  ;;  %v5832_v45 = vpop.f32.mrb[33].mxu1 }
 0x16b   :  { %v2575_v50 = vadd.f32 %v5765_v22, %v2037_v48  ;;  %v4624_v51 = vpop.f32.mrb[6].mxu0  ;;  %4757 = vmatprep.mubr.msk.bf16.mxu1 %vm1782_vm2, %v2843_v44  ;;  %v5834_v48 = vpop.f32.mrb[34].mxu1 }
 0x16c   :  { %v2578_v53 = vadd.f32 %v4624_v51, %v5765_v22  ;;  %v2040_v54 = vpop.f32.mrb[7].mxu0  ;;  %4758 = vmatmul.mubr.msk.bf16.vlgmr.msra.gmra.mrb[68].mxu1 %vm1782_vm2, %v2844_v42  ;;  %v2713_v60 = vmax.f32 %v2577_v47, 0.0  ;;  %v5836_v51 = vpop.f32.mrb[35].mxu1 }
 0x16d   :  { %v2576_v59 = vadd.f32 %v5765_v22, %v2040_v54  ;;  %v2711_v7 = vmax.f32 %v2575_v50, 0.0  ;;  %v5166_v54 = vld [vmem:[%s6397_s0 + $0x1e8] sm:$0xff]  }
 0x16e   :  { %v2714_v1 = vmax.f32 %v2578_v53, 0.0  ;;  %4730 = vmatmul.mubr.msk.bf16.gmra.mrb[112].mxu0 %vm1782_vm2, %v5162_v49 }
 0x16f   :  { %v2712_v8 = vmax.f32 %v2576_v59, 0.0  ;;  %4733 = vmatprep.mubr.msk.bf16.mxu0 %vm1782_vm2, %v5163_v52 }
 0x170   :  { %v2846_v14 = vpack.c.bf16 %v2714_v1, %v2713_v60  ;;  %v5167_v1 = vld [vmem:[%s6397_s0 + $0x1f0] sm:$0xff]  }
 0x171   :  { %v2845_v20 = vpack.c.bf16 %v2712_v8, %v2711_v7  ;;  %v4627_v25 = vpop.f32.mrb[8].mxu0 }
 0x172   :  { %v2581_v28 = vadd.f32 %v4627_v25, %v5765_v22  ;;  %v2053_v29 = vpop.f32.mrb[9].mxu0 }
 0x173   :  { %v2579_v31 = vadd.f32 %v5765_v22, %v2053_v29  ;;  %v4628_v32 = vpop.f32.mrb[10].mxu0  ;;  %4761 = vmatprep.mubr.msk.bf16.mxu1 %vm1782_vm2, %v2845_v20 }
 0x174   :  { %v2582_v34 = vadd.f32 %v4628_v32, %v5765_v22  ;;  %v2056_v35 = vpop.f32.mrb[11].mxu0  ;;  %4762 = vmatmul.mubr.msk.bf16.gmra.mrb[72].mxu1 %vm1782_vm2, %v2846_v14  ;;  %v2717_v37 = vmax.f32 %v2581_v28, 0.0  ;;  %v5851_v28 = vpop.f32.mrb[36].mxu1 }
 0x175   :  { %v2580_v36 = vadd.f32 %v5765_v22, %v2056_v35  ;;  %v2715_v42 = vmax.f32 %v2579_v31, 0.0  ;;  %v5854_v31 = vpop.f32.mrb[37].mxu1 }
 0x176   :  { %v2718_v39 = vmax.f32 %v2582_v34, 0.0  ;;  %4734 = vmatmul.mubr.msk.bf16.gmra.mrb[116].mxu0 %vm1782_vm2, %v5164_v30 }
 0x177   :  { %v2716_v44 = vmax.f32 %v2580_v36, 0.0  ;;  %4737 = vmatprep.mubr.msk.bf16.mxu0 %vm1782_vm2, %v5165_v33  ;;  %v5856_v33 = vpop.f32.mrb[38].mxu1 }
 0x178   :  { %v2848_v47 = vpack.c.bf16 %v2718_v39, %v2717_v37  ;;  %v5858_v36 = vpop.f32.mrb[39].mxu1 }
 0x179   :  { %v2847_v49 = vpack.c.bf16 %v2716_v44, %v2715_v42  ;;  %v4631_v50 = vpop.f32.mrb[12].mxu0  ;;  %v5168_v42 = vld [vmem:[%s6397_s0 + $0x1f8] sm:$0xff]  }
 0x17a   :  { %v2585_v52 = vadd.f32 %v4631_v50, %v5765_v22  ;;  %v2069_v53 = vpop.f32.mrb[13].mxu0 }
 0x17b   :  { %v2583_v59 = vadd.f32 %v5765_v22, %v2069_v53  ;;  %v4632_v60 = vpop.f32.mrb[14].mxu0  ;;  %4765 = vmatprep.mubr.msk.bf16.mxu1 %vm1782_vm2, %v2847_v49  ;;  %v5169_v49 = vld [vmem:[%s6397_s0 + $0x200] sm:$0xff]  }
 0x17c   :  { %v2586_v7 = vadd.f32 %v4632_v60, %v5765_v22  ;;  %v2072_v8 = vpop.f32.mrb[15].mxu0  ;;  %4766 = vmatmul.mubr.msk.bf16.gmra.mrb[76].mxu1 %vm1782_vm2, %v2848_v47  ;;  %v2721_v20 = vmax.f32 %v2585_v52, 0.0  ;;  %v5873_v60 = vpop.f32.mrb[40].mxu1 }
 0x17d   :  { %v2584_v14 = vadd.f32 %v5765_v22, %v2072_v8  ;;  %v2719_v29 = vmax.f32 %v2583_v59, 0.0  ;;  %v5876_v8 = vpop.f32.mrb[41].mxu1 }
 0x17e   :  { %v2722_v25 = vmax.f32 %v2586_v7, 0.0  ;;  %4738 = vmatmul.mubr.msk.bf16.gmra.mrb[120].mxu0 %vm1782_vm2, %v5166_v54 }
 0x17f   :  { %v2720_v30 = vmax.f32 %v2584_v14, 0.0  ;;  %4741 = vmatprep.mubr.msk.bf16.mxu0 %vm1782_vm2, %v5167_v1 }
 0x180   :  { %v2850_v32 = vpack.c.bf16 %v2722_v25, %v2721_v20  ;;  %v5878_v20 = vpop.f32.mrb[42].mxu1 }
 0x181   :  { %v2849_v34 = vpack.c.bf16 %v2720_v30, %v2719_v29  ;;  %v4635_v35 = vpop.f32.mrb[16].mxu0  ;;  %v5880_v30 = vpop.f32.mrb[43].mxu1 }
 0x182   :  { %v2589_v37 = vadd.f32 %v4635_v35, %v5765_v22  ;;  %v2085_v39 = vpop.f32.mrb[17].mxu0  ;;  %v5170_v35 = vld [vmem:[%s6397_s0 + $0x208] sm:$0xff]  }
 0x183   :  { %v2587_v44 = vadd.f32 %v5765_v22, %v2085_v39  ;;  %v4636_v47 = vpop.f32.mrb[18].mxu0  ;;  %4769 = vmatprep.mubr.msk.bf16.mxu1 %vm1782_vm2, %v2849_v34 }
 0x184   :  { %v2590_v50 = vadd.f32 %v4636_v47, %v5765_v22  ;;  %v2088_v52 = vpop.f32.mrb[19].mxu0  ;;  %4770 = vmatmul.mubr.msk.bf16.gmra.mrb[80].mxu1 %vm1782_vm2, %v2850_v32  ;;  %v2725_v54 = vmax.f32 %v2589_v37, 0.0 }
 0x185   :  { %v2588_v53 = vadd.f32 %v5765_v22, %v2088_v52  ;;  %v2723_v1 = vmax.f32 %v2587_v44, 0.0 }
 0x186   :  { %v2726_v59 = vmax.f32 %v2590_v50, 0.0  ;;  %4742 = vmatmul.mubr.msk.bf16.gmra.mrb[124].mxu0 %vm1782_vm2, %v5168_v42  ;;  %v5171_v42 = vld [vmem:[%s6397_s0 + $0x210] sm:$0xff]  }
 0x187   :  { %v2724_v7 = vmax.f32 %v2588_v53, 0.0  ;;  %4745 = vmatprep.mubr.msk.bf16.mxu0 %vm1782_vm2, %v5169_v49  ;;  %v5895_v53 = vpop.f32.mrb[44].mxu1 }
 0x188   :  { %v2852_v14 = vpack.c.bf16 %v2726_v59, %v2725_v54 }
 0x189   :  { %v2851_v25 = vpack.c.bf16 %v2724_v7, %v2723_v1  ;;  %v4639_v29 = vpop.f32.mrb[20].mxu0  ;;  %v5898_v1 = vpop.f32.mrb[45].mxu1 }
 0x18a   :  { %v2593_v32 = vadd.f32 %v4639_v29, %v5765_v22  ;;  %v2101_v34 = vpop.f32.mrb[21].mxu0  ;;  %6402 = vst [vmem:[#allocation2_spill] sm:$0xff] %v5898_v1 }
 0x18b   :  { %v2591_v37 = vadd.f32 %v5765_v22, %v2101_v34  ;;  %v4640_v39 = vpop.f32.mrb[22].mxu0  ;;  %4773 = vmatprep.mubr.msk.bf16.mxu1 %vm1782_vm2, %v2851_v25  ;;  %v5900_v25 = vpop.f32.mrb[46].mxu1 }
 0x18c   :  { %v2594_v44 = vadd.f32 %v4640_v39, %v5765_v22  ;;  %v2104_v47 = vpop.f32.mrb[23].mxu0  ;;  %4774 = vmatmul.mubr.msk.bf16.gmra.mrb[84].mxu1 %vm1782_vm2, %v2852_v14  ;;  %v2729_v50 = vmax.f32 %v2593_v32, 0.0  ;;  %6403 = vst [vmem:[#allocation3_spill] sm:$0xff] %v5900_v25  ;;  %v5902_v14 = vpop.f32.mrb[47].mxu1 }
 0x18d   :  { %v2592_v49 = vadd.f32 %v5765_v22, %v2104_v47  ;;  %v2727_v54 = vmax.f32 %v2591_v37, 0.0  ;;  %6404 = vst [vmem:[#allocation4_spill] sm:$0xff] %v5902_v14 }
 0x18e   :  { %v2730_v52 = vmax.f32 %v2594_v44, 0.0  ;;  %4746 = vmatmul.mubr.msk.bf16.gmra.mrb[128].mxu0 %vm1782_vm2, %v5170_v35  ;;  %v5172_v35 = vld [vmem:[%s6397_s0 + $0x218] sm:$0xff]  }
 0x18f   :  { %v2728_v59 = vmax.f32 %v2592_v49, 0.0  ;;  %4749 = vmatprep.mubr.msk.bf16.mxu0 %vm1782_vm2, %v5171_v42 }
 0x190   :  { %v2854_v7 = vpack.c.bf16 %v2730_v52, %v2729_v50 }
 0x191   :  { %v2853_v29 = vpack.c.bf16 %v2728_v59, %v2727_v54  ;;  %v4643_v34 = vpop.f32.mrb[24].mxu0  ;;  %v5914_v54 = vpop.f32.mrb[48].mxu1 }
 0x192   :  { %v2597_v32 = vadd.f32 %v4643_v34, %v5765_v22  ;;  %v2117_v39 = vpop.f32.mrb[25].mxu0  ;;  %6405 = vst [vmem:[#allocation5_spill] sm:$0xff] %v5914_v54  ;;  %v5916_v14 = vpop.f32.mrb[49].mxu1 }
 0x193   :  { %v2595_v37 = vadd.f32 %v5765_v22, %v2117_v39  ;;  %v4644_v44 = vpop.f32.mrb[26].mxu0  ;;  %4777 = vmatprep.mubr.msk.bf16.mxu1 %vm1782_vm2, %v2853_v29  ;;  %6406 = vst [vmem:[#allocation6_spill] sm:$0xff] %v5916_v14  ;;  %v5918_v25 = vpop.f32.mrb[50].mxu1 }
 0x194   :  { %v2598_v42 = vadd.f32 %v4644_v44, %v5765_v22  ;;  %v2120_v47 = vpop.f32.mrb[27].mxu0  ;;  %4778 = vmatmul.mubr.msk.bf16.gmra.mrb[88].mxu1 %vm1782_vm2, %v2854_v7  ;;  %v2733_v50 = vmax.f32 %v2597_v32, 0.0  ;;  %6407 = vst [vmem:[#allocation7_spill] sm:$0xff] %v5918_v25  ;;  %v5920_v1 = vpop.f32.mrb[51].mxu1 }
 0x195   :  { %v2596_v49 = vadd.f32 %v5765_v22, %v2120_v47  ;;  %v2731_v59 = vmax.f32 %v2595_v37, 0.0  ;;  %6408 = vst [vmem:[#allocation8_spill] sm:$0xff] %v5920_v1 }
 0x196   :  { %v2734_v52 = vmax.f32 %v2598_v42, 0.0  ;;  %4750 = vmatmul.mubr.msk.bf16.gmra.mrb[132].mxu0 %vm1782_vm2, %v5172_v35 }
 0x197   :  { %v2732_v34 = vmax.f32 %v2596_v49, 0.0 }
 0x198   :  { %v2856_v39 = vpack.c.bf16 %v2734_v52, %v2733_v50 }
 0x199   :  { %v2855_v29 = vpack.c.bf16 %v2732_v34, %v2731_v59  ;;  %v4647_v44 = vpop.f32.mrb[28].mxu0  ;;  %v5928_v59 = vpop.f32.mrb[52].mxu1 }
 0x19a   :  { %v2601_v7 = vadd.f32 %v4647_v44, %v5765_v22  ;;  %v2133_v47 = vpop.f32.mrb[29].mxu0  ;;  %6409 = vst [vmem:[#allocation9_spill] sm:$0xff] %v5928_v59  ;;  %v5930_v44 = vpop.f32.mrb[53].mxu1 }
 0x19b   :  { %v2599_v32 = vadd.f32 %v5765_v22, %v2133_v47  ;;  %v4648_v42 = vpop.f32.mrb[30].mxu0  ;;  %4781 = vmatprep.mubr.msk.bf16.mxu1 %vm1782_vm2, %v2855_v29  ;;  %6410 = vst [vmem:[#allocation10_spill] sm:$0xff] %v5930_v44  ;;  %v5932_v47 = vpop.f32.mrb[54].mxu1 }
 0x19c   :  { %v2602_v35 = vadd.f32 %v4648_v42, %v5765_v22  ;;  %v2136_v37 = vpop.f32.mrb[31].mxu0  ;;  %4782 = vmatmul.mubr.msk.bf16.gmra.mrb[92].mxu1 %vm1782_vm2, %v2856_v39  ;;  %v2737_v50 = vmax.f32 %v2601_v7, 0.0  ;;  %6411 = vst [vmem:[#allocation11_spill] sm:$0xff] %v5932_v47  ;;  %v5934_v54 = vpop.f32.mrb[55].mxu1 }
 0x19d   :  { %v2600_v49 = vadd.f32 %v5765_v22, %v2136_v37  ;;  %v2735_v34 = vmax.f32 %v2599_v32, 0.0  ;;  %6412 = vst [vmem:[#allocation12_spill] sm:$0xff] %v5934_v54 }
 0x19e   :  { %v2738_v52 = vmax.f32 %v2602_v35, 0.0 }
 0x19f   :  { %v2736_v1 = vmax.f32 %v2600_v49, 0.0 }
 0x1a0   :  { %v2858_v25 = vpack.c.bf16 %v2738_v52, %v2737_v50  ;;  %v5942_v52 = vpop.f32.mrb[56].mxu1 }
 0x1a1   :  { %v2857_v14 = vpack.c.bf16 %v2736_v1, %v2735_v34  ;;  %v4651_v29 = vpop.f32.mrb[32].mxu0  ;;  %6413 = vst [vmem:[#allocation13_spill] sm:$0xff] %v5942_v52 }
 0x1a2   :  { %v2605_v42 = vadd.f32 %v4651_v29, %v5765_v22  ;;  %v2149_v39 = vpop.f32.mrb[33].mxu0  ;;  %v5944_v29 = vpop.f32.mrb[57].mxu1 }
 0x1a3   :  { %v2603_v37 = vadd.f32 %v5765_v22, %v2149_v39  ;;  %v4652_v7 = vpop.f32.mrb[34].mxu0  ;;  %4785 = vmatprep.mubr.msk.bf16.mxu1 %vm1782_vm2, %v2857_v14  ;;  %6414 = vst [vmem:[#allocation14_spill] sm:$0xff] %v5944_v29  ;;  %v5946_v39 = vpop.f32.mrb[58].mxu1 }
 0x1a4   :  { %v2606_v32 = vadd.f32 %v4652_v7, %v5765_v22  ;;  %v2152_v35 = vpop.f32.mrb[35].mxu0  ;;  %4786 = vmatmul.mubr.msk.bf16.gmra.mrb[96].mxu1 %vm1782_vm2, %v2858_v25  ;;  %v2741_v50 = vmax.f32 %v2605_v42, 0.0  ;;  %6415 = vst [vmem:[#allocation15_spill] sm:$0xff] %v5946_v39  ;;  %v5948_v59 = vpop.f32.mrb[59].mxu1 }
 0x1a5   :  { %v2604_v49 = vadd.f32 %v5765_v22, %v2152_v35  ;;  %v2739_v34 = vmax.f32 %v2603_v37, 0.0  ;;  %6416 = vst [vmem:[#allocation16_spill] sm:$0xff] %v5948_v59 }
 0x1a6   :  { %v2742_v1 = vmax.f32 %v2606_v32, 0.0 }
 0x1a7   :  { %v2740_v54 = vmax.f32 %v2604_v49, 0.0 }
 0x1a8   :  { %v2860_v47 = vpack.c.bf16 %v2742_v1, %v2741_v50  ;;  %v5956_v1 = vpop.f32.mrb[60].mxu1 }
 0x1a9   :  { %v2859_v44 = vpack.c.bf16 %v2740_v54, %v2739_v34  ;;  %v4655_v14 = vpop.f32.mrb[36].mxu0  ;;  %6417 = vst [vmem:[#allocation17_spill] sm:$0xff] %v5956_v1 }
 0x1aa   :  { %v2609_v7 = vadd.f32 %v4655_v14, %v5765_v22  ;;  %v2165_v25 = vpop.f32.mrb[37].mxu0  ;;  %v5958_v14 = vpop.f32.mrb[61].mxu1 }
 0x1ab   :  { %v2607_v35 = vadd.f32 %v5765_v22, %v2165_v25  ;;  %v4656_v42 = vpop.f32.mrb[38].mxu0  ;;  %4789 = vmatprep.mubr.msk.bf16.mxu1 %vm1782_vm2, %v2859_v44  ;;  %6418 = vst [vmem:[#allocation18_spill] sm:$0xff] %v5958_v14  ;;  %v5960_v25 = vpop.f32.mrb[62].mxu1 }
 0x1ac   :  { %v2610_v37 = vadd.f32 %v4656_v42, %v5765_v22  ;;  %v2168_v32 = vpop.f32.mrb[39].mxu0  ;;  %4790 = vmatmul.mubr.msk.bf16.gmra.mrb[100].mxu1 %vm1782_vm2, %v2860_v47  ;;  %v2745_v50 = vmax.f32 %v2609_v7, 0.0  ;;  %6419 = vst [vmem:[#allocation19_spill] sm:$0xff] %v5960_v25  ;;  %v5962_v52 = vpop.f32.mrb[63].mxu1 }
 0x1ad   :  { %v2608_v49 = vadd.f32 %v5765_v22, %v2168_v32  ;;  %v2743_v34 = vmax.f32 %v2607_v35, 0.0  ;;  %6420 = vst [vmem:[#allocation20_spill] sm:$0xff] %v5962_v52 }
 0x1ae   :  { %v2746_v54 = vmax.f32 %v2610_v37, 0.0 }
 0x1af   :  { %v2744_v59 = vmax.f32 %v2608_v49, 0.0 }
 0x1b0   :  { %v2862_v39 = vpack.c.bf16 %v2746_v54, %v2745_v50  ;;  %v5970_v54 = vpop.f32.mrb[64].mxu1 }
 0x1b1   :  { %v2861_v29 = vpack.c.bf16 %v2744_v59, %v2743_v34  ;;  %v4659_v44 = vpop.f32.mrb[40].mxu0  ;;  %6421 = vst [vmem:[#allocation21_spill] sm:$0xff] %v5970_v54 }
 0x1b2   :  { %v2613_v42 = vadd.f32 %v4659_v44, %v5765_v22  ;;  %v2181_v47 = vpop.f32.mrb[41].mxu0  ;;  %v5972_v44 = vpop.f32.mrb[65].mxu1 }
 0x1b3   :  { %v2611_v32 = vadd.f32 %v5765_v22, %v2181_v47  ;;  %v4660_v7 = vpop.f32.mrb[42].mxu0  ;;  %4793 = vmatprep.mubr.msk.bf16.mxu1 %vm1782_vm2, %v2861_v29  ;;  %6422 = vst [vmem:[#allocation22_spill] sm:$0xff] %v5972_v44  ;;  %v5974_v47 = vpop.f32.mrb[66].mxu1 }
 0x1b4   :  { %v2614_v35 = vadd.f32 %v4660_v7, %v5765_v22  ;;  %v2184_v37 = vpop.f32.mrb[43].mxu0  ;;  %4794 = vmatmul.mubr.msk.bf16.gmra.mrb[104].mxu1 %vm1782_vm2, %v2862_v39  ;;  %v2749_v50 = vmax.f32 %v2613_v42, 0.0  ;;  %6423 = vst [vmem:[#allocation23_spill] sm:$0xff] %v5974_v47  ;;  %v5976_v1 = vpop.f32.mrb[67].mxu1 }
 0x1b5   :  { %v2612_v49 = vadd.f32 %v5765_v22, %v2184_v37  ;;  %v2747_v34 = vmax.f32 %v2611_v32, 0.0  ;;  %6424 = vst [vmem:[#allocation24_spill] sm:$0xff] %v5976_v1 }
 0x1b6   :  { %v2750_v59 = vmax.f32 %v2614_v35, 0.0 }
 0x1b7   :  { %v2748_v52 = vmax.f32 %v2612_v49, 0.0 }
 0x1b8   :  { %v2864_v25 = vpack.c.bf16 %v2750_v59, %v2749_v50 }
 0x1b9   :  { %v2863_v14 = vpack.c.bf16 %v2748_v52, %v2747_v34  ;;  %v4663_v29 = vpop.f32.mrb[44].mxu0 }
 0x1ba   :  { %v2617_v7 = vadd.f32 %v4663_v29, %v5765_v22  ;;  %v2197_v39 = vpop.f32.mrb[45].mxu0 }
 0x1bb   :  { %v2615_v37 = vadd.f32 %v5765_v22, %v2197_v39  ;;  %v4664_v42 = vpop.f32.mrb[46].mxu0  ;;  %4797 = vmatprep.mubr.msk.bf16.mxu1 %vm1782_vm2, %v2863_v14 }
 0x1bc   :  { %v2618_v32 = vadd.f32 %v4664_v42, %v5765_v22  ;;  %v2200_v35 = vpop.f32.mrb[47].mxu0  ;;  %4798 = vmatmul.mubr.msk.bf16.gmra.mrb[108].mxu1 %vm1782_vm2, %v2864_v25  ;;  %v2753_v50 = vmax.f32 %v2617_v7, 0.0 }
 0x1bd   :  { %v2616_v49 = vadd.f32 %v5765_v22, %v2200_v35  ;;  %v2751_v59 = vmax.f32 %v2615_v37, 0.0 }
 0x1be   :  { %v2754_v52 = vmax.f32 %v2618_v32, 0.0 }
 0x1bf   :  { %v2752_v34 = vmax.f32 %v2616_v49, 0.0 }
 0x1c0   :  { %v2866_v1 = vpack.c.bf16 %v2754_v52, %v2753_v50 }
 0x1c1   :  { %v2865_v47 = vpack.c.bf16 %v2752_v34, %v2751_v59  ;;  %v4667_v29 = vpop.f32.mrb[48].mxu0 }
 0x1c2   :  { %v2621_v44 = vadd.f32 %v4667_v29, %v5765_v22  ;;  %v2213_v39 = vpop.f32.mrb[49].mxu0 }
 0x1c3   :  { %v2619_v54 = vadd.f32 %v5765_v22, %v2213_v39  ;;  %v4668_v14 = vpop.f32.mrb[50].mxu0  ;;  %4801 = vmatprep.mubr.msk.bf16.mxu1 %vm1782_vm2, %v2865_v47 }
 0x1c4   :  { %v2622_v42 = vadd.f32 %v4668_v14, %v5765_v22  ;;  %v2216_v25 = vpop.f32.mrb[51].mxu0  ;;  %4802 = vmatmul.mubr.msk.bf16.gmra.mrb[112].mxu1 %vm1782_vm2, %v2866_v1  ;;  %v2757_v37 = vmax.f32 %v2621_v44, 0.0 }
 0x1c5   :  { %v2620_v7 = vadd.f32 %v5765_v22, %v2216_v25  ;;  %v2755_v35 = vmax.f32 %v2619_v54, 0.0 }
 0x1c6   :  { %v2758_v32 = vmax.f32 %v2622_v42, 0.0 }
 0x1c7   :  { %v2756_v49 = vmax.f32 %v2620_v7, 0.0 }
 0x1c8   :  { %v2868_v50 = vpack.c.bf16 %v2758_v32, %v2757_v37 }
 0x1c9   :  { %v2867_v52 = vpack.c.bf16 %v2756_v49, %v2755_v35  ;;  %v4671_v59 = vpop.f32.mrb[52].mxu0 }
 0x1ca   :  { %v2625_v34 = vadd.f32 %v4671_v59, %v5765_v22  ;;  %v2229_v29 = vpop.f32.mrb[53].mxu0 }
 0x1cb   :  { %v2623_v39 = vadd.f32 %v5765_v22, %v2229_v29  ;;  %v4672_v47 = vpop.f32.mrb[54].mxu0  ;;  %4805 = vmatprep.mubr.msk.bf16.mxu1 %vm1782_vm2, %v2867_v52 }
 0x1cc   :  { %v2626_v14 = vadd.f32 %v4672_v47, %v5765_v22  ;;  %v2232_v1 = vpop.f32.mrb[55].mxu0  ;;  %4806 = vmatmul.mubr.msk.bf16.gmra.mrb[116].mxu1 %vm1782_vm2, %v2868_v50  ;;  %v2761_v54 = vmax.f32 %v2625_v34, 0.0 }
 0x1cd   :  { %v2624_v44 = vadd.f32 %v5765_v22, %v2232_v1  ;;  %v2759_v25 = vmax.f32 %v2623_v39, 0.0 }
 0x1ce   :  { %v2762_v42 = vmax.f32 %v2626_v14, 0.0 }
 0x1cf   :  { %v2760_v7 = vmax.f32 %v2624_v44, 0.0 }
 0x1d0   :  { %v2870_v37 = vpack.c.bf16 %v2762_v42, %v2761_v54 }
 0x1d1   :  { %v2869_v32 = vpack.c.bf16 %v2760_v7, %v2759_v25  ;;  %v4675_v35 = vpop.f32.mrb[56].mxu0 }
 0x1d2   :  { %v2629_v49 = vadd.f32 %v4675_v35, %v5765_v22  ;;  %v2245_v59 = vpop.f32.mrb[57].mxu0 }
 0x1d3   :  { %v2627_v29 = vadd.f32 %v5765_v22, %v2245_v59  ;;  %v4676_v52 = vpop.f32.mrb[58].mxu0  ;;  %4809 = vmatprep.mubr.msk.bf16.mxu1 %vm1782_vm2, %v2869_v32 }
 0x1d4   :  { %v2630_v47 = vadd.f32 %v4676_v52, %v5765_v22  ;;  %v2248_v50 = vpop.f32.mrb[59].mxu0  ;;  %4810 = vmatmul.mubr.msk.bf16.gmra.mrb[120].mxu1 %vm1782_vm2, %v2870_v37  ;;  %v2765_v39 = vmax.f32 %v2629_v49, 0.0 }
 0x1d5   :  { %v2628_v34 = vadd.f32 %v5765_v22, %v2248_v50  ;;  %v2763_v1 = vmax.f32 %v2627_v29, 0.0 }
 0x1d6   :  { %v2766_v14 = vmax.f32 %v2630_v47, 0.0 }
 0x1d7   :  { %v2764_v44 = vmax.f32 %v2628_v34, 0.0 }
 0x1d8   :  { %v2872_v54 = vpack.c.bf16 %v2766_v14, %v2765_v39 }
 0x1d9   :  { %v2871_v42 = vpack.c.bf16 %v2764_v44, %v2763_v1  ;;  %v4679_v25 = vpop.f32.mrb[60].mxu0 }
 0x1da   :  { %v2633_v7 = vadd.f32 %v4679_v25, %v5765_v22  ;;  %v2261_v35 = vpop.f32.mrb[61].mxu0 }
 0x1db   :  { %v2631_v59 = vadd.f32 %v5765_v22, %v2261_v35  ;;  %v4680_v32 = vpop.f32.mrb[62].mxu0  ;;  %4813 = vmatprep.mubr.msk.bf16.mxu1 %vm1782_vm2, %v2871_v42 }
 0x1dc   :  { %v2634_v52 = vadd.f32 %v4680_v32, %v5765_v22  ;;  %v2264_v37 = vpop.f32.mrb[63].mxu0  ;;  %4814 = vmatmul.mubr.msk.bf16.gmra.mrb[124].mxu1 %vm1782_vm2, %v2872_v54  ;;  %v2769_v29 = vmax.f32 %v2633_v7, 0.0 }
 0x1dd   :  { %v2632_v49 = vadd.f32 %v5765_v22, %v2264_v37  ;;  %v2767_v50 = vmax.f32 %v2631_v59, 0.0 }
 0x1de   :  { %v2770_v47 = vmax.f32 %v2634_v52, 0.0 }
 0x1df   :  { %v2768_v34 = vmax.f32 %v2632_v49, 0.0 }
 0x1e0   :  { %v2874_v39 = vpack.c.bf16 %v2770_v47, %v2769_v29 }
 0x1e1   :  { %v2873_v14 = vpack.c.bf16 %v2768_v34, %v2767_v50  ;;  %v4683_v1 = vpop.f32.mrb[64].mxu0 }
 0x1e2   :  { %v2637_v44 = vadd.f32 %v4683_v1, %v5765_v22  ;;  %v2277_v25 = vpop.f32.mrb[65].mxu0 }
 0x1e3   :  { %v2635_v35 = vadd.f32 %v5765_v22, %v2277_v25  ;;  %v4684_v42 = vpop.f32.mrb[66].mxu0  ;;  %4817 = vmatprep.mubr.msk.bf16.mxu1 %vm1782_vm2, %v2873_v14 }
 0x1e4   :  { %v2638_v32 = vadd.f32 %v4684_v42, %v5765_v22  ;;  %v2280_v54 = vpop.f32.mrb[67].mxu0  ;;  %4818 = vmatmul.mubr.msk.bf16.gmra.mrb[128].mxu1 %vm1782_vm2, %v2874_v39  ;;  %v2773_v59 = vmax.f32 %v2637_v44, 0.0 }
 0x1e5   :  { %v2636_v7 = vadd.f32 %v5765_v22, %v2280_v54  ;;  %v2771_v37 = vmax.f32 %v2635_v35, 0.0 }
 0x1e6   :  { %v2774_v52 = vmax.f32 %v2638_v32, 0.0 }
 0x1e7   :  { %v2772_v49 = vmax.f32 %v2636_v7, 0.0 }
 0x1e8   :  { %v2876_v29 = vpack.c.bf16 %v2774_v52, %v2773_v59 }
 0x1e9   :  { %v2875_v47 = vpack.c.bf16 %v2772_v49, %v2771_v37  ;;  %v4687_v50 = vpop.f32.mrb[68].mxu0 }
 0x1ea   :  { %v2302_v34 = vadd.f32 %v4687_v50, %v5680_v55  ;;  %v2293_v1 = vpop.f32.mrb[69].mxu0 }
 0x1eb   :  { %v2294_v25 = vadd.f32 %v2293_v1, %v5683_v56  ;;  %v4688_v14 = vpop.f32.mrb[70].mxu0  ;;  %4821 = vmatprep.mubr.msk.bf16.mxu1 %vm1782_vm2, %v2875_v47 }
 0x1ec   :  { %v2641_v42 = vadd.f32 %v5765_v22, %v2302_v34  ;;  %v2305_v39 = vadd.f32 %v4688_v14, %v5685_v57  ;;  %v2296_v54 = vpop.f32.mrb[71].mxu0  ;;  %4822 = vmatmul.mubr.msk.bf16.gmra.mrb[132].mxu1 %vm1782_vm2, %v2876_v29 }
 0x1ed   :  { %v2639_v44 = vadd.f32 %v5765_v22, %v2294_v25  ;;  %v2297_v35 = vadd.f32 %v2296_v54, %v5687_v58 }
 0x1ee   :  { %v2642_v32 = vadd.f32 %v5765_v22, %v2305_v39  ;;  %v2777_v7 = vmax.f32 %v2641_v42, 0.0 }
 0x1ef   :  { %v2640_v55 = vadd.f32 %v5765_v22, %v2297_v35  ;;  %v2775_v59 = vmax.f32 %v2639_v44, 0.0 }
 0x1f0   :  { %v2778_v56 = vmax.f32 %v2642_v32, 0.0 }
 0x1f1   :  { %v2776_v52 = vmax.f32 %v2640_v55, 0.0  ;;  %v4691_v37 = vpop.f32.mrb[72].mxu0 }
 0x1f2   :  { %v2878_v49 = vpack.c.bf16 %v2778_v56, %v2777_v7  ;;  %v2318_v47 = vadd.f32 %v4691_v37, %v5696_v61  ;;  %v2309_v57 = vpop.f32.mrb[73].mxu0 }
 0x1f3   :  { %v2877_v50 = vpack.c.bf16 %v2776_v52, %v2775_v59  ;;  %v2310_v29 = vadd.f32 %v2309_v57, %v5699_v62  ;;  %v4692_v34 = vpop.f32.mrb[74].mxu0 }
 0x1f4   :  { %v2645_v1 = vadd.f32 %v5765_v22, %v2318_v47  ;;  %v2321_v58 = vadd.f32 %v4692_v34, %v5701_v63  ;;  %v2312_v25 = vpop.f32.mrb[75].mxu0 }
 0x1f5   :  { %v2643_v14 = vadd.f32 %v5765_v22, %v2310_v29  ;;  %v2313_v42 = vadd.f32 %v2312_v25, %v5703_v0  ;;  %4825 = vmatprep.mubr.msk.bf16.mxu1 %vm1782_vm2, %v2877_v50 }
 0x1f6   :  { %v2646_v39 = vadd.f32 %v5765_v22, %v2321_v58  ;;  %4826 = vmatmul.mubr.msk.bf16.gmra.mrb[136].mxu1 %vm1782_vm2, %v2878_v49  ;;  %v2781_v54 = vmax.f32 %v2645_v1, 0.0 }
 0x1f7   :  { %v2644_v61 = vadd.f32 %v5765_v22, %v2313_v42  ;;  %v2779_v44 = vmax.f32 %v2643_v14, 0.0 }
 0x1f8   :  { %v2782_v62 = vmax.f32 %v2646_v39, 0.0 }
 0x1f9   :  { %v2780_v35 = vmax.f32 %v2644_v61, 0.0  ;;  %v4695_v32 = vpop.f32.mrb[76].mxu0 }
 0x1fa   :  { %v2880_v55 = vpack.c.bf16 %v2782_v62, %v2781_v54  ;;  %v2334_v63 = vadd.f32 %v4695_v32, %v5712_v3  ;;  %v2325_v7 = vpop.f32.mrb[77].mxu0 }
 0x1fb   :  { %v2879_v56 = vpack.c.bf16 %v2780_v35, %v2779_v44  ;;  %v2326_v0 = vadd.f32 %v2325_v7, %v5715_v4  ;;  %v4696_v59 = vpop.f32.mrb[78].mxu0 }
 0x1fc   :  { %v2649_v52 = vadd.f32 %v5765_v22, %v2334_v63  ;;  %v2337_v37 = vadd.f32 %v4696_v59, %v5717_v5  ;;  %v2328_v49 = vpop.f32.mrb[79].mxu0 }
 0x1fd   :  { %v2647_v47 = vadd.f32 %v5765_v22, %v2326_v0  ;;  %v2329_v57 = vadd.f32 %v2328_v49, %v5719_v6  ;;  %4829 = vmatprep.mubr.msk.bf16.mxu1 %vm1782_vm2, %v2879_v56 }
 0x1fe   :  { %v2650_v50 = vadd.f32 %v5765_v22, %v2337_v37  ;;  %4830 = vmatmul.mubr.msk.bf16.gmra.mrb[140].mxu1 %vm1782_vm2, %v2880_v55  ;;  %v2785_v29 = vmax.f32 %v2649_v52, 0.0 }
 0x1ff   :  { %v2648_v3 = vadd.f32 %v5765_v22, %v2329_v57  ;;  %v2783_v34 = vmax.f32 %v2647_v47, 0.0 }
 0x200   :  { %v2786_v4 = vmax.f32 %v2650_v50, 0.0 }
 0x201   :  { %v2784_v1 = vmax.f32 %v2648_v3, 0.0  ;;  %v4699_v58 = vpop.f32.mrb[80].mxu0 }
 0x202   :  { %v2882_v25 = vpack.c.bf16 %v2786_v4, %v2785_v29  ;;  %v2350_v5 = vadd.f32 %v4699_v58, %v5728_v9  ;;  %v2341_v14 = vpop.f32.mrb[81].mxu0 }
 0x203   :  { %v2881_v42 = vpack.c.bf16 %v2784_v1, %v2783_v34  ;;  %v2342_v6 = vadd.f32 %v2341_v14, %v5731_v10  ;;  %v4700_v39 = vpop.f32.mrb[82].mxu0 }
 0x204   :  { %v2653_v61 = vadd.f32 %v5765_v22, %v2350_v5  ;;  %v2353_v54 = vadd.f32 %v4700_v39, %v5733_v11  ;;  %v2344_v62 = vpop.f32.mrb[83].mxu0 }
 0x205   :  { %v2651_v44 = vadd.f32 %v5765_v22, %v2342_v6  ;;  %v2345_v35 = vadd.f32 %v2344_v62, %v5735_v12  ;;  %4833 = vmatprep.mubr.msk.bf16.mxu1 %vm1782_vm2, %v2881_v42 }
 0x206   :  { %v2654_v32 = vadd.f32 %v5765_v22, %v2353_v54  ;;  %4834 = vmatmul.mubr.msk.bf16.gmra.mrb[144].mxu1 %vm1782_vm2, %v2882_v25  ;;  %v2789_v55 = vmax.f32 %v2653_v61, 0.0 }
 0x207   :  { %v2652_v9 = vadd.f32 %v5765_v22, %v2345_v35  ;;  %v2787_v63 = vmax.f32 %v2651_v44, 0.0 }
 0x208   :  { %v2790_v10 = vmax.f32 %v2654_v32, 0.0 }
 0x209   :  { %v2788_v7 = vmax.f32 %v2652_v9, 0.0  ;;  %v4703_v56 = vpop.f32.mrb[84].mxu0 }
 0x20a   :  { %v2884_v0 = vpack.c.bf16 %v2790_v10, %v2789_v55  ;;  %v2366_v11 = vadd.f32 %v4703_v56, %v5744_v15  ;;  %v2357_v59 = vpop.f32.mrb[85].mxu0 }
 0x20b   :  { %v2883_v52 = vpack.c.bf16 %v2788_v7, %v2787_v63  ;;  %v2358_v12 = vadd.f32 %v2357_v59, %v5747_v16  ;;  %v4704_v37 = vpop.f32.mrb[86].mxu0 }
 0x20c   :  { %v2657_v49 = vadd.f32 %v5765_v22, %v2366_v11  ;;  %v2369_v47 = vadd.f32 %v4704_v37, %v5749_v17  ;;  %v2360_v57 = vpop.f32.mrb[87].mxu0 }
 0x20d   :  { %v2655_v50 = vadd.f32 %v5765_v22, %v2358_v12  ;;  %v2361_v3 = vadd.f32 %v2360_v57, %v5751_v18  ;;  %4837 = vmatprep.mubr.msk.bf16.mxu1 %vm1782_vm2, %v2883_v52 }
 0x20e   :  { %v2658_v29 = vadd.f32 %v5765_v22, %v2369_v47  ;;  %4838 = vmatmul.mubr.msk.bf16.gmra.mrb[148].mxu1 %vm1782_vm2, %v2884_v0  ;;  %v2793_v4 = vmax.f32 %v2657_v49, 0.0 }
 0x20f   :  { %v2656_v15 = vadd.f32 %v5765_v22, %v2361_v3  ;;  %v2791_v34 = vmax.f32 %v2655_v50, 0.0 }
 0x210   :  { %v2794_v16 = vmax.f32 %v2658_v29, 0.0 }
 0x211   :  { %v2792_v1 = vmax.f32 %v2656_v15, 0.0  ;;  %v4707_v58 = vpop.f32.mrb[88].mxu0 }
 0x212   :  { %v2886_v25 = vpack.c.bf16 %v2794_v16, %v2793_v4  ;;  %v2382_v17 = vadd.f32 %v4707_v58, %v5760_v21  ;;  %v2373_v5 = vpop.f32.mrb[89].mxu0 }
 0x213   :  { %v2885_v14 = vpack.c.bf16 %v2792_v1, %v2791_v34  ;;  %v2374_v18 = vadd.f32 %v2373_v5, %v5768_v23  ;;  %v4708_v42 = vpop.f32.mrb[90].mxu0 }
 0x214   :  { %v2661_v6 = vadd.f32 %v5765_v22, %v2382_v17  ;;  %v2385_v39 = vadd.f32 %v4708_v42, %v5770_v24  ;;  %v2376_v61 = vpop.f32.mrb[91].mxu0 }
 0x215   :  { %v2659_v54 = vadd.f32 %v5765_v22, %v2374_v18  ;;  %v2377_v62 = vadd.f32 %v2376_v61, %v5772_v26  ;;  %4841 = vmatprep.mubr.msk.bf16.mxu1 %vm1782_vm2, %v2885_v14 }
 0x216   :  { %v2662_v44 = vadd.f32 %v5765_v22, %v2385_v39  ;;  %4842 = vmatmul.mubr.msk.bf16.gmra.mrb[152].mxu1 %vm1782_vm2, %v2886_v25  ;;  %v2797_v35 = vmax.f32 %v2661_v6, 0.0 }
 0x217   :  { %v2660_v21 = vadd.f32 %v5765_v22, %v2377_v62  ;;  %v2795_v32 = vmax.f32 %v2659_v54, 0.0 }
 0x218   :  { %v2798_v23 = vmax.f32 %v2662_v44, 0.0 }
 0x219   :  { %v2796_v9 = vmax.f32 %v2660_v21, 0.0  ;;  %v4711_v55 = vpop.f32.mrb[92].mxu0 }
 0x21a   :  { %v2888_v10 = vpack.c.bf16 %v2798_v23, %v2797_v35  ;;  %v2398_v24 = vadd.f32 %v4711_v55, %v5785_v38  ;;  %v2389_v63 = vpop.f32.mrb[93].mxu0  ;;  %v6101_v35 = vld [vmem:[%s6399_s4] ss:$0 sm:$0xff] }
 0x21b   :  { %v2887_v7 = vpack.c.bf16 %v2796_v9, %v2795_v32  ;;  %v2390_v26 = vadd.f32 %v2389_v63, %v5788_v41  ;;  %v4712_v56 = vpop.f32.mrb[94].mxu0 }
 0x21c   :  { %v2665_v0 = vadd.f32 %v5765_v22, %v2398_v24  ;;  %v2401_v11 = vadd.f32 %v4712_v56, %v5790_v43  ;;  %v2392_v59 = vpop.f32.mrb[95].mxu0 }
 0x21d   :  { %v2663_v52 = vadd.f32 %v5765_v22, %v2390_v26  ;;  %v2393_v12 = vadd.f32 %v2392_v59, %v5792_v46  ;;  %4845 = vmatprep.mubr.msk.bf16.mxu1 %vm1782_vm2, %v2887_v7 }
 0x21e   :  { %v2666_v37 = vadd.f32 %v5765_v22, %v2401_v11  ;;  %4846 = vmatmul.mubr.msk.bf16.gmra.mrb[156].mxu1 %vm1782_vm2, %v2888_v10  ;;  %v2801_v49 = vmax.f32 %v2665_v0, 0.0 }
 0x21f   :  { %v2664_v38 = vadd.f32 %v5765_v22, %v2393_v12  ;;  %v2799_v47 = vmax.f32 %v2663_v52, 0.0 }
 0x220   :  { %v2802_v41 = vmax.f32 %v2666_v37, 0.0 }
 0x221   :  { %v2800_v57 = vmax.f32 %v2664_v38, 0.0  ;;  %v4715_v50 = vpop.f32.mrb[96].mxu0 }
 0x222   :  { %v2890_v3 = vpack.c.bf16 %v2802_v41, %v2801_v49  ;;  %v2414_v43 = vadd.f32 %v4715_v50, %v5807_v2  ;;  %v2405_v29 = vpop.f32.mrb[97].mxu0 }
 0x223   :  { %v2889_v15 = vpack.c.bf16 %v2800_v57, %v2799_v47  ;;  %v2406_v46 = vadd.f32 %v2405_v29, %v5810_v13  ;;  %v4716_v4 = vpop.f32.mrb[98].mxu0 }
 0x224   :  { %v2669_v16 = vadd.f32 %v5765_v22, %v2414_v43  ;;  %v2417_v34 = vadd.f32 %v4716_v4, %v5812_v19  ;;  %v2408_v1 = vpop.f32.mrb[99].mxu0 }
 0x225   :  { %v2667_v58 = vadd.f32 %v5765_v22, %v2406_v46  ;;  %v2409_v25 = vadd.f32 %v2408_v1, %v5814_v27  ;;  %4849 = vmatprep.mubr.msk.bf16.mxu1 %vm1782_vm2, %v2889_v15 }
 0x226   :  { %v2670_v17 = vadd.f32 %v5765_v22, %v2417_v34  ;;  %4850 = vmatmul.mubr.msk.bf16.gmra.mrb[160].mxu1 %vm1782_vm2, %v2890_v3  ;;  %v2805_v5 = vmax.f32 %v2669_v16, 0.0 }
 0x227   :  { %v2668_v2 = vadd.f32 %v5765_v22, %v2409_v25  ;;  %v2803_v14 = vmax.f32 %v2667_v58, 0.0 }
 0x228   :  { %v2806_v13 = vmax.f32 %v2670_v17, 0.0 }
 0x229   :  { %v2804_v18 = vmax.f32 %v2668_v2, 0.0  ;;  %v4719_v42 = vpop.f32.mrb[100].mxu0 }
 0x22a   :  { %v2892_v6 = vpack.c.bf16 %v2806_v13, %v2805_v5  ;;  %v2430_v19 = vadd.f32 %v4719_v42, %v5829_v40  ;;  %v2421_v39 = vpop.f32.mrb[101].mxu0 }
 0x22b   :  { %v2891_v61 = vpack.c.bf16 %v2804_v18, %v2803_v14  ;;  %v2422_v27 = vadd.f32 %v2421_v39, %v5832_v45  ;;  %v4720_v54 = vpop.f32.mrb[102].mxu0 }
 0x22c   :  { %v2673_v62 = vadd.f32 %v5765_v22, %v2430_v19  ;;  %v2433_v44 = vadd.f32 %v4720_v54, %v5834_v48  ;;  %v2424_v21 = vpop.f32.mrb[103].mxu0 }
 0x22d   :  { %v2671_v23 = vadd.f32 %v6101_v35, %v2422_v27  ;;  %v2425_v32 = vadd.f32 %v2424_v21, %v5836_v51  ;;  %4853 = vmatprep.mubr.msk.bf16.mxu1 %vm1782_vm2, %v2891_v61  ;;  %v6426_v27 = vld [vmem:[#allocation3_spill] sm:$0xff]  ;;  %v6427_v21 = vld [vmem:[#allocation4_spill] sm:$0xff] }
 0x22e   :  { %v2674_v40 = vadd.f32 %v6101_v35, %v2433_v44  ;;  %4854 = vmatmul.mubr.msk.bf16.gmra.mrb[164].mxu1 %vm1782_vm2, %v2892_v6  ;;  %v2809_v45 = vmax.f32 %v2673_v62, 0.0  ;;  %v6425_v6 = vld [vmem:[#allocation2_spill] sm:$0xff] }
 0x22f   :  { %v2672_v22 = vadd.f32 %v6101_v35, %v2425_v32  ;;  %v2807_v9 = vmax.f32 %v2671_v23, 0.0 }
 0x230   :  { %v2810_v48 = vmax.f32 %v2674_v40, 0.0 }
 0x231   :  { %v2808_v55 = vmax.f32 %v2672_v22, 0.0  ;;  %v4723_v10 = vpop.f32.mrb[104].mxu0 }
 0x232   :  { %v2894_v24 = vpack.c.bf16 %v2810_v48, %v2809_v45  ;;  %v2446_v63 = vadd.f32 %v4723_v10, %v5851_v28  ;;  %v2437_v7 = vpop.f32.mrb[105].mxu0 }
 0x233   :  { %v2893_v26 = vpack.c.bf16 %v2808_v55, %v2807_v9  ;;  %v2438_v51 = vadd.f32 %v2437_v7, %v5854_v31  ;;  %v4724_v56 = vpop.f32.mrb[106].mxu0  ;;  %v6428_v7 = vld [vmem:[#allocation5_spill] sm:$0xff] }
 0x234   :  { %v2677_v0 = vadd.f32 %v6101_v35, %v2446_v63  ;;  %v2449_v11 = vadd.f32 %v4724_v56, %v5856_v33  ;;  %v2440_v59 = vpop.f32.mrb[107].mxu0 }
 0x235   :  { %v2675_v52 = vadd.f32 %v6101_v35, %v2438_v51  ;;  %v2441_v12 = vadd.f32 %v2440_v59, %v5858_v36  ;;  %4857 = vmatprep.mubr.msk.bf16.mxu1 %vm1782_vm2, %v2893_v26 }
 0x236   :  { %v2678_v37 = vadd.f32 %v6101_v35, %v2449_v11  ;;  %4858 = vmatmul.mubr.msk.bf16.gmra.mrb[168].mxu1 %vm1782_vm2, %v2894_v24  ;;  %v2813_v38 = vmax.f32 %v2677_v0, 0.0  ;;  %v6429_v11 = vld [vmem:[#allocation6_spill] sm:$0xff] }
 0x237   :  { %v2676_v28 = vadd.f32 %v6101_v35, %v2441_v12  ;;  %v2811_v49 = vmax.f32 %v2675_v52, 0.0 }
 0x238   :  { %v2814_v31 = vmax.f32 %v2678_v37, 0.0  ;;  %v6430_v37 = vld [vmem:[#allocation7_spill] sm:$0xff] }
 0x239   :  { %v2812_v41 = vmax.f32 %v2676_v28, 0.0  ;;  %v4727_v47 = vpop.f32.mrb[108].mxu0 }
 0x23a   :  { %v2896_v57 = vpack.c.bf16 %v2814_v31, %v2813_v38  ;;  %v2462_v33 = vadd.f32 %v4727_v47, %v5873_v60  ;;  %v2453_v50 = vpop.f32.mrb[109].mxu0 }
 0x23b   :  { %v2895_v3 = vpack.c.bf16 %v2812_v41, %v2811_v49  ;;  %v2454_v36 = vadd.f32 %v2453_v50, %v5876_v8  ;;  %v4728_v43 = vpop.f32.mrb[110].mxu0  ;;  %v6431_v49 = vld [vmem:[#allocation8_spill] sm:$0xff] }
 0x23c   :  { %v2681_v29 = vadd.f32 %v6101_v35, %v2462_v33  ;;  %v2465_v15 = vadd.f32 %v4728_v43, %v5878_v20  ;;  %v2456_v46 = vpop.f32.mrb[111].mxu0 }
 0x23d   :  { %v2679_v4 = vadd.f32 %v6101_v35, %v2454_v36  ;;  %v2457_v16 = vadd.f32 %v2456_v46, %v5880_v30  ;;  %4861 = vmatprep.mubr.msk.bf16.mxu1 %vm1782_vm2, %v2895_v3 }
 0x23e   :  { %v2682_v34 = vadd.f32 %v6101_v35, %v2465_v15  ;;  %4862 = vmatmul.mubr.msk.bf16.gmra.mrb[172].mxu1 %vm1782_vm2, %v2896_v57  ;;  %v2817_v8 = vmax.f32 %v2681_v29, 0.0 }
 0x23f   :  { %v2680_v60 = vadd.f32 %v6101_v35, %v2457_v16  ;;  %v6129_v1 = vpop.f32.mrb[68].mxu1  ;;  %v2815_v20 = vmax.f32 %v2679_v4, 0.0 }
 0x240   :  { %v2818_v58 = vmax.f32 %v2682_v34, 0.0  ;;  %v6131_v25 = vpop.f32.mrb[69].mxu1 }
 0x241   :  { %v2816_v17 = vmax.f32 %v2680_v60, 0.0  ;;  %v4731_v2 = vpop.f32.mrb[112].mxu0  ;;  %v6133_v5 = vpop.f32.mrb[70].mxu1  ;;  %v6432_v60 = vld [vmem:[#allocation9_spill] sm:$0xff] }
 0x242   :  { %v2898_v30 = vpack.c.bf16 %v2818_v58, %v2817_v8  ;;  %v2478_v13 = vadd.f32 %v4731_v2, %v5895_v53  ;;  %v2469_v14 = vpop.f32.mrb[113].mxu0  ;;  %v6136_v18 = vpop.f32.mrb[71].mxu1 }
 0x243   :  { %v2897_v42 = vpack.c.bf16 %v2816_v17, %v2815_v20  ;;  %v2470_v19 = vadd.f32 %v2469_v14, %v6425_v6  ;;  %v4732_v39 = vpop.f32.mrb[114].mxu0 }
 0x244   :  { %v2685_v61 = vadd.f32 %v6101_v35, %v2478_v13  ;;  %v2481_v54 = vadd.f32 %v4732_v39, %v6426_v27  ;;  %v2472_v62 = vpop.f32.mrb[115].mxu0 }
 0x245   :  { %v2683_v44 = vadd.f32 %v6101_v35, %v2470_v19  ;;  %v2473_v23 = vadd.f32 %v2472_v62, %v6427_v21  ;;  %4865 = vmatprep.mubr.msk.bf16.mxu1 %vm1782_vm2, %v2897_v42  ;;  %v6434_v19 = vld [vmem:[#allocation11_spill] sm:$0xff] }
 0x246   :  { %v2686_v53 = vadd.f32 %v6101_v35, %v2481_v54  ;;  %4866 = vmatmul.mubr.msk.bf16.gmra.mrb[176].mxu1 %vm1782_vm2, %v2898_v30  ;;  %v2821_v22 = vmax.f32 %v2685_v61, 0.0  ;;  %v6433_v30 = vld [vmem:[#allocation10_spill] sm:$0xff]  ;;  %v6435_v54 = vld [vmem:[#allocation12_spill] sm:$0xff] }
 0x247   :  { %v2684_v32 = vadd.f32 %v6101_v35, %v2473_v23  ;;  %v6147_v40 = vpop.f32.mrb[72].mxu1  ;;  %v2819_v9 = vmax.f32 %v2683_v44, 0.0 }
 0x248   :  { %v2822_v45 = vmax.f32 %v2686_v53, 0.0  ;;  %v6149_v48 = vpop.f32.mrb[73].mxu1 }
 0x249   :  { %v2820_v55 = vmax.f32 %v2684_v32, 0.0  ;;  %v4735_v10 = vpop.f32.mrb[116].mxu0  ;;  %v6151_v24 = vpop.f32.mrb[74].mxu1 }
 0x24a   :  { %v2900_v63 = vpack.c.bf16 %v2822_v45, %v2821_v22  ;;  %v2494_v26 = vadd.f32 %v4735_v10, %v6428_v7  ;;  %v2485_v51 = vpop.f32.mrb[117].mxu0  ;;  %v6154_v56 = vpop.f32.mrb[75].mxu1 }
 0x24b   :  { %v2899_v0 = vpack.c.bf16 %v2820_v55, %v2819_v9  ;;  %v2486_v59 = vadd.f32 %v2485_v51, %v6429_v11  ;;  %v4736_v52 = vpop.f32.mrb[118].mxu0  ;;  %v6436_v51 = vld [vmem:[#allocation13_spill] sm:$0xff] }
 0x24c   :  { %v2689_v12 = vadd.f32 %v6101_v35, %v2494_v26  ;;  %v2497_v28 = vadd.f32 %v4736_v52, %v6430_v37  ;;  %v2488_v38 = vpop.f32.mrb[119].mxu0  ;;  %v6437_v37 = vld [vmem:[#allocation14_spill] sm:$0xff] }
 0x24d   :  { %v2687_v31 = vadd.f32 %v6101_v35, %v2486_v59  ;;  %v2489_v41 = vadd.f32 %v2488_v38, %v6431_v49  ;;  %4869 = vmatprep.mubr.msk.bf16.mxu1 %vm1782_vm2, %v2899_v0 }
 0x24e   :  { %v2690_v47 = vadd.f32 %v6101_v35, %v2497_v28  ;;  %4870 = vmatmul.mubr.msk.bf16.gmra.mrb[180].mxu1 %vm1782_vm2, %v2900_v63  ;;  %v2825_v50 = vmax.f32 %v2689_v12, 0.0 }
 0x24f   :  { %v2688_v57 = vadd.f32 %v6101_v35, %v2489_v41  ;;  %v6165_v33 = vpop.f32.mrb[76].mxu1  ;;  %v2823_v29 = vmax.f32 %v2687_v31, 0.0  ;;  %v6438_v41 = vld [vmem:[#allocation15_spill] sm:$0xff] }
 0x250   :  { %v2826_v3 = vmax.f32 %v2690_v47, 0.0  ;;  %v3710_v36 = vmax.f32 %v6129_v1, %v6165_v33  ;;  %v6169_v43 = vpop.f32.mrb[77].mxu1 }
 0x251   :  { %v2824_v15 = vmax.f32 %v2688_v57, 0.0  ;;  %v3708_v46 = vmax.f32 %v6131_v25, %v6169_v43  ;;  %v4739_v4 = vpop.f32.mrb[120].mxu0  ;;  %v6173_v16 = vpop.f32.mrb[78].mxu1 }
 0x252   :  { %v2902_v34 = vpack.c.bf16 %v2826_v3, %v2825_v50  ;;  %v2510_v8 = vadd.f32 %v4739_v4, %v6432_v60  ;;  %v3711_v58 = vmax.f32 %v6133_v5, %v6173_v16  ;;  %v2501_v20 = vpop.f32.mrb[121].mxu0  ;;  %v6178_v17 = vpop.f32.mrb[79].mxu1  ;;  %v6439_v3 = vld [vmem:[#allocation16_spill] sm:$0xff] }
 0x253   :  { %v2901_v2 = vpack.c.bf16 %v2824_v15, %v2823_v29  ;;  %v2502_v13 = vadd.f32 %v2501_v20, %v6433_v30  ;;  %v3709_v14 = vmax.f32 %v6136_v18, %v6178_v17  ;;  %v4740_v42 = vpop.f32.mrb[122].mxu0 }
 0x254   :  { %v2693_v6 = vadd.f32 %v6101_v35, %v2510_v8  ;;  %v2513_v39 = vadd.f32 %v4740_v42, %v6434_v19  ;;  %v2504_v61 = vpop.f32.mrb[123].mxu0  ;;  %v6440_v19 = vld [vmem:[#allocation17_spill] sm:$0xff] }
 0x255   :  { %v2691_v27 = vadd.f32 %v6101_v35, %v2502_v13  ;;  %v2505_v62 = vadd.f32 %v2504_v61, %v6435_v54  ;;  %4873 = vmatprep.mubr.msk.bf16.mxu1 %vm1782_vm2, %v2901_v2 }
 0x256   :  { %v2694_v44 = vadd.f32 %v6101_v35, %v2513_v39  ;;  %4874 = vmatmul.mubr.msk.bf16.gmra.mrb[184].mxu1 %vm1782_vm2, %v2902_v34  ;;  %v2829_v53 = vmax.f32 %v2693_v6, 0.0 }
 0x257   :  { %v2692_v21 = vadd.f32 %v6101_v35, %v2505_v62  ;;  %v6191_v23 = vpop.f32.mrb[80].mxu1  ;;  %v2827_v9 = vmax.f32 %v2691_v27, 0.0  ;;  %v6441_v62 = vld [vmem:[#allocation18_spill] sm:$0xff] }
 0x258   :  { %v2830_v32 = vmax.f32 %v2694_v44, 0.0  ;;  %v3714_v22 = vmax.f32 %v6147_v40, %v6191_v23  ;;  %v6195_v45 = vpop.f32.mrb[81].mxu1 }
 0x259   :  { %v2828_v55 = vmax.f32 %v2692_v21, 0.0  ;;  %v3712_v10 = vmax.f32 %v6149_v48, %v6195_v45  ;;  %v4743_v63 = vpop.f32.mrb[124].mxu0  ;;  %v6199_v7 = vpop.f32.mrb[82].mxu1 }
 0x25a   :  { %v2904_v26 = vpack.c.bf16 %v2830_v32, %v2829_v53  ;;  %v2526_v0 = vadd.f32 %v4743_v63, %v6436_v51  ;;  %v3715_v11 = vmax.f32 %v6151_v24, %v6199_v7  ;;  %v2517_v59 = vpop.f32.mrb[125].mxu0  ;;  %v6204_v52 = vpop.f32.mrb[83].mxu1  ;;  %v6442_v32 = vld [vmem:[#allocation19_spill] sm:$0xff] }
 0x25b   :  { %v2903_v12 = vpack.c.bf16 %v2828_v55, %v2827_v9  ;;  %v2518_v28 = vadd.f32 %v2517_v59, %v6437_v37  ;;  %v3713_v38 = vmax.f32 %v6154_v56, %v6204_v52  ;;  %v4744_v31 = vpop.f32.mrb[126].mxu0 }
 0x25c   :  { %v2697_v49 = vadd.f32 %v6101_v35, %v2526_v0  ;;  %v2529_v47 = vadd.f32 %v4744_v31, %v6438_v41  ;;  %v2520_v57 = vpop.f32.mrb[127].mxu0 }
 0x25d   :  { %v2695_v50 = vadd.f32 %v6101_v35, %v2518_v28  ;;  %v2521_v29 = vadd.f32 %v2520_v57, %v6439_v3  ;;  %4877 = vmatprep.mubr.msk.bf16.mxu1 %vm1782_vm2, %v2903_v12  ;;  %v6444_v3 = vld [vmem:[#allocation21_spill] sm:$0xff] }
 0x25e   :  { %v2698_v15 = vadd.f32 %v6101_v35, %v2529_v47  ;;  %4878 = vmatmul.mubr.msk.bf16.gmra.mrb[188].mxu1 %vm1782_vm2, %v2904_v26  ;;  %v2833_v60 = vmax.f32 %v2697_v49, 0.0  ;;  %v6443_v26 = vld [vmem:[#allocation20_spill] sm:$0xff] }
 0x25f   :  { %v2696_v4 = vadd.f32 %v6101_v35, %v2521_v29  ;;  %v4775_v34 = vpop.f32.mrb[84].mxu1  ;;  %v2831_v2 = vmax.f32 %v2695_v50, 0.0 }
 0x260   :  { %v2834_v8 = vmax.f32 %v2698_v15, 0.0  ;;  %v3229_v20 = vpop.f32.mrb[85].mxu1 }
 0x261   :  { %v2832_v30 = vmax.f32 %v2696_v4, 0.0  ;;  %v4747_v13 = vpop.f32.mrb[128].mxu0  ;;  %v4776_v42 = vpop.f32.mrb[86].mxu1 }
 0x262   :  { %v2906_v6 = vpack.c.bf16 %v2834_v8, %v2833_v60  ;;  %v2542_v39 = vadd.f32 %v4747_v13, %v6440_v19  ;;  %v2533_v61 = vpop.f32.mrb[129].mxu0  ;;  %v3232_v27 = vpop.f32.mrb[87].mxu1  ;;  %v6445_v8 = vld [vmem:[#allocation22_spill] sm:$0xff] }
 0x263   :  { %v2905_v54 = vpack.c.bf16 %v2832_v30, %v2831_v2  ;;  %v2534_v44 = vadd.f32 %v2533_v61, %v6441_v62  ;;  %v4748_v21 = vpop.f32.mrb[130].mxu0 }
 0x264   :  { %v2701_v53 = vadd.f32 %v6101_v35, %v2542_v39  ;;  %v2545_v9 = vadd.f32 %v4748_v21, %v6442_v32  ;;  %v2536_v55 = vpop.f32.mrb[131].mxu0 }
 0x265   :  { %v2699_v63 = vadd.f32 %v6101_v35, %v2534_v44  ;;  %v2537_v51 = vadd.f32 %v2536_v55, %v6443_v26  ;;  %4881 = vmatprep.mubr.msk.bf16.mxu1 %vm1782_vm2, %v2905_v54  ;;  %v6447_v54 = vld [vmem:[#allocation24_spill] sm:$0xff] }
 0x266   :  { %v2702_v0 = vadd.f32 %v6101_v35, %v2545_v9  ;;  %4882 = vmatmul.mubr.msk.bf16.gmra.mrb[192].mxu1 %vm1782_vm2, %v2906_v6  ;;  %v2837_v37 = vmax.f32 %v2701_v53, 0.0  ;;  %v6446_v6 = vld [vmem:[#allocation23_spill] sm:$0xff] }
 0x267   :  { %v2700_v59 = vadd.f32 %v6101_v35, %v2537_v51  ;;  %v4779_v12 = vpop.f32.mrb[88].mxu1  ;;  %v2835_v49 = vmax.f32 %v2699_v63, 0.0 }
 0x268   :  { %v2838_v28 = vmax.f32 %v2702_v0, 0.0  ;;  %v3245_v31 = vpop.f32.mrb[89].mxu1 }
 0x269   :  { %v2836_v41 = vmax.f32 %v2700_v59, 0.0  ;;  %v4751_v47 = vpop.f32.mrb[132].mxu0  ;;  %v4780_v57 = vpop.f32.mrb[90].mxu1 }
 0x26a   :  { %v2908_v50 = vpack.c.bf16 %v2838_v28, %v2837_v37  ;;  %v2558_v29 = vadd.f32 %v4751_v47, %v6444_v3  ;;  %v2549_v15 = vpop.f32.mrb[133].mxu0  ;;  %v3248_v4 = vpop.f32.mrb[91].mxu1 }
 0x26b   :  { %v2907_v60 = vpack.c.bf16 %v2836_v41, %v2835_v49  ;;  %v2550_v2 = vadd.f32 %v2549_v15, %v6445_v8  ;;  %v4752_v30 = vpop.f32.mrb[134].mxu0 }
 0x26c   :  { %v2705_v13 = vadd.f32 %v6101_v35, %v2558_v29  ;;  %v2561_v19 = vadd.f32 %v4752_v30, %v6446_v6  ;;  %v2552_v39 = vpop.f32.mrb[135].mxu0 }
 0x26d   :  { %v2703_v61 = vadd.f32 %v6101_v35, %v2550_v2  ;;  %v2553_v62 = vadd.f32 %v2552_v39, %v6447_v54  ;;  %4885 = vmatprep.mubr.msk.bf16.mxu1 %vm1782_vm2, %v2907_v60 }
 0x26e   :  { %v2706_v44 = vadd.f32 %v6101_v35, %v2561_v19  ;;  %4886 = vmatmul.mubr.msk.bf16.gmra.mrb[196].mxu1 %vm1782_vm2, %v2908_v50  ;;  %v2841_v32 = vmax.f32 %v2705_v13, 0.0 }
 0x26f   :  { %v2704_v21 = vadd.f32 %v6101_v35, %v2553_v62  ;;  %v4783_v53 = vpop.f32.mrb[92].mxu1  ;;  %v2839_v26 = vmax.f32 %v2703_v61, 0.0 }
 0x270   :  { %v2842_v9 = vmax.f32 %v2706_v44, 0.0  ;;  %v3718_v55 = vmax.f32 %v4775_v34, %v4783_v53  ;;  %v3261_v63 = vpop.f32.mrb[93].mxu1 }
 0x271   :  { %v2840_v51 = vmax.f32 %v2704_v21, 0.0  ;;  %v3716_v0 = vmax.f32 %v3229_v20, %v3261_v63  ;;  %v4784_v59 = vpop.f32.mrb[94].mxu1 }
 0x272   :  { %v2910_v37 = vpack.c.bf16 %v2842_v9, %v2841_v32  ;;  %v6240_v28 = vmax.f32 %v3710_v36, %v3718_v55  ;;  %v3719_v49 = vmax.f32 %v4776_v42, %v4784_v59  ;;  %v3264_v41 = vpop.f32.mrb[95].mxu1 }
 0x273   :  { %v2909_v47 = vpack.c.bf16 %v2840_v51, %v2839_v26  ;;  %v6245_v35 = vmax.f32 %v3708_v46, %v3716_v0  ;;  %v3717_v34 = vmax.f32 %v3232_v27, %v3264_v41 }
 0x274   :  { %v6250_v20 = vmax.f32 %v3711_v58, %v3719_v49 }
 0x275   :  { %v6255_v1 = vmax.f32 %v3709_v14, %v3717_v34  ;;  %4889 = vmatprep.mubr.msk.bf16.mxu1 %vm1782_vm2, %v2909_v47 }
 0x276   :  { %4890 = vmatmul.mubr.msk.bf16.gmra.mrb[200].mxu1 %vm1782_vm2, %v2910_v37 }
 0x277   :  { %v4787_v33 = vpop.f32.mrb[96].mxu1 }
 0x278   :  { %v3722_v36 = vmax.f32 %v4779_v12, %v4787_v33  ;;  %v3277_v25 = vpop.f32.mrb[97].mxu1 }
 0x279   :  { %v3720_v43 = vmax.f32 %v3245_v31, %v3277_v25  ;;  %v4788_v46 = vpop.f32.mrb[98].mxu1 }
 0x27a   :  { %v6262_v5 = vmax.f32 %v3714_v22, %v3722_v36  ;;  %v3723_v16 = vmax.f32 %v4780_v57, %v4788_v46  ;;  %v3280_v58 = vpop.f32.mrb[99].mxu1 }
 0x27b   :  { %v6267_v18 = vmax.f32 %v3712_v10, %v3720_v43  ;;  %v3721_v17 = vmax.f32 %v3248_v4, %v3280_v58 }
 0x27c   :  { %v6272_v14 = vmax.f32 %v3715_v11, %v3723_v16 }
 0x27d   :  { %v6277_v42 = vmax.f32 %v3713_v38, %v3721_v17 }
 0x27f   :  { %v4791_v40 = vpop.f32.mrb[100].mxu1 }
 0x280   :  { %v3293_v23 = vpop.f32.mrb[101].mxu1 }
 0x281   :  { %v4792_v22 = vpop.f32.mrb[102].mxu1 }
 0x282   :  { %v3296_v27 = vpop.f32.mrb[103].mxu1 }
 0x287   :  { %v4795_v12 = vpop.f32.mrb[104].mxu1 }
 0x288   :  { %v3309_v31 = vpop.f32.mrb[105].mxu1 }
 0x289   :  { %v4796_v48 = vpop.f32.mrb[106].mxu1 }
 0x28a   :  { %v3312_v45 = vpop.f32.mrb[107].mxu1 }
 0x28f   :  { %v4799_v10 = vpop.f32.mrb[108].mxu1 }
 0x290   :  { %v3726_v57 = vmax.f32 %v4791_v40, %v4799_v10  ;;  %v3325_v50 = vpop.f32.mrb[109].mxu1 }
 0x291   :  { %v3724_v3 = vmax.f32 %v3293_v23, %v3325_v50  ;;  %v4800_v24 = vpop.f32.mrb[110].mxu1 }
 0x292   :  { %v3727_v7 = vmax.f32 %v4792_v22, %v4800_v24  ;;  %v3328_v11 = vpop.f32.mrb[111].mxu1 }
 0x293   :  { %v3725_v29 = vmax.f32 %v3296_v27, %v3328_v11 }
 0x297   :  { %v4803_v15 = vpop.f32.mrb[112].mxu1 }
 0x298   :  { %v3730_v56 = vmax.f32 %v4795_v12, %v4803_v15  ;;  %v3341_v52 = vpop.f32.mrb[113].mxu1 }
 0x299   :  { %v3728_v38 = vmax.f32 %v3309_v31, %v3341_v52  ;;  %v4804_v4 = vpop.f32.mrb[114].mxu1 }
 0x29a   :  { %v3731_v60 = vmax.f32 %v4796_v48, %v4804_v4  ;;  %v3344_v8 = vpop.f32.mrb[115].mxu1 }
 0x29b   :  { %v3729_v2 = vmax.f32 %v3312_v45, %v3344_v8 }
 0x29f   :  { %v4807_v30 = vpop.f32.mrb[116].mxu1 }
 0x2a0   :  { %v3357_v13 = vpop.f32.mrb[117].mxu1 }
 0x2a1   :  { %v4808_v6 = vpop.f32.mrb[118].mxu1 }
 0x2a2   :  { %v3360_v19 = vpop.f32.mrb[119].mxu1 }
 0x2a7   :  { %v4811_v39 = vpop.f32.mrb[120].mxu1 }
 0x2a8   :  { %v3373_v61 = vpop.f32.mrb[121].mxu1 }
 0x2a9   :  { %v4812_v54 = vpop.f32.mrb[122].mxu1 }
 0x2aa   :  { %v3376_v62 = vpop.f32.mrb[123].mxu1 }
 0x2af   :  { %v4815_v44 = vpop.f32.mrb[124].mxu1 }
 0x2b0   :  { %v3734_v21 = vmax.f32 %v4807_v30, %v4815_v44  ;;  %v3389_v53 = vpop.f32.mrb[125].mxu1 }
 0x2b1   :  { %v3732_v32 = vmax.f32 %v3357_v13, %v3389_v53  ;;  %v4816_v9 = vpop.f32.mrb[126].mxu1 }
 0x2b2   :  { %v6279_v55 = vmax.f32 %v3726_v57, %v3734_v21  ;;  %v3735_v63 = vmax.f32 %v4808_v6, %v4816_v9  ;;  %v3392_v26 = vpop.f32.mrb[127].mxu1 }
 0x2b3   :  { %v6281_v51 = vmax.f32 %v3724_v3, %v3732_v32  ;;  %v3733_v0 = vmax.f32 %v3360_v19, %v3392_v26 }
 0x2b4   :  { %v6283_v59 = vmax.f32 %v3727_v7, %v3735_v63  ;;  %v3806_v37 = vmax.f32 %v6240_v28, %v6279_v55 }
 0x2b5   :  { %v6287_v49 = vmax.f32 %v3725_v29, %v3733_v0  ;;  %v3804_v41 = vmax.f32 %v6245_v35, %v6281_v51 }
 0x2b6   :  { %v3807_v47 = vmax.f32 %v6250_v20, %v6283_v59 }
 0x2b7   :  { %v4819_v34 = vpop.f32.mrb[128].mxu1  ;;  %v3805_v33 = vmax.f32 %v6255_v1, %v6287_v49  ;;  %v4249_v1 = vld [vmem:[%s6400_s6] ss:$0 sm:$0xff] }
 0x2b8   :  { %v3738_v36 = vmax.f32 %v4811_v39, %v4819_v34  ;;  %v3405_v25 = vpop.f32.mrb[129].mxu1 }
 0x2b9   :  { %v3736_v43 = vmax.f32 %v3373_v61, %v3405_v25  ;;  %v4820_v46 = vpop.f32.mrb[130].mxu1 }
 0x2ba   :  { %v6295_v16 = vmax.f32 %v3730_v56, %v3738_v36  ;;  %v3739_v58 = vmax.f32 %v4812_v54, %v4820_v46  ;;  %v3408_v17 = vpop.f32.mrb[131].mxu1 }
 0x2bb   :  { %v6297_v40 = vmax.f32 %v3728_v38, %v3736_v43  ;;  %v3737_v23 = vmax.f32 %v3376_v62, %v3408_v17 }
 0x2bc   :  { %v6299_v22 = vmax.f32 %v3731_v60, %v3739_v58  ;;  %v3810_v27 = vmax.f32 %v6262_v5, %v6295_v16 }
 0x2bd   :  { %v6303_v12 = vmax.f32 %v3729_v2, %v3737_v23  ;;  %v3808_v31 = vmax.f32 %v6267_v18, %v6297_v40 }
 0x2be   :  { %v3811_v48 = vmax.f32 %v6272_v14, %v6299_v22 }
 0x2bf   :  { %v4823_v45 = vpop.f32.mrb[132].mxu1  ;;  %v3809_v10 = vmax.f32 %v6277_v42, %v6303_v12 }
 0x2c0   :  { %v3421_v57 = vpop.f32.mrb[133].mxu1 }
 0x2c1   :  { %v4824_v50 = vpop.f32.mrb[134].mxu1 }
 0x2c2   :  { %v3424_v3 = vpop.f32.mrb[135].mxu1 }
 0x2c9   :  { %v4827_v24 = vpop.f32.mrb[136].mxu1 }
 0x2ca   :  { %v3437_v7 = vpop.f32.mrb[137].mxu1 }
 0x2cb   :  { %v4828_v11 = vpop.f32.mrb[138].mxu1 }
 0x2cc   :  { %v3440_v29 = vpop.f32.mrb[139].mxu1 }
 0x2d1   :  { %v4831_v15 = vpop.f32.mrb[140].mxu1 }
 0x2d2   :  { %v3742_v56 = vmax.f32 %v4823_v45, %v4831_v15  ;;  %v3453_v52 = vpop.f32.mrb[141].mxu1 }
 0x2d3   :  { %v3740_v38 = vmax.f32 %v3421_v57, %v3453_v52  ;;  %v4832_v4 = vpop.f32.mrb[142].mxu1 }
 0x2d4   :  { %v3743_v60 = vmax.f32 %v4824_v50, %v4832_v4  ;;  %v3456_v8 = vpop.f32.mrb[143].mxu1 }
 0x2d5   :  { %v3741_v2 = vmax.f32 %v3424_v3, %v3456_v8 }
 0x2d9   :  { %v4835_v30 = vpop.f32.mrb[144].mxu1 }
 0x2da   :  { %v3746_v13 = vmax.f32 %v4827_v24, %v4835_v30  ;;  %v3469_v6 = vpop.f32.mrb[145].mxu1 }
 0x2db   :  { %v3744_v19 = vmax.f32 %v3437_v7, %v3469_v6  ;;  %v4836_v39 = vpop.f32.mrb[146].mxu1 }
 0x2dc   :  { %v3747_v61 = vmax.f32 %v4828_v11, %v4836_v39  ;;  %v3472_v54 = vpop.f32.mrb[147].mxu1 }
 0x2dd   :  { %v3745_v62 = vmax.f32 %v3440_v29, %v3472_v54 }
 0x2e1   :  { %v4839_v44 = vpop.f32.mrb[148].mxu1 }
 0x2e2   :  { %v3485_v21 = vpop.f32.mrb[149].mxu1 }
 0x2e3   :  { %v4840_v53 = vpop.f32.mrb[150].mxu1 }
 0x2e4   :  { %v3488_v32 = vpop.f32.mrb[151].mxu1 }
 0x2e9   :  { %v4843_v9 = vpop.f32.mrb[152].mxu1 }
 0x2ea   :  { %v3501_v63 = vpop.f32.mrb[153].mxu1 }
 0x2eb   :  { %v4844_v26 = vpop.f32.mrb[154].mxu1 }
 0x2ec   :  { %v3504_v0 = vpop.f32.mrb[155].mxu1 }
 0x2f1   :  { %v4847_v34 = vpop.f32.mrb[156].mxu1 }
 0x2f2   :  { %v3750_v36 = vmax.f32 %v4839_v44, %v4847_v34  ;;  %v3517_v25 = vpop.f32.mrb[157].mxu1 }
 0x2f3   :  { %v3748_v43 = vmax.f32 %v3485_v21, %v3517_v25  ;;  %v4848_v46 = vpop.f32.mrb[158].mxu1 }
 0x2f4   :  { %v6311_v58 = vmax.f32 %v3742_v56, %v3750_v36  ;;  %v3751_v17 = vmax.f32 %v4840_v53, %v4848_v46  ;;  %v3520_v23 = vpop.f32.mrb[159].mxu1 }
 0x2f5   :  { %v6313_v45 = vmax.f32 %v3740_v38, %v3748_v43  ;;  %v3749_v57 = vmax.f32 %v3488_v32, %v3520_v23 }
 0x2f6   :  { %v6315_v50 = vmax.f32 %v3743_v60, %v3751_v17 }
 0x2f7   :  { %v6317_v3 = vmax.f32 %v3741_v2, %v3749_v57 }
 0x2f9   :  { %v4851_v24 = vpop.f32.mrb[160].mxu1 }
 0x2fa   :  { %v3754_v7 = vmax.f32 %v4843_v9, %v4851_v24  ;;  %v3533_v11 = vpop.f32.mrb[161].mxu1 }
 0x2fb   :  { %v3752_v29 = vmax.f32 %v3501_v63, %v3533_v11  ;;  %v4852_v15 = vpop.f32.mrb[162].mxu1 }
 0x2fc   :  { %v6319_v52 = vmax.f32 %v3746_v13, %v3754_v7  ;;  %v3755_v4 = vmax.f32 %v4844_v26, %v4852_v15  ;;  %v3536_v8 = vpop.f32.mrb[163].mxu1 }
 0x2fd   :  { %v6321_v56 = vmax.f32 %v3744_v19, %v3752_v29  ;;  %v3753_v30 = vmax.f32 %v3504_v0, %v3536_v8 }
 0x2fe   :  { %v6323_v6 = vmax.f32 %v3747_v61, %v3755_v4 }
 0x2ff   :  { %v6325_v38 = vmax.f32 %v3745_v62, %v3753_v30 }
 0x301   :  { %v4855_v60 = vpop.f32.mrb[164].mxu1 }
 0x302   :  { %v3549_v39 = vpop.f32.mrb[165].mxu1 }
 0x303   :  { %v4856_v2 = vpop.f32.mrb[166].mxu1 }
 0x304   :  { %v3552_v54 = vpop.f32.mrb[167].mxu1 }
 0x309   :  { %v4859_v44 = vpop.f32.mrb[168].mxu1 }
 0x30a   :  { %v3565_v21 = vpop.f32.mrb[169].mxu1 }
 0x30b   :  { %v4860_v53 = vpop.f32.mrb[170].mxu1 }
 0x30c   :  { %v3568_v32 = vpop.f32.mrb[171].mxu1 }
 0x311   :  { %v4863_v9 = vpop.f32.mrb[172].mxu1 }
 0x312   :  { %v3758_v13 = vmax.f32 %v4855_v60, %v4863_v9  ;;  %v3581_v63 = vpop.f32.mrb[173].mxu1 }
 0x313   :  { %v3756_v26 = vmax.f32 %v3549_v39, %v3581_v63  ;;  %v4864_v34 = vpop.f32.mrb[174].mxu1 }
 0x314   :  { %v3759_v19 = vmax.f32 %v4856_v2, %v4864_v34  ;;  %v3584_v36 = vpop.f32.mrb[175].mxu1 }
 0x315   :  { %v3757_v0 = vmax.f32 %v3552_v54, %v3584_v36 }
 0x319   :  { %v4867_v61 = vpop.f32.mrb[176].mxu1 }
 0x31a   :  { %v3762_v25 = vmax.f32 %v4859_v44, %v4867_v61  ;;  %v3597_v62 = vpop.f32.mrb[177].mxu1 }
 0x31b   :  { %v3760_v43 = vmax.f32 %v3565_v21, %v3597_v62  ;;  %v4868_v46 = vpop.f32.mrb[178].mxu1 }
 0x31c   :  { %v3763_v17 = vmax.f32 %v4860_v53, %v4868_v46  ;;  %v3600_v23 = vpop.f32.mrb[179].mxu1 }
 0x31d   :  { %v3761_v57 = vmax.f32 %v3568_v32, %v3600_v23 }
 0x321   :  { %v4871_v24 = vpop.f32.mrb[180].mxu1 }
 0x322   :  { %v3613_v7 = vpop.f32.mrb[181].mxu1 }
 0x323   :  { %v4872_v11 = vpop.f32.mrb[182].mxu1 }
 0x324   :  { %v3616_v29 = vpop.f32.mrb[183].mxu1 }
 0x329   :  { %v4875_v15 = vpop.f32.mrb[184].mxu1 }
 0x32a   :  { %v3629_v4 = vpop.f32.mrb[185].mxu1 }
 0x32b   :  { %v4876_v8 = vpop.f32.mrb[186].mxu1 }
 0x32c   :  { %v3632_v30 = vpop.f32.mrb[187].mxu1 }
 0x331   :  { %v4879_v60 = vpop.f32.mrb[188].mxu1 }
 0x332   :  { %v3766_v39 = vmax.f32 %v4871_v24, %v4879_v60  ;;  %v3645_v2 = vpop.f32.mrb[189].mxu1 }
 0x333   :  { %v3764_v54 = vmax.f32 %v3613_v7, %v3645_v2  ;;  %v4880_v9 = vpop.f32.mrb[190].mxu1 }
 0x334   :  { %v3798_v44 = vmax.f32 %v3758_v13, %v3766_v39  ;;  %v3767_v63 = vmax.f32 %v4872_v11, %v4880_v9  ;;  %v3648_v21 = vpop.f32.mrb[191].mxu1 }
 0x335   :  { %v3796_v34 = vmax.f32 %v3756_v26, %v3764_v54  ;;  %v3765_v53 = vmax.f32 %v3616_v29, %v3648_v21 }
 0x336   :  { %v3799_v36 = vmax.f32 %v3759_v19, %v3767_v63  ;;  %v3814_v32 = vmax.f32 %v6311_v58, %v3798_v44 }
 0x337   :  { %v3797_v61 = vmax.f32 %v3757_v0, %v3765_v53  ;;  %v3812_v62 = vmax.f32 %v6313_v45, %v3796_v34 }
 0x338   :  { %v3822_v46 = vmax.f32 %v3806_v37, %v3814_v32  ;;  %v3815_v23 = vmax.f32 %v6315_v50, %v3799_v36 }
 0x339   :  { %v4883_v24 = vpop.f32.mrb[192].mxu1  ;;  %v3820_v13 = vmax.f32 %v3804_v41, %v3812_v62  ;;  %v3813_v26 = vmax.f32 %v6317_v3, %v3797_v61 }
 0x33a   :  { %v3770_v7 = vmax.f32 %v4875_v15, %v4883_v24  ;;  %v3661_v19 = vpop.f32.mrb[193].mxu1  ;;  %v3823_v58 = vmax.f32 %v3807_v47, %v3815_v23 }
 0x33b   :  { %v3768_v45 = vmax.f32 %v3629_v4, %v3661_v19  ;;  %v4884_v0 = vpop.f32.mrb[194].mxu1  ;;  %v3821_v28 = vmax.f32 %v3805_v33, %v3813_v26 }
 0x33c   :  { %v3802_v55 = vmax.f32 %v3762_v25, %v3770_v7  ;;  %v3771_v37 = vmax.f32 %v4876_v8, %v4884_v0  ;;  %v3664_v50 = vpop.f32.mrb[195].mxu1 }
 0x33d   :  { %v3800_v11 = vmax.f32 %v3760_v43, %v3768_v45  ;;  %v3769_v35 = vmax.f32 %v3632_v30, %v3664_v50 }
 0x33e   :  { %v3803_v51 = vmax.f32 %v3763_v17, %v3771_v37  ;;  %v3818_v41 = vmax.f32 %v6319_v52, %v3802_v55 }
 0x33f   :  { %v3801_v3 = vmax.f32 %v3761_v57, %v3769_v35  ;;  %v3816_v29 = vmax.f32 %v6321_v56, %v3800_v11 }
 0x340   :  { %v3826_v20 = vmax.f32 %v3810_v27, %v3818_v41  ;;  %v3819_v59 = vmax.f32 %v6323_v6, %v3803_v51 }
 0x341   :  { %v4887_v47 = vpop.f32.mrb[196].mxu1  ;;  %v3824_v49 = vmax.f32 %v3808_v31, %v3816_v29  ;;  %v3817_v33 = vmax.f32 %v6325_v38, %v3801_v3 }
 0x342   :  { %v3830_v52 = vmax.f32 %v3822_v46, %v4887_v47  ;;  %v3677_v25 = vpop.f32.mrb[197].mxu1  ;;  %v3827_v5 = vmax.f32 %v3811_v48, %v3819_v59 }
 0x343   :  { %v3828_v16 = vmax.f32 %v3820_v13, %v3677_v25  ;;  %v4888_v27 = vpop.f32.mrb[198].mxu1  ;;  %v3825_v56 = vmax.f32 %v3809_v10, %v3817_v33 }
 0x344   :  { %v3845_v6 = vadd.f32 %v4249_v1, %v3830_v52  ;;  %v3831_v43 = vmax.f32 %v3823_v58, %v4888_v27  ;;  %v3680_v17 = vpop.f32.mrb[199].mxu1 }
 0x345   :  { %v3843_v57 = vadd.f32 %v4249_v1, %v3828_v16  ;;  %v3829_v18 = vmax.f32 %v3821_v28, %v3680_v17 }
 0x346   :  { %v3853_v40 = vmax.f32 %v3845_v6, 0.0  ;;  %v3846_v31 = vadd.f32 %v4249_v1, %v3831_v43 }
 0x347   :  { %v3851_v38 = vmax.f32 %v3843_v57, 0.0  ;;  %v3844_v15 = vadd.f32 %v4249_v1, %v3829_v18 }
 0x348   :  { %v4260_v4 = vpack.c.bf16 %v3853_v40, %v3853_v40  ;;  %v3854_v8 = vmax.f32 %v3846_v31, 0.0 }
 0x349   :  { %v4258_v14 = vpack.c.bf16 %v3851_v38, %v3851_v38  ;;  %v3852_v22 = vmax.f32 %v3844_v15, 0.0  ;;  %v4891_v48 = vpop.f32.mrb[200].mxu1 }
 0x34a   :  { %3894 = vst.msk [vmem:[%s6401_s7 + $0x8] sm:$0xf] %vm3891_vm3, %v4260_v4  ;;  %v4261_v42 = vpack.c.bf16 %v3854_v8, %v3854_v8  ;;  %v3834_v12 = vmax.f32 %v3826_v20, %v4891_v48  ;;  %v3693_v10 = vpop.f32.mrb[201].mxu1 }
 0x34b   :  { %3892 = vst.msk [vmem:[%s6401_s7] sm:$0xf] %vm3891_vm3, %v4258_v14  ;;  %v4259_v30 = vpack.c.bf16 %v3852_v22, %v3852_v22  ;;  %v3832_v60 = vmax.f32 %v3824_v49, %v3693_v10  ;;  %v4892_v39 = vpop.f32.mrb[202].mxu1 }
 0x34c   :  { %3895 = vst.msk [vmem:[%s6401_s7 + $0xc] sm:$0xf] %vm3891_vm3, %v4261_v42  ;;  %v3849_v2 = vadd.f32 %v4249_v1, %v3834_v12  ;;  %v3835_v54 = vmax.f32 %v3827_v5, %v4892_v39  ;;  %v3696_v9 = vpop.f32.mrb[203].mxu1 }
 0x34d   :  { %3893 = vst.msk [vmem:[%s6401_s7 + $0x4] sm:$0xf] %vm3891_vm3, %v4259_v30  ;;  %v3847_v44 = vadd.f32 %v4249_v1, %v3832_v60  ;;  %v3833_v63 = vmax.f32 %v3825_v56, %v3696_v9 }
 0x34e   :  { %v3857_v21 = vmax.f32 %v3849_v2, 0.0  ;;  %v3850_v34 = vadd.f32 %v4249_v1, %v3835_v54 }
 0x34f   :  { %v3855_v53 = vmax.f32 %v3847_v44, 0.0  ;;  %v3848_v36 = vadd.f32 %v4249_v1, %v3833_v63 }
 0x350   :  { %v4264_v32 = vpack.c.bf16 %v3857_v21, %v3857_v21  ;;  %v3858_v61 = vmax.f32 %v3850_v34, 0.0 }
 0x351   :  { %v4262_v62 = vpack.c.bf16 %v3855_v53, %v3855_v53  ;;  %v3856_v46 = vmax.f32 %v3848_v36, 0.0 }
 0x352   :  { %3898 = vst.msk [vmem:[%s6401_s7 + $0x18] sm:$0xf] %vm3891_vm3, %v4264_v32  ;;  %v4265_v23 = vpack.c.bf16 %v3858_v61, %v3858_v61 }
 0x353   :  { %3896 = vst.msk [vmem:[%s6401_s7 + $0x10] sm:$0xf] %vm3891_vm3, %v4262_v62  ;;  %v4263_v24 = vpack.c.bf16 %v3856_v46, %v3856_v46 }
 0x354   :  { %3899 = vst.msk [vmem:[%s6401_s7 + $0x1c] sm:$0xf] %vm3891_vm3, %v4265_v23 }
 0x355   :  { %3897 = vst.msk [vmem:[%s6401_s7 + $0x14] sm:$0xf] %vm3891_vm3, %v4263_v24 }

</bundles_post_ra>
